<compile_context>
chip_gen: v7x
topology: tpu7x:2x2x1
jax: 0.10.0
libtpu: 0.0.40
codegen_flags: <defaults>
</compile_context>

<pallas_src>
import jax
import jax.numpy as jnp
from jax.experimental import pallas as pl
from jax.experimental.pallas import tpu as pltpu

# ----- static configuration (small shapes for the demo) ----------------------
ATOM_FEATURE_DIMS = (119, 4, 12, 12, 10, 6, 6, 2, 2)   # OGB get_atom_feature_dims()
BOND_FEATURE_DIMS = (5, 6, 2)                           # OGB get_bond_feature_dims()
HIDDEN_DIM = 128
TARGET_DIM = 8
DEPTH = 3
NUM_NODES = 16
NUM_EDGES = 32
NUM_GRAPHS = 2
BN_EPS = 1e-5

# lane-friendly padded sizes
ATOM_K_PAD = 256          # sum(ATOM_FEATURE_DIMS) = 173 -> 256
BOND_K_PAD = 128          # sum(BOND_FEATURE_DIMS) = 13  -> 128
NUM_GRAPHS_PAD = 8        # pooled rows padded (extra graphs have zero mass)
OUT_PAD = 128             # lane-dense output block; sliced to TARGET_DIM outside


# ----- the Pallas kernel ------------------------------------------------------
def _geomol_kernel(*refs):
    (atom_feat, bond_feat, row, col, col_t, batch_t, inv_counts,
     atom_tab, bond_tab,
     ni_w1, ni_b1, ni_w2, ni_b2,
     ei_w1, ei_b1, ei_w2, ei_b2,
     em_we, em_be, em_wio, em_mw1, em_mb1, em_mw2, em_mb2,
     nm_w1, nm_b1, nm_w2, nm_b2,
     ro_w1, ro_b1, ro_w2, ro_b2,
     out_ref) = refs

    f32 = jnp.float32
    bf16 = jnp.bfloat16
    N = atom_feat.shape[0]
    E = bond_feat.shape[0]
    G = out_ref.shape[0]
    H = HIDDEN_DIM

    def linear(h, w, b=None):
        # h: f32 activation; w: bf16 weight (value); b: f32 bias (value).
        y = jnp.dot(h.astype(bf16), w, preferred_element_type=f32)
        if b is not None:
            y = y + b
        return y

    def mlp2(h, w1, b1, w2, b2):
        # GeomolMLP(num_layers=2): Linear -> BatchNorm(eval, folded) -> ReLU -> Linear
        h = jnp.maximum(linear(h, w1, b1), 0.0)
        return linear(h, w2, b2)

    def encode(feat_ref, n_rows, dims, k_pad, tab):
        # OGB Atom/BondEncoder: sum_i Embedding_i(feat[:, i]) == multihot @ stacked_table
        # (table zero-padded to a lane multiple; the few compare/accumulate passes
        #  over [rows, k_pad] are negligible VPU filler at these shapes)
        iota = jax.lax.broadcasted_iota(jnp.int32, (n_rows, k_pad), 1)
        multihot = jnp.zeros((n_rows, k_pad), f32)
        off = 0
        for i, d in enumerate(dims):
            idx = feat_ref[:, i:i + 1] + off           # [rows, 1]
            multihot = multihot + (iota == idx).astype(f32)
            off += d
        return jnp.dot(multihot.astype(bf16), tab, preferred_element_type=f32)

    # --- encoders + init MLPs ---
    x = encode(atom_feat, N, ATOM_FEATURE_DIMS, ATOM_K_PAD, atom_tab[...])   # [N, H]
    e = encode(bond_feat, E, BOND_FEATURE_DIMS, BOND_K_PAD, bond_tab[...])   # [E, H]
    x = mlp2(x, ni_w1[...], ni_b1[...], ni_w2[...], ni_b2[...])
    e = mlp2(e, ei_w1[...], ei_b1[...], ei_w2[...], ei_b2[...])

    # --- one-hot matrices (built once, transpose-free, bf16 for the MXU) ---
    iota_en = jax.lax.broadcasted_iota(jnp.int32, (E, N), 1)
    p_row = (iota_en == row[...]).astype(bf16)          # [E, N] : x[row] gather
    p_col = (iota_en == col[...]).astype(bf16)          # [E, N] : x[col] gather
    iota_ne = jax.lax.broadcasted_iota(jnp.int32, (N, E), 0)
    p_colT = (iota_ne == col_t[...]).astype(bf16)       # [N, E] : scatter_add(e, col)
    iota_gn = jax.lax.broadcasted_iota(jnp.int32, (G, N), 0)
    p_batchT = (iota_gn == batch_t[...]).astype(bf16)   # [G, N] : per-graph pooling

    # --- hoist the shared (depth-loop) weights out of the unrolled loop ---
    em_we_v, em_be_v, em_wio_v = em_we[...], em_be[...], em_wio[...]
    em_mw1_v, em_mb1_v, em_mw2_v, em_mb2_v = em_mw1[...], em_mb1[...], em_mw2[...], em_mb2[...]
    nm_w1_v, nm_b1_v, nm_w2_v, nm_b2_v = nm_w1[...], nm_b1[...], nm_w2[...], nm_b2[...]

    # --- depth iterations of the (shared-weight) MetaLayer update ---
    for _ in range(DEPTH):
        x_bf = x.astype(bf16)
        e_bf = e.astype(bf16)
        # EdgeModel -- project on nodes first (N <= E), one fused [H, 2H] matmul,
        # then gather the projected features with the one-hot matrices.
        x_io = jnp.dot(x_bf, em_wio_v, preferred_element_type=f32)            # [N, 2H]
        f_i = jnp.dot(p_row, x_io[:, :H].astype(bf16), preferred_element_type=f32)   # Win*x[row]
        f_j = jnp.dot(p_col, x_io[:, H:].astype(bf16), preferred_element_type=f32)   # Wout*x[col]
        f_ij = jnp.dot(e_bf, em_we_v, preferred_element_type=f32) + em_be_v
        h = jnp.maximum(f_ij + f_i + f_j, 0.0)
        e = mlp2(h, em_mw1_v, em_mb1_v, em_mw2_v, em_mb2_v) + e
        # NodeModel: scatter_add(e, col) -> MLP -> residual
        agg = jnp.dot(p_colT, e.astype(bf16), preferred_element_type=f32)     # [N, H]
        x = x + mlp2(agg, nm_w1_v, nm_b1_v, nm_w2_v, nm_b2_v)

    # --- global mean pool (reciprocal counts precomputed in the wrapper) ---
    pooled = jnp.dot(p_batchT, x.astype(bf16), preferred_element_type=f32)    # [G, H]
    pooled = pooled * inv_counts[...]

    # --- readout MLP (FCLayer(H->H, BN, ReLU) -> FCLayer(H->OUT_PAD)) ---
    h = jnp.maximum(linear(pooled, ro_w1[...], ro_b1[...]), 0.0)
    out_ref[...] = linear(h, ro_w2[...], ro_b2[...])                          # [G, 128] lane-dense


def geomol_gnn_wrapper_forward(inputs, params):
    atom_feat, bond_feat, row, col, batch = inputs
    # row-vector index copies so the kernel never transposes; reciprocal node
    # counts so pooling is a multiply (and empty/padded graphs don't divide by 0)
    col_t = col.reshape(1, -1).astype(jnp.int32)          # [1, E]
    batch_t = batch.reshape(1, -1).astype(jnp.int32)      # [1, N]
    counts = jnp.sum(
        (batch == jnp.arange(NUM_GRAPHS_PAD, dtype=jnp.int32)[None, :]).astype(jnp.float32),
        axis=0)                                            # [G_PAD]
    inv_counts = jnp.where(counts > 0.0, 1.0 / jnp.maximum(counts, 1.0), 0.0)
    inv_counts = inv_counts[:, None].astype(jnp.float32)   # [G_PAD, 1]

    flat = [atom_feat, bond_feat, row, col, col_t, batch_t, inv_counts] + list(params)
    out = pl.pallas_call(
        _geomol_kernel,
        out_shape=jax.ShapeDtypeStruct((NUM_GRAPHS_PAD, OUT_PAD), jnp.float32),
        in_specs=[pl.BlockSpec(memory_space=pltpu.MemorySpace.VMEM)] * len(flat),
        out_specs=pl.BlockSpec(memory_space=pltpu.MemorySpace.VMEM),
        # total resident data is ~1 MB (bf16 weights); 16 MiB leaves ample
        # headroom on every generation (v7x physical VMEM is only 64 MiB).
        compiler_params=pltpu.CompilerParams(vmem_limit_bytes=16 << 20),
    )(*flat)
    # slice the lane-dense [G_PAD, 128] block down to the real output
    return out[:NUM_GRAPHS, :TARGET_DIM]


# ----- deterministic parameter construction (JAX glue) ------------------------
def _fold_bn(w, b, gamma, beta, mean, var, eps=BN_EPS):
    # eval-mode BatchNorm folded exactly into the preceding Linear ([in,out] w, [1,out] b)
    scale = gamma / jnp.sqrt(var + eps)
    w_f = w * scale[None, :]
    b_f = (b - mean[None, :]) * scale[None, :] + beta[None, :]
    return w_f, b_f


def init_params(key):
    state = {"key": key}
    bf16 = jnp.bfloat16

    def nxt():
        state["key"], sub = jax.random.split(state["key"])
        return sub

    def lin(in_dim, out_dim, bias=True, scale=0.05):
        w = scale * jax.random.normal(nxt(), (in_dim, out_dim), jnp.float32)
        b = (scale * jax.random.normal(nxt(), (1, out_dim), jnp.float32)) if bias else None
        return w, b

    def bn(dim):
        gamma = 1.0 + 0.1 * jax.random.normal(nxt(), (dim,), jnp.float32)
        beta = 0.1 * jax.random.normal(nxt(), (dim,), jnp.float32)
        mean = 0.1 * jax.random.normal(nxt(), (dim,), jnp.float32)
        var = 1.0 + 0.1 * jax.random.uniform(nxt(), (dim,), jnp.float32)
        return gamma, beta, mean, var

    def geomol_mlp2(dim):
        w1, b1 = lin(dim, dim)
        w1, b1 = _fold_bn(w1, b1, *bn(dim))
        w2, b2 = lin(dim, dim)
        # MXU operands in bf16; biases stay f32 (added on the VPU)
        return w1.astype(bf16), b1, w2.astype(bf16), b2

    H, T = HIDDEN_DIM, TARGET_DIM

    atom_tab = 0.1 * jax.random.normal(nxt(), (sum(ATOM_FEATURE_DIMS), H), jnp.float32)
    bond_tab = 0.1 * jax.random.normal(nxt(), (sum(BOND_FEATURE_DIMS), H), jnp.float32)
    atom_tab = jnp.pad(atom_tab, ((0, ATOM_K_PAD - atom_tab.shape[0]), (0, 0))).astype(bf16)
    bond_tab = jnp.pad(bond_tab, ((0, BOND_K_PAD - bond_tab.shape[0]), (0, 0))).astype(bf16)

    ni = geomol_mlp2(H)                                  # node_init
    ei = geomol_mlp2(H)                                  # edge_init

    em_we, em_be = lin(H, H)                             # EdgeModel.edge (bias)
    em_win, _ = lin(H, H, bias=False)                    # EdgeModel.node_in (no bias)
    em_wout, _ = lin(H, H, bias=False)                   # EdgeModel.node_out (no bias)
    em_we = em_we.astype(bf16)
    em_wio = jnp.concatenate([em_win, em_wout], axis=1).astype(bf16)   # fused [H, 2H]
    em_mlp = geomol_mlp2(H)                              # EdgeModel.mlp (n_layers=2)

    nm = geomol_mlp2(H)                                  # NodeModel MLP (n_layers=2)

    ro_w1, ro_b1 = lin(H, H)                             # readout FC1 + BN + ReLU
    ro_w1, ro_b1 = _fold_bn(ro_w1, ro_b1, *bn(H))
    ro_w2, ro_b2 = lin(H, T)                             # readout FC2 (linear)
    ro_w1 = ro_w1.astype(bf16)
    ro_w2 = jnp.pad(ro_w2, ((0, 0), (0, OUT_PAD - T))).astype(bf16)    # lane-dense output
    ro_b2 = jnp.pad(ro_b2, ((0, 0), (0, OUT_PAD - T)))

    return (atom_tab, bond_tab,
            *ni, *ei,
            em_we, em_be, em_wio, *em_mlp,
            *nm,
            ro_w1, ro_b1, ro_w2, ro_b2)


def make_inputs(key):
    k_atom, k_bond, k_edge = jax.random.split(key, 3)
    atom_feat = jnp.stack(
        [jax.random.randint(jax.random.fold_in(k_atom, i), (NUM_NODES,), 0, d)
         for i, d in enumerate(ATOM_FEATURE_DIMS)], axis=1).astype(jnp.int32)       # data.z: [N, 9]
    bond_feat = jnp.stack(
        [jax.random.randint(jax.random.fold_in(k_bond, i), (NUM_EDGES,), 0, d)
         for i, d in enumerate(BOND_FEATURE_DIMS)], axis=1).astype(jnp.int32)       # edge_attr: [E, 3]
    edge_index = jax.random.randint(k_edge, (2, NUM_EDGES), 0, NUM_NODES).astype(jnp.int32)
    row = edge_index[0][:, None]                                                    # [E, 1]
    col = edge_index[1][:, None]                                                    # [E, 1]
    batch = jnp.concatenate(
        [jnp.zeros((NUM_NODES // 2,), jnp.int32),
         jnp.ones((NUM_NODES - NUM_NODES // 2,), jnp.int32)])[:, None]              # [N, 1]
    return (atom_feat, bond_feat, row, col, batch)


# TODO(synk): dense one-hot gather/scatter is only appropriate at demo scale; for
# production N/E it must be replaced with index-driven edge/node tiling
# (PrefetchScalarGridSpec + a parallel grid axis for v7x's two TensorCores).

if __name__ == "__main__":
    key = jax.random.PRNGKey(0)
    k_in, k_par = jax.random.split(key)
    inputs = make_inputs(k_in)
    params = init_params(k_par)

    out = geomol_gnn_wrapper_forward(inputs, params)
    out = jax.block_until_ready(out)

    assert out.shape == (NUM_GRAPHS, TARGET_DIM), out.shape
    assert bool(jnp.all(jnp.isfinite(out)))
    print("KERNEL_OK")
</pallas_src>

<mosaic_0001>
module attributes {stable_mosaic.version = 11 : i64} {
  func.func @_geomol_kernel(%arg0: memref<16x9xi32, #tpu.memory_space<vmem>>, %arg1: memref<32x3xi32, #tpu.memory_space<vmem>>, %arg2: memref<32x1xi32, #tpu.memory_space<vmem>>, %arg3: memref<32x1xi32, #tpu.memory_space<vmem>>, %arg4: memref<1x32xi32, #tpu.memory_space<vmem>>, %arg5: memref<1x16xi32, #tpu.memory_space<vmem>>, %arg6: memref<8x1xf32, #tpu.memory_space<vmem>>, %arg7: memref<256x128xbf16, #tpu.memory_space<vmem>>, %arg8: memref<128x128xbf16, #tpu.memory_space<vmem>>, %arg9: memref<128x128xbf16, #tpu.memory_space<vmem>>, %arg10: memref<1x128xf32, #tpu.memory_space<vmem>>, %arg11: memref<128x128xbf16, #tpu.memory_space<vmem>>, %arg12: memref<1x128xf32, #tpu.memory_space<vmem>>, %arg13: memref<128x128xbf16, #tpu.memory_space<vmem>>, %arg14: memref<1x128xf32, #tpu.memory_space<vmem>>, %arg15: memref<128x128xbf16, #tpu.memory_space<vmem>>, %arg16: memref<1x128xf32, #tpu.memory_space<vmem>>, %arg17: memref<128x128xbf16, #tpu.memory_space<vmem>>, %arg18: memref<1x128xf32, #tpu.memory_space<vmem>>, %arg19: memref<128x256xbf16, #tpu.memory_space<vmem>>, %arg20: memref<128x128xbf16, #tpu.memory_space<vmem>>, %arg21: memref<1x128xf32, #tpu.memory_space<vmem>>, %arg22: memref<128x128xbf16, #tpu.memory_space<vmem>>, %arg23: memref<1x128xf32, #tpu.memory_space<vmem>>, %arg24: memref<128x128xbf16, #tpu.memory_space<vmem>>, %arg25: memref<1x128xf32, #tpu.memory_space<vmem>>, %arg26: memref<128x128xbf16, #tpu.memory_space<vmem>>, %arg27: memref<1x128xf32, #tpu.memory_space<vmem>>, %arg28: memref<128x128xbf16, #tpu.memory_space<vmem>>, %arg29: memref<1x128xf32, #tpu.memory_space<vmem>>, %arg30: memref<128x128xbf16, #tpu.memory_space<vmem>>, %arg31: memref<1x128xf32, #tpu.memory_space<vmem>>, %arg32: memref<8x128xf32, #tpu.memory_space<vmem>>) attributes {dimension_semantics = [], scalar_prefetch = 0 : i64, scratch_operands = 0 : i64, tpu.core_type = #tpu.core_type<tc>} {
    %c0 = arith.constant 0 : index
    %c0_0 = arith.constant 0 : index
    %0 = vector.load %arg7[%c0, %c0_0] : memref<256x128xbf16, #tpu.memory_space<vmem>>, vector<256x128xbf16>
    %1 = tpu.iota {dimensions = array<i32: 1>} : vector<16x256xi32>
    %cst = arith.constant 0.000000e+00 : f32
    %2 = vector.broadcast %cst : f32 to vector<16x256xf32>
    %c0_1 = arith.constant 0 : index
    %c0_2 = arith.constant 0 : index
    %3 = vector.load %arg0[%c0_1, %c0_2] : memref<16x9xi32, #tpu.memory_space<vmem>>, vector<16x1xi32>
    %c0_i32 = arith.constant 0 : i32
    %4 = vector.broadcast %c0_i32 : i32 to vector<16x1xi32>
    %5 = arith.addi %3, %4 : vector<16x1xi32>
    %6 = vector.broadcast %5 : vector<16x1xi32> to vector<16x256xi32>
    %7 = arith.cmpi eq, %1, %6 : vector<16x256xi32>
    %8 = arith.extui %7 : vector<16x256xi1> to vector<16x256xi32>
    %9 = arith.sitofp %8 : vector<16x256xi32> to vector<16x256xf32>
    %10 = arith.addf %2, %9 : vector<16x256xf32>
    %c0_3 = arith.constant 0 : index
    %c1 = arith.constant 1 : index
    %11 = vector.load %arg0[%c0_3, %c1] : memref<16x9xi32, #tpu.memory_space<vmem>>, vector<16x1xi32>
    %c119_i32 = arith.constant 119 : i32
    %12 = vector.broadcast %c119_i32 : i32 to vector<16x1xi32>
    %13 = arith.addi %11, %12 : vector<16x1xi32>
    %14 = vector.broadcast %13 : vector<16x1xi32> to vector<16x256xi32>
    %15 = arith.cmpi eq, %1, %14 : vector<16x256xi32>
    %16 = arith.extui %15 : vector<16x256xi1> to vector<16x256xi32>
    %17 = arith.sitofp %16 : vector<16x256xi32> to vector<16x256xf32>
    %18 = arith.addf %10, %17 : vector<16x256xf32>
    %c0_4 = arith.constant 0 : index
    %c2 = arith.constant 2 : index
    %19 = vector.load %arg0[%c0_4, %c2] : memref<16x9xi32, #tpu.memory_space<vmem>>, vector<16x1xi32>
    %c123_i32 = arith.constant 123 : i32
    %20 = vector.broadcast %c123_i32 : i32 to vector<16x1xi32>
    %21 = arith.addi %19, %20 : vector<16x1xi32>
    %22 = vector.broadcast %21 : vector<16x1xi32> to vector<16x256xi32>
    %23 = arith.cmpi eq, %1, %22 : vector<16x256xi32>
    %24 = arith.extui %23 : vector<16x256xi1> to vector<16x256xi32>
    %25 = arith.sitofp %24 : vector<16x256xi32> to vector<16x256xf32>
    %26 = arith.addf %18, %25 : vector<16x256xf32>
    %c0_5 = arith.constant 0 : index
    %c3 = arith.constant 3 : index
    %27 = vector.load %arg0[%c0_5, %c3] : memref<16x9xi32, #tpu.memory_space<vmem>>, vector<16x1xi32>
    %c135_i32 = arith.constant 135 : i32
    %28 = vector.broadcast %c135_i32 : i32 to vector<16x1xi32>
    %29 = arith.addi %27, %28 : vector<16x1xi32>
    %30 = vector.broadcast %29 : vector<16x1xi32> to vector<16x256xi32>
    %31 = arith.cmpi eq, %1, %30 : vector<16x256xi32>
    %32 = arith.extui %31 : vector<16x256xi1> to vector<16x256xi32>
    %33 = arith.sitofp %32 : vector<16x256xi32> to vector<16x256xf32>
    %34 = arith.addf %26, %33 : vector<16x256xf32>
    %c0_6 = arith.constant 0 : index
    %c4 = arith.constant 4 : index
    %35 = vector.load %arg0[%c0_6, %c4] : memref<16x9xi32, #tpu.memory_space<vmem>>, vector<16x1xi32>
    %c147_i32 = arith.constant 147 : i32
    %36 = vector.broadcast %c147_i32 : i32 to vector<16x1xi32>
    %37 = arith.addi %35, %36 : vector<16x1xi32>
    %38 = vector.broadcast %37 : vector<16x1xi32> to vector<16x256xi32>
    %39 = arith.cmpi eq, %1, %38 : vector<16x256xi32>
    %40 = arith.extui %39 : vector<16x256xi1> to vector<16x256xi32>
    %41 = arith.sitofp %40 : vector<16x256xi32> to vector<16x256xf32>
    %42 = arith.addf %34, %41 : vector<16x256xf32>
    %c0_7 = arith.constant 0 : index
    %c5 = arith.constant 5 : index
    %43 = vector.load %arg0[%c0_7, %c5] : memref<16x9xi32, #tpu.memory_space<vmem>>, vector<16x1xi32>
    %c157_i32 = arith.constant 157 : i32
    %44 = vector.broadcast %c157_i32 : i32 to vector<16x1xi32>
    %45 = arith.addi %43, %44 : vector<16x1xi32>
    %46 = vector.broadcast %45 : vector<16x1xi32> to vector<16x256xi32>
    %47 = arith.cmpi eq, %1, %46 : vector<16x256xi32>
    %48 = arith.extui %47 : vector<16x256xi1> to vector<16x256xi32>
    %49 = arith.sitofp %48 : vector<16x256xi32> to vector<16x256xf32>
    %50 = arith.addf %42, %49 : vector<16x256xf32>
    %c0_8 = arith.constant 0 : index
    %c6 = arith.constant 6 : index
    %51 = vector.load %arg0[%c0_8, %c6] : memref<16x9xi32, #tpu.memory_space<vmem>>, vector<16x1xi32>
    %c163_i32 = arith.constant 163 : i32
    %52 = vector.broadcast %c163_i32 : i32 to vector<16x1xi32>
    %53 = arith.addi %51, %52 : vector<16x1xi32>
    %54 = vector.broadcast %53 : vector<16x1xi32> to vector<16x256xi32>
    %55 = arith.cmpi eq, %1, %54 : vector<16x256xi32>
    %56 = arith.extui %55 : vector<16x256xi1> to vector<16x256xi32>
    %57 = arith.sitofp %56 : vector<16x256xi32> to vector<16x256xf32>
    %58 = arith.addf %50, %57 : vector<16x256xf32>
    %c0_9 = arith.constant 0 : index
    %c7 = arith.constant 7 : index
    %59 = vector.load %arg0[%c0_9, %c7] : memref<16x9xi32, #tpu.memory_space<vmem>>, vector<16x1xi32>
    %c169_i32 = arith.constant 169 : i32
    %60 = vector.broadcast %c169_i32 : i32 to vector<16x1xi32>
    %61 = arith.addi %59, %60 : vector<16x1xi32>
    %62 = vector.broadcast %61 : vector<16x1xi32> to vector<16x256xi32>
    %63 = arith.cmpi eq, %1, %62 : vector<16x256xi32>
    %64 = arith.extui %63 : vector<16x256xi1> to vector<16x256xi32>
    %65 = arith.sitofp %64 : vector<16x256xi32> to vector<16x256xf32>
    %66 = arith.addf %58, %65 : vector<16x256xf32>
    %c0_10 = arith.constant 0 : index
    %c8 = arith.constant 8 : index
    %67 = vector.load %arg0[%c0_10, %c8] : memref<16x9xi32, #tpu.memory_space<vmem>>, vector<16x1xi32>
    %c171_i32 = arith.constant 171 : i32
    %68 = vector.broadcast %c171_i32 : i32 to vector<16x1xi32>
    %69 = arith.addi %67, %68 : vector<16x1xi32>
    %70 = vector.broadcast %69 : vector<16x1xi32> to vector<16x256xi32>
    %71 = arith.cmpi eq, %1, %70 : vector<16x256xi32>
    %72 = arith.extui %71 : vector<16x256xi1> to vector<16x256xi32>
    %73 = arith.sitofp %72 : vector<16x256xi32> to vector<16x256xf32>
    %74 = arith.addf %66, %73 : vector<16x256xf32>
    %75 = arith.truncf %74 : vector<16x256xf32> to vector<16x256xbf16>
    %cst_11 = arith.constant dense<0.000000e+00> : vector<16x128xf32>
    %76 = tpu.matmul %75, %0, %cst_11 {dimension_numbers = #tpu.dot_dimension_numbers<[1], [0], [0], [1], [0, 0, 1, 1], [], []>} : vector<16x256xbf16>, vector<256x128xbf16>, vector<16x128xf32> -> vector<16x128xf32>
    %c0_12 = arith.constant 0 : index
    %c0_13 = arith.constant 0 : index
    %77 = vector.load %arg8[%c0_12, %c0_13] : memref<128x128xbf16, #tpu.memory_space<vmem>>, vector<128x128xbf16>
    %78 = tpu.iota {dimensions = array<i32: 1>} : vector<32x128xi32>
    %cst_14 = arith.constant 0.000000e+00 : f32
    %79 = vector.broadcast %cst_14 : f32 to vector<32x128xf32>
    %c0_15 = arith.constant 0 : index
    %c0_16 = arith.constant 0 : index
    %80 = vector.load %arg1[%c0_15, %c0_16] : memref<32x3xi32, #tpu.memory_space<vmem>>, vector<32x1xi32>
    %c0_i32_17 = arith.constant 0 : i32
    %81 = vector.broadcast %c0_i32_17 : i32 to vector<32x1xi32>
    %82 = arith.addi %80, %81 : vector<32x1xi32>
    %83 = vector.broadcast %82 : vector<32x1xi32> to vector<32x128xi32>
    %84 = arith.cmpi eq, %78, %83 : vector<32x128xi32>
    %85 = arith.extui %84 : vector<32x128xi1> to vector<32x128xi32>
    %86 = arith.sitofp %85 : vector<32x128xi32> to vector<32x128xf32>
    %87 = arith.addf %79, %86 : vector<32x128xf32>
    %c0_18 = arith.constant 0 : index
    %c1_19 = arith.constant 1 : index
    %88 = vector.load %arg1[%c0_18, %c1_19] : memref<32x3xi32, #tpu.memory_space<vmem>>, vector<32x1xi32>
    %c5_i32 = arith.constant 5 : i32
    %89 = vector.broadcast %c5_i32 : i32 to vector<32x1xi32>
    %90 = arith.addi %88, %89 : vector<32x1xi32>
    %91 = vector.broadcast %90 : vector<32x1xi32> to vector<32x128xi32>
    %92 = arith.cmpi eq, %78, %91 : vector<32x128xi32>
    %93 = arith.extui %92 : vector<32x128xi1> to vector<32x128xi32>
    %94 = arith.sitofp %93 : vector<32x128xi32> to vector<32x128xf32>
    %95 = arith.addf %87, %94 : vector<32x128xf32>
    %c0_20 = arith.constant 0 : index
    %c2_21 = arith.constant 2 : index
    %96 = vector.load %arg1[%c0_20, %c2_21] : memref<32x3xi32, #tpu.memory_space<vmem>>, vector<32x1xi32>
    %c11_i32 = arith.constant 11 : i32
    %97 = vector.broadcast %c11_i32 : i32 to vector<32x1xi32>
    %98 = arith.addi %96, %97 : vector<32x1xi32>
    %99 = vector.broadcast %98 : vector<32x1xi32> to vector<32x128xi32>
    %100 = arith.cmpi eq, %78, %99 : vector<32x128xi32>
    %101 = arith.extui %100 : vector<32x128xi1> to vector<32x128xi32>
    %102 = arith.sitofp %101 : vector<32x128xi32> to vector<32x128xf32>
    %103 = arith.addf %95, %102 : vector<32x128xf32>
    %104 = arith.truncf %103 : vector<32x128xf32> to vector<32x128xbf16>
    %cst_22 = arith.constant dense<0.000000e+00> : vector<32x128xf32>
    %105 = tpu.matmul %104, %77, %cst_22 {dimension_numbers = #tpu.dot_dimension_numbers<[1], [0], [0], [1], [0, 0, 1, 1], [], []>} : vector<32x128xbf16>, vector<128x128xbf16>, vector<32x128xf32> -> vector<32x128xf32>
    %c0_23 = arith.constant 0 : index
    %c0_24 = arith.constant 0 : index
    %106 = vector.load %arg9[%c0_23, %c0_24] : memref<128x128xbf16, #tpu.memory_space<vmem>>, vector<128x128xbf16>
    %c0_25 = arith.constant 0 : index
    %c0_26 = arith.constant 0 : index
    %107 = vector.load %arg10[%c0_25, %c0_26] : memref<1x128xf32, #tpu.memory_space<vmem>>, vector<1x128xf32>
    %c0_27 = arith.constant 0 : index
    %c0_28 = arith.constant 0 : index
    %108 = vector.load %arg11[%c0_27, %c0_28] : memref<128x128xbf16, #tpu.memory_space<vmem>>, vector<128x128xbf16>
    %c0_29 = arith.constant 0 : index
    %c0_30 = arith.constant 0 : index
    %109 = vector.load %arg12[%c0_29, %c0_30] : memref<1x128xf32, #tpu.memory_space<vmem>>, vector<1x128xf32>
    %110 = arith.truncf %76 : vector<16x128xf32> to vector<16x128xbf16>
    %cst_31 = arith.constant dense<0.000000e+00> : vector<16x128xf32>
    %111 = tpu.matmul %110, %106, %cst_31 {dimension_numbers = #tpu.dot_dimension_numbers<[1], [0], [0], [1], [0, 0, 1, 1], [], []>} : vector<16x128xbf16>, vector<128x128xbf16>, vector<16x128xf32> -> vector<16x128xf32>
    %112 = vector.broadcast %107 : vector<1x128xf32> to vector<16x128xf32>
    %113 = arith.addf %111, %112 : vector<16x128xf32>
    %cst_32 = arith.constant 0.000000e+00 : f32
    %114 = vector.broadcast %cst_32 : f32 to vector<16x128xf32>
    %115 = arith.maximumf %113, %114 : vector<16x128xf32>
    %116 = arith.truncf %115 : vector<16x128xf32> to vector<16x128xbf16>
    %cst_33 = arith.constant dense<0.000000e+00> : vector<16x128xf32>
    %117 = tpu.matmul %116, %108, %cst_33 {dimension_numbers = #tpu.dot_dimension_numbers<[1], [0], [0], [1], [0, 0, 1, 1], [], []>} : vector<16x128xbf16>, vector<128x128xbf16>, vector<16x128xf32> -> vector<16x128xf32>
    %118 = vector.broadcast %109 : vector<1x128xf32> to vector<16x128xf32>
    %119 = arith.addf %117, %118 : vector<16x128xf32>
    %c0_34 = arith.constant 0 : index
    %c0_35 = arith.constant 0 : index
    %120 = vector.load %arg13[%c0_34, %c0_35] : memref<128x128xbf16, #tpu.memory_space<vmem>>, vector<128x128xbf16>
    %c0_36 = arith.constant 0 : index
    %c0_37 = arith.constant 0 : index
    %121 = vector.load %arg14[%c0_36, %c0_37] : memref<1x128xf32, #tpu.memory_space<vmem>>, vector<1x128xf32>
    %c0_38 = arith.constant 0 : index
    %c0_39 = arith.constant 0 : index
    %122 = vector.load %arg15[%c0_38, %c0_39] : memref<128x128xbf16, #tpu.memory_space<vmem>>, vector<128x128xbf16>
    %c0_40 = arith.constant 0 : index
    %c0_41 = arith.constant 0 : index
    %123 = vector.load %arg16[%c0_40, %c0_41] : memref<1x128xf32, #tpu.memory_space<vmem>>, vector<1x128xf32>
    %124 = arith.truncf %105 : vector<32x128xf32> to vector<32x128xbf16>
    %cst_42 = arith.constant dense<0.000000e+00> : vector<32x128xf32>
    %125 = tpu.matmul %124, %120, %cst_42 {dimension_numbers = #tpu.dot_dimension_numbers<[1], [0], [0], [1], [0, 0, 1, 1], [], []>} : vector<32x128xbf16>, vector<128x128xbf16>, vector<32x128xf32> -> vector<32x128xf32>
    %126 = vector.broadcast %121 : vector<1x128xf32> to vector<32x128xf32>
    %127 = arith.addf %125, %126 : vector<32x128xf32>
    %cst_43 = arith.constant 0.000000e+00 : f32
    %128 = vector.broadcast %cst_43 : f32 to vector<32x128xf32>
    %129 = arith.maximumf %127, %128 : vector<32x128xf32>
    %130 = arith.truncf %129 : vector<32x128xf32> to vector<32x128xbf16>
    %cst_44 = arith.constant dense<0.000000e+00> : vector<32x128xf32>
    %131 = tpu.matmul %130, %122, %cst_44 {dimension_numbers = #tpu.dot_dimension_numbers<[1], [0], [0], [1], [0, 0, 1, 1], [], []>} : vector<32x128xbf16>, vector<128x128xbf16>, vector<32x128xf32> -> vector<32x128xf32>
    %132 = vector.broadcast %123 : vector<1x128xf32> to vector<32x128xf32>
    %133 = arith.addf %131, %132 : vector<32x128xf32>
    %134 = tpu.iota {dimensions = array<i32: 1>} : vector<32x16xi32>
    %c0_45 = arith.constant 0 : index
    %c0_46 = arith.constant 0 : index
    %135 = vector.load %arg2[%c0_45, %c0_46] : memref<32x1xi32, #tpu.memory_space<vmem>>, vector<32x1xi32>
    %136 = vector.broadcast %135 : vector<32x1xi32> to vector<32x16xi32>
    %137 = arith.cmpi eq, %134, %136 : vector<32x16xi32>
    %138 = arith.extui %137 : vector<32x16xi1> to vector<32x16xi32>
    %139 = arith.sitofp %138 : vector<32x16xi32> to vector<32x16xf32>
    %140 = arith.truncf %139 : vector<32x16xf32> to vector<32x16xbf16>
    %c0_47 = arith.constant 0 : index
    %c0_48 = arith.constant 0 : index
    %141 = vector.load %arg3[%c0_47, %c0_48] : memref<32x1xi32, #tpu.memory_space<vmem>>, vector<32x1xi32>
    %142 = vector.broadcast %141 : vector<32x1xi32> to vector<32x16xi32>
    %143 = arith.cmpi eq, %134, %142 : vector<32x16xi32>
    %144 = arith.extui %143 : vector<32x16xi1> to vector<32x16xi32>
    %145 = arith.sitofp %144 : vector<32x16xi32> to vector<32x16xf32>
    %146 = arith.truncf %145 : vector<32x16xf32> to vector<32x16xbf16>
    %147 = tpu.iota {dimensions = array<i32: 0>} : vector<16x32xi32>
    %c0_49 = arith.constant 0 : index
    %c0_50 = arith.constant 0 : index
    %148 = vector.load %arg4[%c0_49, %c0_50] : memref<1x32xi32, #tpu.memory_space<vmem>>, vector<1x32xi32>
    %149 = vector.broadcast %148 : vector<1x32xi32> to vector<16x32xi32>
    %150 = arith.cmpi eq, %147, %149 : vector<16x32xi32>
    %151 = arith.extui %150 : vector<16x32xi1> to vector<16x32xi32>
    %152 = arith.sitofp %151 : vector<16x32xi32> to vector<16x32xf32>
    %153 = arith.truncf %152 : vector<16x32xf32> to vector<16x32xbf16>
    %154 = tpu.iota {dimensions = array<i32: 0>} : vector<8x16xi32>
    %c0_51 = arith.constant 0 : index
    %c0_52 = arith.constant 0 : index
    %155 = vector.load %arg5[%c0_51, %c0_52] : memref<1x16xi32, #tpu.memory_space<vmem>>, vector<1x16xi32>
    %156 = vector.broadcast %155 : vector<1x16xi32> to vector<8x16xi32>
    %157 = arith.cmpi eq, %154, %156 : vector<8x16xi32>
    %158 = arith.extui %157 : vector<8x16xi1> to vector<8x16xi32>
    %159 = arith.sitofp %158 : vector<8x16xi32> to vector<8x16xf32>
    %160 = arith.truncf %159 : vector<8x16xf32> to vector<8x16xbf16>
    %c0_53 = arith.constant 0 : index
    %c0_54 = arith.constant 0 : index
    %161 = vector.load %arg17[%c0_53, %c0_54] : memref<128x128xbf16, #tpu.memory_space<vmem>>, vector<128x128xbf16>
    %c0_55 = arith.constant 0 : index
    %c0_56 = arith.constant 0 : index
    %162 = vector.load %arg18[%c0_55, %c0_56] : memref<1x128xf32, #tpu.memory_space<vmem>>, vector<1x128xf32>
    %c0_57 = arith.constant 0 : index
    %c0_58 = arith.constant 0 : index
    %163 = vector.load %arg19[%c0_57, %c0_58] : memref<128x256xbf16, #tpu.memory_space<vmem>>, vector<128x256xbf16>
    %c0_59 = arith.constant 0 : index
    %c0_60 = arith.constant 0 : index
    %164 = vector.load %arg20[%c0_59, %c0_60] : memref<128x128xbf16, #tpu.memory_space<vmem>>, vector<128x128xbf16>
    %c0_61 = arith.constant 0 : index
    %c0_62 = arith.constant 0 : index
    %165 = vector.load %arg21[%c0_61, %c0_62] : memref<1x128xf32, #tpu.memory_space<vmem>>, vector<1x128xf32>
    %c0_63 = arith.constant 0 : index
    %c0_64 = arith.constant 0 : index
    %166 = vector.load %arg22[%c0_63, %c0_64] : memref<128x128xbf16, #tpu.memory_space<vmem>>, vector<128x128xbf16>
    %c0_65 = arith.constant 0 : index
    %c0_66 = arith.constant 0 : index
    %167 = vector.load %arg23[%c0_65, %c0_66] : memref<1x128xf32, #tpu.memory_space<vmem>>, vector<1x128xf32>
    %c0_67 = arith.constant 0 : index
    %c0_68 = arith.constant 0 : index
    %168 = vector.load %arg24[%c0_67, %c0_68] : memref<128x128xbf16, #tpu.memory_space<vmem>>, vector<128x128xbf16>
    %c0_69 = arith.constant 0 : index
    %c0_70 = arith.constant 0 : index
    %169 = vector.load %arg25[%c0_69, %c0_70] : memref<1x128xf32, #tpu.memory_space<vmem>>, vector<1x128xf32>
    %c0_71 = arith.constant 0 : index
    %c0_72 = arith.constant 0 : index
    %170 = vector.load %arg26[%c0_71, %c0_72] : memref<128x128xbf16, #tpu.memory_space<vmem>>, vector<128x128xbf16>
    %c0_73 = arith.constant 0 : index
    %c0_74 = arith.constant 0 : index
    %171 = vector.load %arg27[%c0_73, %c0_74] : memref<1x128xf32, #tpu.memory_space<vmem>>, vector<1x128xf32>
    %172 = arith.truncf %119 : vector<16x128xf32> to vector<16x128xbf16>
    %173 = arith.truncf %133 : vector<32x128xf32> to vector<32x128xbf16>
    %cst_75 = arith.constant dense<0.000000e+00> : vector<16x256xf32>
    %174 = tpu.matmul %172, %163, %cst_75 {dimension_numbers = #tpu.dot_dimension_numbers<[1], [0], [0], [1], [0, 0, 1, 1], [], []>} : vector<16x128xbf16>, vector<128x256xbf16>, vector<16x256xf32> -> vector<16x256xf32>
    %175 = vector.extract_strided_slice %174 {offsets = [0, 0], sizes = [16, 128], strides = [1, 1]} : vector<16x256xf32> to vector<16x128xf32>
    %176 = arith.truncf %175 : vector<16x128xf32> to vector<16x128xbf16>
    %cst_76 = arith.constant dense<0.000000e+00> : vector<32x128xf32>
    %177 = tpu.matmul %140, %176, %cst_76 {dimension_numbers = #tpu.dot_dimension_numbers<[1], [0], [0], [1], [0, 0, 1, 1], [], []>} : vector<32x16xbf16>, vector<16x128xbf16>, vector<32x128xf32> -> vector<32x128xf32>
    %178 = vector.extract_strided_slice %174 {offsets = [0, 128], sizes = [16, 128], strides = [1, 1]} : vector<16x256xf32> to vector<16x128xf32>
    %179 = arith.truncf %178 : vector<16x128xf32> to vector<16x128xbf16>
    %cst_77 = arith.constant dense<0.000000e+00> : vector<32x128xf32>
    %180 = tpu.matmul %146, %179, %cst_77 {dimension_numbers = #tpu.dot_dimension_numbers<[1], [0], [0], [1], [0, 0, 1, 1], [], []>} : vector<32x16xbf16>, vector<16x128xbf16>, vector<32x128xf32> -> vector<32x128xf32>
    %cst_78 = arith.constant dense<0.000000e+00> : vector<32x128xf32>
    %181 = tpu.matmul %173, %161, %cst_78 {dimension_numbers = #tpu.dot_dimension_numbers<[1], [0], [0], [1], [0, 0, 1, 1], [], []>} : vector<32x128xbf16>, vector<128x128xbf16>, vector<32x128xf32> -> vector<32x128xf32>
    %182 = vector.broadcast %162 : vector<1x128xf32> to vector<32x128xf32>
    %183 = arith.addf %181, %182 : vector<32x128xf32>
    %184 = arith.addf %183, %177 : vector<32x128xf32>
    %185 = arith.addf %184, %180 : vector<32x128xf32>
    %cst_79 = arith.constant 0.000000e+00 : f32
    %186 = vector.broadcast %cst_79 : f32 to vector<32x128xf32>
    %187 = arith.maximumf %185, %186 : vector<32x128xf32>
    %188 = arith.truncf %187 : vector<32x128xf32> to vector<32x128xbf16>
    %cst_80 = arith.constant dense<0.000000e+00> : vector<32x128xf32>
    %189 = tpu.matmul %188, %164, %cst_80 {dimension_numbers = #tpu.dot_dimension_numbers<[1], [0], [0], [1], [0, 0, 1, 1], [], []>} : vector<32x128xbf16>, vector<128x128xbf16>, vector<32x128xf32> -> vector<32x128xf32>
    %190 = vector.broadcast %165 : vector<1x128xf32> to vector<32x128xf32>
    %191 = arith.addf %189, %190 : vector<32x128xf32>
    %cst_81 = arith.constant 0.000000e+00 : f32
    %192 = vector.broadcast %cst_81 : f32 to vector<32x128xf32>
    %193 = arith.maximumf %191, %192 : vector<32x128xf32>
    %194 = arith.truncf %193 : vector<32x128xf32> to vector<32x128xbf16>
    %cst_82 = arith.constant dense<0.000000e+00> : vector<32x128xf32>
    %195 = tpu.matmul %194, %166, %cst_82 {dimension_numbers = #tpu.dot_dimension_numbers<[1], [0], [0], [1], [0, 0, 1, 1], [], []>} : vector<32x128xbf16>, vector<128x128xbf16>, vector<32x128xf32> -> vector<32x128xf32>
    %196 = vector.broadcast %167 : vector<1x128xf32> to vector<32x128xf32>
    %197 = arith.addf %195, %196 : vector<32x128xf32>
    %198 = arith.addf %197, %133 : vector<32x128xf32>
    %199 = arith.truncf %198 : vector<32x128xf32> to vector<32x128xbf16>
    %cst_83 = arith.constant dense<0.000000e+00> : vector<16x128xf32>
    %200 = tpu.matmul %153, %199, %cst_83 {dimension_numbers = #tpu.dot_dimension_numbers<[1], [0], [0], [1], [0, 0, 1, 1], [], []>} : vector<16x32xbf16>, vector<32x128xbf16>, vector<16x128xf32> -> vector<16x128xf32>
    %201 = arith.truncf %200 : vector<16x128xf32> to vector<16x128xbf16>
    %cst_84 = arith.constant dense<0.000000e+00> : vector<16x128xf32>
    %202 = tpu.matmul %201, %168, %cst_84 {dimension_numbers = #tpu.dot_dimension_numbers<[1], [0], [0], [1], [0, 0, 1, 1], [], []>} : vector<16x128xbf16>, vector<128x128xbf16>, vector<16x128xf32> -> vector<16x128xf32>
    %203 = vector.broadcast %169 : vector<1x128xf32> to vector<16x128xf32>
    %204 = arith.addf %202, %203 : vector<16x128xf32>
    %cst_85 = arith.constant 0.000000e+00 : f32
    %205 = vector.broadcast %cst_85 : f32 to vector<16x128xf32>
    %206 = arith.maximumf %204, %205 : vector<16x128xf32>
    %207 = arith.truncf %206 : vector<16x128xf32> to vector<16x128xbf16>
    %cst_86 = arith.constant dense<0.000000e+00> : vector<16x128xf32>
    %208 = tpu.matmul %207, %170, %cst_86 {dimension_numbers = #tpu.dot_dimension_numbers<[1], [0], [0], [1], [0, 0, 1, 1], [], []>} : vector<16x128xbf16>, vector<128x128xbf16>, vector<16x128xf32> -> vector<16x128xf32>
    %209 = vector.broadcast %171 : vector<1x128xf32> to vector<16x128xf32>
    %210 = arith.addf %208, %209 : vector<16x128xf32>
    %211 = arith.addf %119, %210 : vector<16x128xf32>
    %212 = arith.truncf %211 : vector<16x128xf32> to vector<16x128xbf16>
    %213 = arith.truncf %198 : vector<32x128xf32> to vector<32x128xbf16>
    %cst_87 = arith.constant dense<0.000000e+00> : vector<16x256xf32>
    %214 = tpu.matmul %212, %163, %cst_87 {dimension_numbers = #tpu.dot_dimension_numbers<[1], [0], [0], [1], [0, 0, 1, 1], [], []>} : vector<16x128xbf16>, vector<128x256xbf16>, vector<16x256xf32> -> vector<16x256xf32>
    %215 = vector.extract_strided_slice %214 {offsets = [0, 0], sizes = [16, 128], strides = [1, 1]} : vector<16x256xf32> to vector<16x128xf32>
    %216 = arith.truncf %215 : vector<16x128xf32> to vector<16x128xbf16>
    %cst_88 = arith.constant dense<0.000000e+00> : vector<32x128xf32>
    %217 = tpu.matmul %140, %216, %cst_88 {dimension_numbers = #tpu.dot_dimension_numbers<[1], [0], [0], [1], [0, 0, 1, 1], [], []>} : vector<32x16xbf16>, vector<16x128xbf16>, vector<32x128xf32> -> vector<32x128xf32>
    %218 = vector.extract_strided_slice %214 {offsets = [0, 128], sizes = [16, 128], strides = [1, 1]} : vector<16x256xf32> to vector<16x128xf32>
    %219 = arith.truncf %218 : vector<16x128xf32> to vector<16x128xbf16>
    %cst_89 = arith.constant dense<0.000000e+00> : vector<32x128xf32>
    %220 = tpu.matmul %146, %219, %cst_89 {dimension_numbers = #tpu.dot_dimension_numbers<[1], [0], [0], [1], [0, 0, 1, 1], [], []>} : vector<32x16xbf16>, vector<16x128xbf16>, vector<32x128xf32> -> vector<32x128xf32>
    %cst_90 = arith.constant dense<0.000000e+00> : vector<32x128xf32>
    %221 = tpu.matmul %213, %161, %cst_90 {dimension_numbers = #tpu.dot_dimension_numbers<[1], [0], [0], [1], [0, 0, 1, 1], [], []>} : vector<32x128xbf16>, vector<128x128xbf16>, vector<32x128xf32> -> vector<32x128xf32>
    %222 = vector.broadcast %162 : vector<1x128xf32> to vector<32x128xf32>
    %223 = arith.addf %221, %222 : vector<32x128xf32>
    %224 = arith.addf %223, %217 : vector<32x128xf32>
    %225 = arith.addf %224, %220 : vector<32x128xf32>
    %cst_91 = arith.constant 0.000000e+00 : f32
    %226 = vector.broadcast %cst_91 : f32 to vector<32x128xf32>
    %227 = arith.maximumf %225, %226 : vector<32x128xf32>
    %228 = arith.truncf %227 : vector<32x128xf32> to vector<32x128xbf16>
    %cst_92 = arith.constant dense<0.000000e+00> : vector<32x128xf32>
    %229 = tpu.matmul %228, %164, %cst_92 {dimension_numbers = #tpu.dot_dimension_numbers<[1], [0], [0], [1], [0, 0, 1, 1], [], []>} : vector<32x128xbf16>, vector<128x128xbf16>, vector<32x128xf32> -> vector<32x128xf32>
    %230 = vector.broadcast %165 : vector<1x128xf32> to vector<32x128xf32>
    %231 = arith.addf %229, %230 : vector<32x128xf32>
    %cst_93 = arith.constant 0.000000e+00 : f32
    %232 = vector.broadcast %cst_93 : f32 to vector<32x128xf32>
    %233 = arith.maximumf %231, %232 : vector<32x128xf32>
    %234 = arith.truncf %233 : vector<32x128xf32> to vector<32x128xbf16>
    %cst_94 = arith.constant dense<0.000000e+00> : vector<32x128xf32>
    %235 = tpu.matmul %234, %166, %cst_94 {dimension_numbers = #tpu.dot_dimension_numbers<[1], [0], [0], [1], [0, 0, 1, 1], [], []>} : vector<32x128xbf16>, vector<128x128xbf16>, vector<32x128xf32> -> vector<32x128xf32>
    %236 = vector.broadcast %167 : vector<1x128xf32> to vector<32x128xf32>
    %237 = arith.addf %235, %236 : vector<32x128xf32>
    %238 = arith.addf %237, %198 : vector<32x128xf32>
    %239 = arith.truncf %238 : vector<32x128xf32> to vector<32x128xbf16>
    %cst_95 = arith.constant dense<0.000000e+00> : vector<16x128xf32>
    %240 = tpu.matmul %153, %239, %cst_95 {dimension_numbers = #tpu.dot_dimension_numbers<[1], [0], [0], [1], [0, 0, 1, 1], [], []>} : vector<16x32xbf16>, vector<32x128xbf16>, vector<16x128xf32> -> vector<16x128xf32>
    %241 = arith.truncf %240 : vector<16x128xf32> to vector<16x128xbf16>
    %cst_96 = arith.constant dense<0.000000e+00> : vector<16x128xf32>
    %242 = tpu.matmul %241, %168, %cst_96 {dimension_numbers = #tpu.dot_dimension_numbers<[1], [0], [0], [1], [0, 0, 1, 1], [], []>} : vector<16x128xbf16>, vector<128x128xbf16>, vector<16x128xf32> -> vector<16x128xf32>
    %243 = vector.broadcast %169 : vector<1x128xf32> to vector<16x128xf32>
    %244 = arith.addf %242, %243 : vector<16x128xf32>
    %cst_97 = arith.constant 0.000000e+00 : f32
    %245 = vector.broadcast %cst_97 : f32 to vector<16x128xf32>
    %246 = arith.maximumf %244, %245 : vector<16x128xf32>
    %247 = arith.truncf %246 : vector<16x128xf32> to vector<16x128xbf16>
    %cst_98 = arith.constant dense<0.000000e+00> : vector<16x128xf32>
    %248 = tpu.matmul %247, %170, %cst_98 {dimension_numbers = #tpu.dot_dimension_numbers<[1], [0], [0], [1], [0, 0, 1, 1], [], []>} : vector<16x128xbf16>, vector<128x128xbf16>, vector<16x128xf32> -> vector<16x128xf32>
    %249 = vector.broadcast %171 : vector<1x128xf32> to vector<16x128xf32>
    %250 = arith.addf %248, %249 : vector<16x128xf32>
    %251 = arith.addf %211, %250 : vector<16x128xf32>
    %252 = arith.truncf %251 : vector<16x128xf32> to vector<16x128xbf16>
    %253 = arith.truncf %238 : vector<32x128xf32> to vector<32x128xbf16>
    %cst_99 = arith.constant dense<0.000000e+00> : vector<16x256xf32>
    %254 = tpu.matmul %252, %163, %cst_99 {dimension_numbers = #tpu.dot_dimension_numbers<[1], [0], [0], [1], [0, 0, 1, 1], [], []>} : vector<16x128xbf16>, vector<128x256xbf16>, vector<16x256xf32> -> vector<16x256xf32>
    %255 = vector.extract_strided_slice %254 {offsets = [0, 0], sizes = [16, 128], strides = [1, 1]} : vector<16x256xf32> to vector<16x128xf32>
    %256 = arith.truncf %255 : vector<16x128xf32> to vector<16x128xbf16>
    %cst_100 = arith.constant dense<0.000000e+00> : vector<32x128xf32>
    %257 = tpu.matmul %140, %256, %cst_100 {dimension_numbers = #tpu.dot_dimension_numbers<[1], [0], [0], [1], [0, 0, 1, 1], [], []>} : vector<32x16xbf16>, vector<16x128xbf16>, vector<32x128xf32> -> vector<32x128xf32>
    %258 = vector.extract_strided_slice %254 {offsets = [0, 128], sizes = [16, 128], strides = [1, 1]} : vector<16x256xf32> to vector<16x128xf32>
    %259 = arith.truncf %258 : vector<16x128xf32> to vector<16x128xbf16>
    %cst_101 = arith.constant dense<0.000000e+00> : vector<32x128xf32>
    %260 = tpu.matmul %146, %259, %cst_101 {dimension_numbers = #tpu.dot_dimension_numbers<[1], [0], [0], [1], [0, 0, 1, 1], [], []>} : vector<32x16xbf16>, vector<16x128xbf16>, vector<32x128xf32> -> vector<32x128xf32>
    %cst_102 = arith.constant dense<0.000000e+00> : vector<32x128xf32>
    %261 = tpu.matmul %253, %161, %cst_102 {dimension_numbers = #tpu.dot_dimension_numbers<[1], [0], [0], [1], [0, 0, 1, 1], [], []>} : vector<32x128xbf16>, vector<128x128xbf16>, vector<32x128xf32> -> vector<32x128xf32>
    %262 = vector.broadcast %162 : vector<1x128xf32> to vector<32x128xf32>
    %263 = arith.addf %261, %262 : vector<32x128xf32>
    %264 = arith.addf %263, %257 : vector<32x128xf32>
    %265 = arith.addf %264, %260 : vector<32x128xf32>
    %cst_103 = arith.constant 0.000000e+00 : f32
    %266 = vector.broadcast %cst_103 : f32 to vector<32x128xf32>
    %267 = arith.maximumf %265, %266 : vector<32x128xf32>
    %268 = arith.truncf %267 : vector<32x128xf32> to vector<32x128xbf16>
    %cst_104 = arith.constant dense<0.000000e+00> : vector<32x128xf32>
    %269 = tpu.matmul %268, %164, %cst_104 {dimension_numbers = #tpu.dot_dimension_numbers<[1], [0], [0], [1], [0, 0, 1, 1], [], []>} : vector<32x128xbf16>, vector<128x128xbf16>, vector<32x128xf32> -> vector<32x128xf32>
    %270 = vector.broadcast %165 : vector<1x128xf32> to vector<32x128xf32>
    %271 = arith.addf %269, %270 : vector<32x128xf32>
    %cst_105 = arith.constant 0.000000e+00 : f32
    %272 = vector.broadcast %cst_105 : f32 to vector<32x128xf32>
    %273 = arith.maximumf %271, %272 : vector<32x128xf32>
    %274 = arith.truncf %273 : vector<32x128xf32> to vector<32x128xbf16>
    %cst_106 = arith.constant dense<0.000000e+00> : vector<32x128xf32>
    %275 = tpu.matmul %274, %166, %cst_106 {dimension_numbers = #tpu.dot_dimension_numbers<[1], [0], [0], [1], [0, 0, 1, 1], [], []>} : vector<32x128xbf16>, vector<128x128xbf16>, vector<32x128xf32> -> vector<32x128xf32>
    %276 = vector.broadcast %167 : vector<1x128xf32> to vector<32x128xf32>
    %277 = arith.addf %275, %276 : vector<32x128xf32>
    %278 = arith.addf %277, %238 : vector<32x128xf32>
    %279 = arith.truncf %278 : vector<32x128xf32> to vector<32x128xbf16>
    %cst_107 = arith.constant dense<0.000000e+00> : vector<16x128xf32>
    %280 = tpu.matmul %153, %279, %cst_107 {dimension_numbers = #tpu.dot_dimension_numbers<[1], [0], [0], [1], [0, 0, 1, 1], [], []>} : vector<16x32xbf16>, vector<32x128xbf16>, vector<16x128xf32> -> vector<16x128xf32>
    %281 = arith.truncf %280 : vector<16x128xf32> to vector<16x128xbf16>
    %cst_108 = arith.constant dense<0.000000e+00> : vector<16x128xf32>
    %282 = tpu.matmul %281, %168, %cst_108 {dimension_numbers = #tpu.dot_dimension_numbers<[1], [0], [0], [1], [0, 0, 1, 1], [], []>} : vector<16x128xbf16>, vector<128x128xbf16>, vector<16x128xf32> -> vector<16x128xf32>
    %283 = vector.broadcast %169 : vector<1x128xf32> to vector<16x128xf32>
    %284 = arith.addf %282, %283 : vector<16x128xf32>
    %cst_109 = arith.constant 0.000000e+00 : f32
    %285 = vector.broadcast %cst_109 : f32 to vector<16x128xf32>
    %286 = arith.maximumf %284, %285 : vector<16x128xf32>
    %287 = arith.truncf %286 : vector<16x128xf32> to vector<16x128xbf16>
    %cst_110 = arith.constant dense<0.000000e+00> : vector<16x128xf32>
    %288 = tpu.matmul %287, %170, %cst_110 {dimension_numbers = #tpu.dot_dimension_numbers<[1], [0], [0], [1], [0, 0, 1, 1], [], []>} : vector<16x128xbf16>, vector<128x128xbf16>, vector<16x128xf32> -> vector<16x128xf32>
    %289 = vector.broadcast %171 : vector<1x128xf32> to vector<16x128xf32>
    %290 = arith.addf %288, %289 : vector<16x128xf32>
    %291 = arith.addf %251, %290 : vector<16x128xf32>
    %292 = arith.truncf %291 : vector<16x128xf32> to vector<16x128xbf16>
    %cst_111 = arith.constant dense<0.000000e+00> : vector<8x128xf32>
    %293 = tpu.matmul %160, %292, %cst_111 {dimension_numbers = #tpu.dot_dimension_numbers<[1], [0], [0], [1], [0, 0, 1, 1], [], []>} : vector<8x16xbf16>, vector<16x128xbf16>, vector<8x128xf32> -> vector<8x128xf32>
    %c0_112 = arith.constant 0 : index
    %c0_113 = arith.constant 0 : index
    %294 = vector.load %arg6[%c0_112, %c0_113] : memref<8x1xf32, #tpu.memory_space<vmem>>, vector<8x1xf32>
    %295 = vector.broadcast %294 : vector<8x1xf32> to vector<8x128xf32>
    %296 = arith.mulf %293, %295 : vector<8x128xf32>
    %c0_114 = arith.constant 0 : index
    %c0_115 = arith.constant 0 : index
    %297 = vector.load %arg28[%c0_114, %c0_115] : memref<128x128xbf16, #tpu.memory_space<vmem>>, vector<128x128xbf16>
    %c0_116 = arith.constant 0 : index
    %c0_117 = arith.constant 0 : index
    %298 = vector.load %arg29[%c0_116, %c0_117] : memref<1x128xf32, #tpu.memory_space<vmem>>, vector<1x128xf32>
    %299 = arith.truncf %296 : vector<8x128xf32> to vector<8x128xbf16>
    %cst_118 = arith.constant dense<0.000000e+00> : vector<8x128xf32>
    %300 = tpu.matmul %299, %297, %cst_118 {dimension_numbers = #tpu.dot_dimension_numbers<[1], [0], [0], [1], [0, 0, 1, 1], [], []>} : vector<8x128xbf16>, vector<128x128xbf16>, vector<8x128xf32> -> vector<8x128xf32>
    %301 = vector.broadcast %298 : vector<1x128xf32> to vector<8x128xf32>
    %302 = arith.addf %300, %301 : vector<8x128xf32>
    %cst_119 = arith.constant 0.000000e+00 : f32
    %303 = vector.broadcast %cst_119 : f32 to vector<8x128xf32>
    %304 = arith.maximumf %302, %303 : vector<8x128xf32>
    %c0_120 = arith.constant 0 : index
    %c0_121 = arith.constant 0 : index
    %305 = vector.load %arg30[%c0_120, %c0_121] : memref<128x128xbf16, #tpu.memory_space<vmem>>, vector<128x128xbf16>
    %c0_122 = arith.constant 0 : index
    %c0_123 = arith.constant 0 : index
    %306 = vector.load %arg31[%c0_122, %c0_123] : memref<1x128xf32, #tpu.memory_space<vmem>>, vector<1x128xf32>
    %307 = arith.truncf %304 : vector<8x128xf32> to vector<8x128xbf16>
    %cst_124 = arith.constant dense<0.000000e+00> : vector<8x128xf32>
    %308 = tpu.matmul %307, %305, %cst_124 {dimension_numbers = #tpu.dot_dimension_numbers<[1], [0], [0], [1], [0, 0, 1, 1], [], []>} : vector<8x128xbf16>, vector<128x128xbf16>, vector<8x128xf32> -> vector<8x128xf32>
    %309 = vector.broadcast %306 : vector<1x128xf32> to vector<8x128xf32>
    %310 = arith.addf %308, %309 : vector<8x128xf32>
    %c0_125 = arith.constant 0 : index
    %c0_126 = arith.constant 0 : index
    %311 = vector.load %arg32[%c0_125, %c0_126] : memref<8x128xf32, #tpu.memory_space<vmem>>, vector<8x128xf32>
    tpu.vector_store %arg32[%c0_125, %c0_126], %310 {strides = array<i32>} : memref<8x128xf32, #tpu.memory_space<vmem>>, vector<8x128xf32>,
    return
  }
}

</mosaic_0001>

<bundles_post_ra>
// kernel: tpu_custom_call.1
= control target key start
LH: loop header
LB: loop body
LE: loop exit
PB: predicated region body
PF: predicated region fallthrough
CT: control target
= control target key end

     0   :  { %s5407_s6 = smov 1   ;;  %s5408_s10 = smov 2   ;;  %s6634_s0 = inlined_call_operand.smem [shape: u32[33], index: -1, kind: input, shape index: {}] }
   0x1   :  { %s5482_s5 = sld [smem:[%s6634_s0]]   ;;  %s5409_s14 = smov 3  }
   0x2   :  { %s5487_s9 = sld [smem:[%s6634_s0 + %s5407_s6]]   ;;  %s5410_s18 = smov 4  }
   0x3   :  { %s5492_s13 = sld [smem:[%s6634_s0 + %s5408_s10]]   ;;  %s5411_s22 = smov 5  }
   0x4   :  { %s5497_s17 = sld [smem:[%s6634_s0 + %s5409_s14]]   ;;  %s5412_s26 = smov 6  }
   0x5   :  { %s5502_s21 = sld [smem:[%s6634_s0 + %s5410_s18]]   ;;  %s5413_s30 = smov 7  }
   0x6   :  { %s5507_s25 = sld [smem:[%s6634_s0 + %s5411_s22]]   ;;  %s5414_s4 = smov 8  }
   0x7   :  { %s5512_s29 = sld [smem:[%s6634_s0 + %s5412_s26]]   ;;  %s5415_s10 = smov 9  }
   0x8   :  { %6675 = sst [smem:[#allocation44_spill]] %s5487_s9  ;;  %s5416_s15 = smov 10  }
   0x9   :  { %6676 = sst [smem:[#allocation45_spill]] %s5492_s13  ;;  %s5417_s20 = smov 11  }
   0xa   :  { %6677 = sst [smem:[#allocation46_spill]] %s5497_s17  ;;  %s5418_s26 = smov 12  }
   0xb   :  { %6678 = sst [smem:[#allocation47_spill]] %s5502_s21  ;;  %s5419_s1 = smov 13  }
   0xc   :  { %6679 = sst [smem:[#allocation48_spill]] %s5507_s25  ;;  %s5420_s7 = smov 14  }
   0xd   :  { %6680 = sst [smem:[#allocation49_spill]] %s5512_s29  ;;  %s5422_s22 = smov 16  }
   0xe   :  { %s5517_s3 = sld [smem:[%s6634_s0 + %s5413_s30]]   ;;  %s5423_s28 = smov 17  }
   0xf   :  { %s5522_s8 = sld [smem:[%s6634_s0 + %s5414_s4]]  }
  0x10   :  { %s5527_s14 = sld [smem:[%s6634_s0 + %s5415_s10]]  }
  0x11   :  { %s5532_s19 = sld [smem:[%s6634_s0 + %s5416_s15]]   ;;  %s5421_s15 = smov 15  }
  0x12   :  { %s5537_s24 = sld [smem:[%s6634_s0 + %s5417_s20]]  }
  0x13   :  { %s5542_s30 = sld [smem:[%s6634_s0 + %s5418_s26]]  }
  0x14   :  { %6681 = sst [smem:[#allocation50_spill]] %s5517_s3 }
  0x15   :  { %s5547_s6 = sld [smem:[%s6634_s0 + %s5419_s1]]  }
  0x16   :  { %s5552_s12 = sld [smem:[%s6634_s0 + %s5420_s7]]   ;;  %s5424_s7 = smov 18  }
  0x17   :  { %s5557_s20 = sld [smem:[%s6634_s0 + %s5421_s15]]   ;;  %s5425_s15 = smov 19  }
  0x18   :  { %s5562_s27 = sld [smem:[%s6634_s0 + %s5422_s22]]   ;;  %s5426_s22 = smov 20  }
  0x19   :  { %s5567_s4 = sld [smem:[%s6634_s0 + %s5423_s28]]   ;;  %s5427_s28 = smov 21  }
  0x1a   :  { %s5572_s25 = sld [smem:[%s6634_s0 + %s5424_s7]]   ;;  %s5428_s7 = smov 22  }
  0x1b   :  { %s5577_s21 = sld [smem:[%s6634_s0 + %s5425_s15]]   ;;  %s5429_s15 = smov 23  }
  0x1c   :  { %s5582_s29 = sld [smem:[%s6634_s0 + %s5426_s22]]   ;;  %s5430_s22 = smov 24  }
  0x1d   :  { %s5587_s17 = sld [smem:[%s6634_s0 + %s5427_s28]]   ;;  %s5431_s28 = smov 25  }
  0x1e   :  { %s5592_s13 = sld [smem:[%s6634_s0 + %s5428_s7]]   ;;  %s5432_s7 = smov 26  }
  0x1f   :  { %6682 = sst [smem:[#allocation51_spill]] %s5567_s4 }
  0x20   :  { %s5597_s9 = sld [smem:[%s6634_s0 + %s5429_s15]]   ;;  %s5433_s15 = smov 27  }
  0x21   :  { %6683 = sst [smem:[#allocation52_spill]] %s5577_s21 }
  0x22   :  { %s5602_s3 = sld [smem:[%s6634_s0 + %s5430_s22]]   ;;  %s5434_s22 = smov 28  }
  0x23   :  { %6684 = sst [smem:[#allocation53_spill]] %s5587_s17 }
  0x24   :  { %6685 = sst [smem:[#allocation54_spill]] %s5592_s13 }
  0x25   :  { %s5607_s17 = sld [smem:[%s6634_s0 + %s5431_s28]]   ;;  %s5435_s28 = smov 29  }
  0x26   :  { %6686 = sst [smem:[#allocation55_spill]] %s5597_s9 }
  0x27   :  { %s5612_s13 = sld [smem:[%s6634_s0 + %s5432_s7]]   ;;  %s5436_s7 = smov 30  }
  0x28   :  { %s5617_s9 = sld [smem:[%s6634_s0 + %s5433_s15]]   ;;  %s5437_s15 = smov 31  }
  0x29   :  { %s5622_s21 = sld [smem:[%s6634_s0 + %s5434_s22]]   ;;  %s5438_s22 = smov 32  }
  0x2a   :  { %s5642_s4 = sld [smem:[%s6634_s0 + %s5438_s22]]  }
  0x2b   :  { %6687 = sst [smem:[#allocation56_spill]] %s5607_s17 }
  0x2c   :  { %s5627_s17 = sld [smem:[%s6634_s0 + %s5435_s28]]  }
  0x2d   :  { %6688 = sst [smem:[#allocation57_spill]] %s5612_s13 }
  0x2e   :  { %6689 = sst [smem:[#allocation58_spill]] %s5617_s9 }
  0x2f   :  { %s5632_s13 = sld [smem:[%s6634_s0 + %s5436_s7]]  }
  0x30   :  { %s5637_s9 = sld [smem:[%s6634_s0 + %s5437_s15]]  }
  0x31   :  { %70 = vsyncpa [#allocation3], 0 }
  0x32   :  { %71 = vsyncpa [#allocation6], 0 }
  0x33   :  { %72 = vsyncpa [#allocation9], 0 }
  0x34   :  { %73 = vsyncpa [#allocation12], 0 }
  0x35   :  { %74 = vsyncpa [#allocation15], 0 }
  0x36   :  { %75 = vsyncpa [#allocation18], 0 }
  0x37   :  { %76 = vsyncpa [#allocation21], 0 }
  0x38   :  { %77 = vsyncpa [#allocation24], 0 }
  0x39   :  { %78 = vsyncpa [#allocation27], 0 }
  0x3a   :  { %79 = vsyncpa [#allocation30], 0 }
  0x3b   :  { %80 = vsyncpa [#allocation4], 0  ;;  %s5439_s28 = smov [#allocation5]   ;;  %s4945_s2 = scalar_lea.hbm %s5522_s8, 1024 }
  0x3c   :  { %s112_s1 = sshll.u32 %s5439_s28, 4  ;;  %p4946_p0 = scmp.ne.s32.totalorder %s5522_s8, %s4945_s2  ;;  %s113_s1 = int_to_ptr.vmem [resolvable:$true] %s112_s1 }
  0x3d   :  { %p4949_p1 = scmp.lt.u32.totalorder %s4945_s2, %s5522_s8 }
  0x3f   :  { %p4951_p2 = pnand %p4949_p1, %p4946_p0 }
  0x41   :  { %4954 = shalt.err (!%p4951_p2)
}
  0x42   :  { %s4955_s0 = scalar_lea.vmem %s113_s1, 1024  ;;  %p4960_p4 = scmp.lt.s32.totalorder %s113_s1, %s113_s1 }
  0x43   :  { %p4956_p3 = scmp.ne.s32.totalorder %s113_s1, %s4955_s0  ;;  %p4961_p5 = scmp.lt.s32.totalorder %s4955_s0, %s4955_s0 }
  0x45   :  { %p4962_p6 = por %p4961_p5, %p4960_p4 }
  0x47   :  { %p4963_p7 = pnand %p4962_p6, %p4956_p3 }
  0x49   :  { %4966 = shalt.err (!%p4963_p7)
}
  0x4a   :  { %s5440_s7 = smov 64   ;;  %s5441_s10 = smov 4  }
  0x4b   :  { %118 = dma.hbm_to_vmem [thread:$0]  %s5522_s8, 1024, %s113_s1, [#allocation6], %s5440_s7, %s5440_s7, %s5441_s10  }
  0x4c   :  { %s5442_s11 = smov [#allocation8]   ;;  %s5443_s16 = smov [#allocation11]  }
  0x4d   :  { %s137_s15 = sshll.u32 %s5442_s11, 4  ;;  %s159_s18 = sshll.u32 %s5443_s16, 4  ;;  %s138_s15 = int_to_ptr.vmem [resolvable:$true] %s137_s15  ;;  %s160_s18 = int_to_ptr.vmem [resolvable:$true] %s159_s18 }
  0x4e   :  { %s4967_s22 = scalar_lea.hbm %s5532_s19, 16 }
  0x4f   :  { %p4968_p8 = scmp.ne.s32.totalorder %s5532_s19, %s4967_s22  ;;  %p4971_p9 = scmp.lt.u32.totalorder %s4967_s22, %s5532_s19 }
  0x51   :  { %p4973_p10 = pnand %p4971_p9, %p4968_p8 }
  0x53   :  { %4976 = shalt.err (!%p4973_p10)
}
  0x54   :  { %s4977_s23 = scalar_lea.vmem %s138_s15, 16  ;;  %s4981_s26 = scalar_lea.vmem %s138_s15, 32 }
  0x55   :  { %p4978_p11 = scmp.ne.s32.totalorder %s138_s15, %s4977_s23  ;;  %p4982_p12 = scmp.lt.s32.totalorder %s138_s15, %s138_s15 }
  0x56   :  { %p4983_p13 = scmp.lt.s32.totalorder %s4981_s26, %s4977_s23 }
  0x58   :  { %p4984_p0 = por %p4983_p13, %p4982_p12 }
  0x5a   :  { %p4985_p1 = pnand %p4984_p0, %p4978_p11 }
  0x5c   :  { %4988 = shalt.err (!%p4985_p1)
}
  0x5d   :  { %140 = dma.hbm_to_vmem [thread:$0]  %s5532_s19, 16, %s138_s15, [#allocation9]  }
  0x5e   :  { %s4989_s8 = scalar_lea.hbm %s5542_s30, 16 }
  0x5f   :  { %p4990_p2 = scmp.ne.s32.totalorder %s5542_s30, %s4989_s8  ;;  %p4993_p3 = scmp.lt.u32.totalorder %s4989_s8, %s5542_s30 }
  0x61   :  { %p4995_p4 = pnand %p4993_p3, %p4990_p2 }
  0x63   :  { %4998 = shalt.err (!%p4995_p4)
}
  0x64   :  { %s4999_s28 = scalar_lea.vmem %s160_s18, 16  ;;  %s5003_s1 = scalar_lea.vmem %s160_s18, 32 }
  0x65   :  { %p5000_p5 = scmp.ne.s32.totalorder %s160_s18, %s4999_s28  ;;  %p5004_p6 = scmp.lt.s32.totalorder %s160_s18, %s160_s18 }
  0x66   :  { %p5005_p7 = scmp.lt.s32.totalorder %s5003_s1, %s4999_s28 }
  0x68   :  { %p5006_p8 = por %p5005_p7, %p5004_p6 }
  0x6a   :  { %p5007_p9 = pnand %p5006_p8, %p5000_p5 }
  0x6c   :  { %5010 = shalt.err (!%p5007_p9)
}
  0x6d   :  { %162 = dma.hbm_to_vmem [thread:$0]  %s5542_s30, 16, %s160_s18, [#allocation12]  }
  0x6e   :  { %s5444_s19 = smov [#allocation14]   ;;  %s5445_s0 = smov [#allocation17]  }
  0x6f   :  { %s181_s2 = sshll.u32 %s5444_s19, 4  ;;  %s203_s11 = sshll.u32 %s5445_s0, 4  ;;  %s182_s2 = int_to_ptr.vmem [resolvable:$true] %s181_s2  ;;  %s204_s11 = int_to_ptr.vmem [resolvable:$true] %s203_s11 }
  0x70   :  { %s5011_s15 = scalar_lea.hbm %s5552_s12, 16 }
  0x71   :  { %p5012_p10 = scmp.ne.s32.totalorder %s5552_s12, %s5011_s15  ;;  %p5015_p11 = scmp.lt.u32.totalorder %s5011_s15, %s5552_s12 }
  0x73   :  { %p5017_p12 = pnand %p5015_p11, %p5012_p10 }
  0x75   :  { %5020 = shalt.err (!%p5017_p12)
}
  0x76   :  { %s5021_s16 = scalar_lea.vmem %s182_s2, 16  ;;  %s5025_s22 = scalar_lea.vmem %s182_s2, 32 }
  0x77   :  { %p5022_p13 = scmp.ne.s32.totalorder %s182_s2, %s5021_s16  ;;  %p5026_p0 = scmp.lt.s32.totalorder %s182_s2, %s182_s2 }
  0x78   :  { %p5027_p1 = scmp.lt.s32.totalorder %s5025_s22, %s5021_s16 }
  0x7a   :  { %p5028_p2 = por %p5027_p1, %p5026_p0 }
  0x7c   :  { %p5029_p3 = pnand %p5028_p2, %p5022_p13 }
  0x7e   :  { %5032 = shalt.err (!%p5029_p3)
}
  0x7f   :  { %184 = dma.hbm_to_vmem [thread:$0]  %s5552_s12, 16, %s182_s2, [#allocation15]  }
  0x80   :  { %s5033_s30 = scalar_lea.hbm %s5562_s27, 16 }
  0x81   :  { %p5034_p4 = scmp.ne.s32.totalorder %s5562_s27, %s5033_s30  ;;  %p5037_p5 = scmp.lt.u32.totalorder %s5033_s30, %s5562_s27 }
  0x83   :  { %p5039_p6 = pnand %p5037_p5, %p5034_p4 }
  0x85   :  { %5042 = shalt.err (!%p5039_p6)
}
  0x86   :  { %s5043_s18 = scalar_lea.vmem %s204_s11, 16  ;;  %s5047_s23 = scalar_lea.vmem %s204_s11, 32 }
  0x87   :  { %p5044_p7 = scmp.ne.s32.totalorder %s204_s11, %s5043_s18  ;;  %p5048_p8 = scmp.lt.s32.totalorder %s204_s11, %s204_s11 }
  0x88   :  { %p5049_p9 = scmp.lt.s32.totalorder %s5047_s23, %s5043_s18 }
  0x8a   :  { %p5050_p10 = por %p5049_p9, %p5048_p8 }
  0x8c   :  { %p5051_p11 = pnand %p5050_p10, %p5044_p7 }
  0x8e   :  { %5054 = shalt.err (!%p5051_p11)
}
  0x8f   :  { %206 = dma.hbm_to_vmem [thread:$0]  %s5562_s27, 16, %s204_s11, [#allocation18]  }
  0x90   :  { %s5446_s12 = smov [#allocation20]   ;;  %s5447_s8 = smov [#allocation23]  }
  0x91   :  { %s225_s26 = sshll.u32 %s5446_s12, 4  ;;  %s246_s28 = sshll.u32 %s5447_s8, 4  ;;  %s226_s26 = int_to_ptr.vmem [resolvable:$true] %s225_s26  ;;  %s247_s28 = int_to_ptr.vmem [resolvable:$true] %s246_s28 }
  0x92   :  { %s5055_s1 = scalar_lea.hbm %s5572_s25, 16 }
  0x93   :  { %p5056_p12 = scmp.ne.s32.totalorder %s5572_s25, %s5055_s1  ;;  %p5059_p13 = scmp.lt.u32.totalorder %s5055_s1, %s5572_s25 }
  0x95   :  { %p5061_p0 = pnand %p5059_p13, %p5056_p12 }
  0x97   :  { %5064 = shalt.err (!%p5061_p0)
}
  0x98   :  { %s5065_s19 = scalar_lea.vmem %s226_s26, 16  ;;  %s5069_s2 = scalar_lea.vmem %s226_s26, 32 }
  0x99   :  { %p5066_p1 = scmp.ne.s32.totalorder %s226_s26, %s5065_s19  ;;  %p5070_p2 = scmp.lt.s32.totalorder %s226_s26, %s226_s26 }
  0x9a   :  { %p5071_p3 = scmp.lt.s32.totalorder %s5069_s2, %s5065_s19 }
  0x9c   :  { %p5072_p4 = por %p5071_p3, %p5070_p2 }
  0x9e   :  { %p5073_p5 = pnand %p5072_p4, %p5066_p1 }
  0xa0   :  { %5076 = shalt.err (!%p5073_p5)
}
  0xa1   :  { %228 = dma.hbm_to_vmem [thread:$0]  %s5572_s25, 16, %s226_s26, [#allocation21]  }
  0xa2   :  { %s5077_s27 = scalar_lea.hbm %s5582_s29, 1024 }
  0xa3   :  { %p5078_p6 = scmp.ne.s32.totalorder %s5582_s29, %s5077_s27  ;;  %p5081_p7 = scmp.lt.u32.totalorder %s5077_s27, %s5582_s29 }
  0xa5   :  { %p5083_p8 = pnand %p5081_p7, %p5078_p6 }
  0xa7   :  { %5086 = shalt.err (!%p5083_p8)
}
  0xa8   :  { %s5087_s0 = scalar_lea.vmem %s247_s28, 1024  ;;  %p5092_p10 = scmp.lt.s32.totalorder %s247_s28, %s247_s28 }
  0xa9   :  { %p5088_p9 = scmp.ne.s32.totalorder %s247_s28, %s5087_s0  ;;  %p5093_p11 = scmp.lt.s32.totalorder %s5087_s0, %s5087_s0 }
  0xab   :  { %p5094_p12 = por %p5093_p11, %p5092_p10 }
  0xad   :  { %p5095_p13 = pnand %p5094_p12, %p5088_p9 }
  0xaf   :  { %5098 = shalt.err (!%p5095_p13)
}
  0xb0   :  { %252 = dma.hbm_to_vmem [thread:$0]  %s5582_s29, 1024, %s247_s28, [#allocation24], %s5440_s7, %s5440_s7, %s5441_s10  }
  0xb1   :  { %s5448_s25 = smov [#allocation26]   ;;  %s5449_s15 = smov [#allocation29]  }
  0xb2   :  { %s272_s11 = sshll.u32 %s5448_s25, 4  ;;  %s300_s16 = sshll.u32 %s5449_s15, 4  ;;  %s273_s11 = int_to_ptr.vmem [resolvable:$true] %s272_s11  ;;  %s301_s16 = int_to_ptr.vmem [resolvable:$true] %s300_s16 }
  0xb3   :  { %s5099_s22 = scalar_lea.hbm %s5602_s3, 1024 }
  0xb4   :  { %p5100_p0 = scmp.ne.s32.totalorder %s5602_s3, %s5099_s22  ;;  %p5103_p1 = scmp.lt.u32.totalorder %s5099_s22, %s5602_s3 }
  0xb6   :  { %p5105_p2 = pnand %p5103_p1, %p5100_p0 }
  0xb8   :  { %5108 = shalt.err (!%p5105_p2)
}
  0xb9   :  { %s5109_s30 = scalar_lea.vmem %s273_s11, 1024  ;;  %p5114_p4 = scmp.lt.s32.totalorder %s273_s11, %s273_s11 }
  0xba   :  { %p5110_p3 = scmp.ne.s32.totalorder %s273_s11, %s5109_s30  ;;  %p5115_p5 = scmp.lt.s32.totalorder %s5109_s30, %s5109_s30 }
  0xbc   :  { %p5116_p6 = por %p5115_p5, %p5114_p4 }
  0xbe   :  { %p5117_p7 = pnand %p5116_p6, %p5110_p3 }
  0xc0   :  { %5120 = shalt.err (!%p5117_p7)
}
  0xc1   :  { %278 = dma.hbm_to_vmem [thread:$0]  %s5602_s3, 1024, %s273_s11, [#allocation27], %s5440_s7, %s5440_s7, %s5441_s10  }
  0xc2   :  { %s5121_s29 = scalar_lea.hbm %s5622_s21, 1024 }
  0xc3   :  { %p5122_p8 = scmp.ne.s32.totalorder %s5622_s21, %s5121_s29  ;;  %p5125_p9 = scmp.lt.u32.totalorder %s5121_s29, %s5622_s21 }
  0xc5   :  { %p5127_p10 = pnand %p5125_p9, %p5122_p8 }
  0xc7   :  { %5130 = shalt.err (!%p5127_p10)
}
  0xc8   :  { %s5131_s18 = scalar_lea.vmem %s301_s16, 1024  ;;  %p5136_p12 = scmp.lt.s32.totalorder %s301_s16, %s301_s16 }
  0xc9   :  { %p5132_p11 = scmp.ne.s32.totalorder %s301_s16, %s5131_s18  ;;  %p5137_p13 = scmp.lt.s32.totalorder %s5131_s18, %s5131_s18 }
  0xcb   :  { %p5138_p0 = por %p5137_p13, %p5136_p12 }
  0xcd   :  { %p5139_p1 = pnand %p5138_p0, %p5132_p11 }
  0xcf   :  { %5142 = shalt.err (!%p5139_p1)
}
  0xd0   :  { %306 = dma.hbm_to_vmem [thread:$0]  %s5622_s21, 1024, %s301_s16, [#allocation30], %s5440_s7, %s5440_s7, %s5441_s10  }
  0xd1   :  { %s5450_s3 = smov [#allocation2]   ;;  %s5143_s12 = scalar_lea.hbm %s5482_s5, 256 }
  0xd2   :  { %s86_s23 = sshll.u32 %s5450_s3, 4  ;;  %p5144_p2 = scmp.ne.s32.totalorder %s5482_s5, %s5143_s12  ;;  %s87_s23 = int_to_ptr.vmem [resolvable:$true] %s86_s23 }
  0xd3   :  { %p5147_p3 = scmp.lt.u32.totalorder %s5143_s12, %s5482_s5 }
  0xd5   :  { %p5149_p4 = pnand %p5147_p3, %p5144_p2 }
  0xd7   :  { %5152 = shalt.err (!%p5149_p4)
}
  0xd8   :  { %s5153_s26 = scalar_lea.vmem %s87_s23, 256  ;;  %p5158_p6 = scmp.lt.s32.totalorder %s87_s23, %s87_s23 }
  0xd9   :  { %p5154_p5 = scmp.ne.s32.totalorder %s87_s23, %s5153_s26  ;;  %p5159_p7 = scmp.lt.s32.totalorder %s5153_s26, %s5153_s26 }
  0xdb   :  { %p5160_p8 = por %p5159_p7, %p5158_p6 }
  0xdd   :  { %p5161_p9 = pnand %p5160_p8, %p5154_p5 }
  0xdf   :  { %5164 = shalt.err (!%p5161_p9)
}
  0xe0   :  { %s5451_s8 = smov 128   ;;  %s5452_s21 = smov 8  }
  0xe1   :  { %92 = dma.hbm_to_vmem [thread:$0]  %s5482_s5, 256, %s87_s23, [#allocation3], %s5451_s8, %s5451_s8, %s5452_s21  }
  0xe2   :  { %s5453_s28 = smov [#allocation7]   ;;  %s5454_s19 = smov [#allocation10]  }
  0xe3   :  { %s124_s1 = sshll.u32 %s5453_s28, 4  ;;  %s146_s2 = sshll.u32 %s5454_s19, 4  ;;  %s125_s1 = int_to_ptr.vmem [resolvable:$true] %s124_s1  ;;  %s5699_s2 = int_to_ptr.vmem [resolvable:$true] %s146_s2 }
  0xe4   :  { %s5165_s27 = scalar_lea.hbm %s5527_s14, 1024 }
  0xe5   :  { %p5166_p10 = scmp.ne.s32.totalorder %s5527_s14, %s5165_s27  ;;  %p5169_p11 = scmp.lt.u32.totalorder %s5165_s27, %s5527_s14 }
  0xe7   :  { %p5171_p12 = pnand %p5169_p11, %p5166_p10 }
  0xe9   :  { %5174 = shalt.err (!%p5171_p12)
}
  0xea   :  { %s5175_s0 = scalar_lea.vmem %s125_s1, 1024  ;;  %p5180_p0 = scmp.lt.s32.totalorder %s125_s1, %s125_s1 }
  0xeb   :  { %p5176_p13 = scmp.ne.s32.totalorder %s125_s1, %s5175_s0  ;;  %p5181_p1 = scmp.lt.s32.totalorder %s5175_s0, %s5175_s0 }
  0xed   :  { %p5182_p2 = por %p5181_p1, %p5180_p0 }
  0xef   :  { %p5183_p3 = pnand %p5182_p2, %p5176_p13 }
  0xf1   :  { %5186 = shalt.err (!%p5183_p3)
}
  0xf2   :  { %130 = dma.hbm_to_vmem [thread:$0]  %s5527_s14, 1024, %s125_s1, [#allocation6], %s5440_s7, %s5440_s7, %s5441_s10  }
  0xf3   :  { %s5187_s5 = scalar_lea.hbm %s5537_s24, 1024 }
  0xf4   :  { %p5188_p4 = scmp.ne.s32.totalorder %s5537_s24, %s5187_s5  ;;  %p5191_p5 = scmp.lt.u32.totalorder %s5187_s5, %s5537_s24 }
  0xf6   :  { %p5193_p6 = pnand %p5191_p5, %p5188_p4 }
  0xf8   :  { %5196 = shalt.err (!%p5193_p6)
}
  0xf9   :  { %s5197_s25 = scalar_lea.vmem %s5699_s2, 1024  ;;  %p5202_p8 = scmp.lt.s32.totalorder %s5699_s2, %s5699_s2 }
  0xfa   :  { %p5198_p7 = scmp.ne.s32.totalorder %s5699_s2, %s5197_s25  ;;  %p5203_p9 = scmp.lt.s32.totalorder %s5197_s25, %s5197_s25 }
  0xfc   :  { %p5204_p10 = por %p5203_p9, %p5202_p8 }
  0xfe   :  { %p5205_p11 = pnand %p5204_p10, %p5198_p7 }
 0x100   :  { %5208 = shalt.err (!%p5205_p11)
}
 0x101   :  { %152 = dma.hbm_to_vmem [thread:$0]  %s5537_s24, 1024, %s5699_s2, [#allocation9], %s5440_s7, %s5440_s7, %s5441_s10  }
 0x102   :  { %s5455_s14 = smov [#allocation13]   ;;  %s5456_s15 = smov [#allocation16]  }
 0x103   :  { %s168_s11 = sshll.u32 %s5455_s14, 4  ;;  %s190_s16 = sshll.u32 %s5456_s15, 4  ;;  %s169_s11 = int_to_ptr.vmem [resolvable:$true] %s168_s11  ;;  %s5720_s16 = int_to_ptr.vmem [resolvable:$true] %s190_s16 }
 0x104   :  { %s5209_s22 = scalar_lea.hbm %s5547_s6, 1024 }
 0x105   :  { %p5210_p12 = scmp.ne.s32.totalorder %s5547_s6, %s5209_s22  ;;  %p5213_p13 = scmp.lt.u32.totalorder %s5209_s22, %s5547_s6 }
 0x107   :  { %p5215_p0 = pnand %p5213_p13, %p5210_p12 }
 0x109   :  { %5218 = shalt.err (!%p5215_p0)
}
 0x10a   :  { %s5219_s30 = scalar_lea.vmem %s169_s11, 1024  ;;  %p5224_p2 = scmp.lt.s32.totalorder %s169_s11, %s169_s11 }
 0x10b   :  { %p5220_p1 = scmp.ne.s32.totalorder %s169_s11, %s5219_s30  ;;  %p5225_p3 = scmp.lt.s32.totalorder %s5219_s30, %s5219_s30 }
 0x10d   :  { %p5226_p4 = por %p5225_p3, %p5224_p2 }
 0x10f   :  { %p5227_p5 = pnand %p5226_p4, %p5220_p1 }
 0x111   :  { %5230 = shalt.err (!%p5227_p5)
}
 0x112   :  { %174 = dma.hbm_to_vmem [thread:$0]  %s5547_s6, 1024, %s169_s11, [#allocation12], %s5440_s7, %s5440_s7, %s5441_s10  }
 0x113   :  { %s5231_s24 = scalar_lea.hbm %s5557_s20, 1024 }
 0x114   :  { %p5232_p6 = scmp.ne.s32.totalorder %s5557_s20, %s5231_s24  ;;  %p5235_p7 = scmp.lt.u32.totalorder %s5231_s24, %s5557_s20 }
 0x116   :  { %p5237_p8 = pnand %p5235_p7, %p5232_p6 }
 0x118   :  { %5240 = shalt.err (!%p5237_p8)
}
 0x119   :  { %s5241_s29 = scalar_lea.vmem %s5720_s16, 1024  ;;  %p5246_p10 = scmp.lt.s32.totalorder %s5720_s16, %s5720_s16 }
 0x11a   :  { %p5242_p9 = scmp.ne.s32.totalorder %s5720_s16, %s5241_s29  ;;  %p5247_p11 = scmp.lt.s32.totalorder %s5241_s29, %s5241_s29 }
 0x11c   :  { %p5248_p12 = por %p5247_p11, %p5246_p10 }
 0x11e   :  { %p5249_p13 = pnand %p5248_p12, %p5242_p9 }
 0x120   :  { %5252 = shalt.err (!%p5249_p13)
}
 0x121   :  { %s6690_s6 = sld [smem:[#allocation51_spill]]  ;;  %s5457_s18 = smov [#allocation19]  }
 0x122   :  { %196 = dma.hbm_to_vmem [thread:$0]  %s5557_s20, 1024, %s5720_s16, [#allocation15], %s5440_s7, %s5440_s7, %s5441_s10  }
 0x123   :  { %s212_s3 = sshll.u32 %s5457_s18, 4  ;;  %s5458_s23 = smov [#allocation22]   ;;  %s213_s3 = int_to_ptr.vmem [resolvable:$true] %s212_s3 }
 0x124   :  { %s234_s12 = sshll.u32 %s5458_s23, 4  ;;  %s5741_s12 = int_to_ptr.vmem [resolvable:$true] %s234_s12 }
 0x127   :  { %s5253_s26 = scalar_lea.hbm %s6690_s6, 1024 }
 0x128   :  { %p5254_p0 = scmp.ne.s32.totalorder %s6690_s6, %s5253_s26  ;;  %p5257_p1 = scmp.lt.u32.totalorder %s5253_s26, %s6690_s6 }
 0x12a   :  { %p5259_p2 = pnand %p5257_p1, %p5254_p0 }
 0x12c   :  { %5262 = shalt.err (!%p5259_p2)
}
 0x12d   :  { %s5263_s28 = scalar_lea.vmem %s213_s3, 1024  ;;  %p5268_p4 = scmp.lt.s32.totalorder %s213_s3, %s213_s3 }
 0x12e   :  { %p5264_p3 = scmp.ne.s32.totalorder %s213_s3, %s5263_s28  ;;  %p5269_p5 = scmp.lt.s32.totalorder %s5263_s28, %s5263_s28 }
 0x130   :  { %p5270_p6 = por %p5269_p5, %p5268_p4 }
 0x132   :  { %p5271_p7 = pnand %p5270_p6, %p5264_p3 }
 0x134   :  { %5274 = shalt.err (!%p5271_p7)
}
 0x135   :  { %s6691_s20 = sld [smem:[#allocation52_spill]] }
 0x136   :  { %218 = dma.hbm_to_vmem [thread:$0]  %s6690_s6, 1024, %s213_s3, [#allocation18], %s5440_s7, %s5440_s7, %s5441_s10  }
 0x13b   :  { %s5275_s1 = scalar_lea.hbm %s6691_s20, 2048 }
 0x13c   :  { %p5276_p8 = scmp.ne.s32.totalorder %s6691_s20, %s5275_s1  ;;  %p5279_p9 = scmp.lt.u32.totalorder %s5275_s1, %s6691_s20 }
 0x13e   :  { %p5281_p10 = pnand %p5279_p9, %p5276_p8 }
 0x140   :  { %5284 = shalt.err (!%p5281_p10)
}
 0x141   :  { %s5285_s19 = scalar_lea.vmem %s5741_s12, 2048  ;;  %p5290_p12 = scmp.lt.s32.totalorder %s5741_s12, %s5741_s12 }
 0x142   :  { %p5286_p11 = scmp.ne.s32.totalorder %s5741_s12, %s5285_s19  ;;  %p5291_p13 = scmp.lt.s32.totalorder %s5285_s19, %s5285_s19 }
 0x144   :  { %p5292_p0 = por %p5291_p13, %p5290_p12 }
 0x146   :  { %p5293_p1 = pnand %p5292_p0, %p5286_p11 }
 0x148   :  { %5296 = shalt.err (!%p5293_p1)
}
 0x149   :  { %s6692_s2 = sld [smem:[#allocation53_spill]]  ;;  %s5459_s27 = smov [#allocation25]  }
 0x14a   :  { %240 = dma.hbm_to_vmem [thread:$0]  %s6691_s20, 2048, %s5741_s12, [#allocation21], %s5451_s8, %s5451_s8, %s5452_s21  }
 0x14b   :  { %s259_s0 = sshll.u32 %s5459_s27, 4  ;;  %s5460_s5 = smov [#allocation28]   ;;  %s260_s0 = int_to_ptr.vmem [resolvable:$true] %s259_s0 }
 0x14c   :  { %s286_s25 = sshll.u32 %s5460_s5, 4  ;;  %s5762_s25 = int_to_ptr.vmem [resolvable:$true] %s286_s25 }
 0x14f   :  { %s5297_s14 = scalar_lea.hbm %s6692_s2, 16 }
 0x150   :  { %p5298_p2 = scmp.ne.s32.totalorder %s6692_s2, %s5297_s14  ;;  %p5301_p3 = scmp.lt.u32.totalorder %s5297_s14, %s6692_s2 }
 0x152   :  { %p5303_p4 = pnand %p5301_p3, %p5298_p2 }
 0x154   :  { %5306 = shalt.err (!%p5303_p4)
}
 0x155   :  { %s5307_s11 = scalar_lea.vmem %s260_s0, 16  ;;  %s5311_s15 = scalar_lea.vmem %s260_s0, 32 }
 0x156   :  { %p5308_p5 = scmp.ne.s32.totalorder %s260_s0, %s5307_s11  ;;  %p5312_p6 = scmp.lt.s32.totalorder %s260_s0, %s260_s0 }
 0x157   :  { %p5313_p7 = scmp.lt.s32.totalorder %s5311_s15, %s5307_s11 }
 0x159   :  { %p5314_p8 = por %p5313_p7, %p5312_p6 }
 0x15b   :  { %p5315_p9 = pnand %p5314_p8, %p5308_p5 }
 0x15d   :  { %5318 = shalt.err (!%p5315_p9)
}
 0x15e   :  { %s6693_s8 = sld [smem:[#allocation57_spill]] }
 0x15f   :  { %262 = dma.hbm_to_vmem [thread:$0]  %s6692_s2, 16, %s260_s0, [#allocation24]  }
 0x164   :  { %s5319_s21 = scalar_lea.hbm %s6693_s8, 1024 }
 0x165   :  { %p5320_p10 = scmp.ne.s32.totalorder %s6693_s8, %s5319_s21  ;;  %p5323_p11 = scmp.lt.u32.totalorder %s5319_s21, %s6693_s8 }
 0x167   :  { %p5325_p12 = pnand %p5323_p11, %p5320_p10 }
 0x169   :  { %5328 = shalt.err (!%p5325_p12)
}
 0x16a   :  { %s5329_s16 = scalar_lea.vmem %s5762_s25, 1024  ;;  %p5334_p0 = scmp.lt.s32.totalorder %s5762_s25, %s5762_s25 }
 0x16b   :  { %p5330_p13 = scmp.ne.s32.totalorder %s5762_s25, %s5329_s16  ;;  %p5335_p1 = scmp.lt.s32.totalorder %s5329_s16, %s5329_s16 }
 0x16d   :  { %p5336_p2 = por %p5335_p1, %p5334_p0 }
 0x16f   :  { %p5337_p3 = pnand %p5336_p2, %p5330_p13 }
 0x171   :  { %5340 = shalt.err (!%p5337_p3)
}
 0x172   :  { %292 = dma.hbm_to_vmem [thread:$0]  %s6693_s8, 1024, %s5762_s25, [#allocation27], %s5440_s7, %s5440_s7, %s5441_s10  }
 0x173   :  { %s5461_s22 = smov [#allocation31]   ;;  %s5341_s24 = scalar_lea.hbm %s5632_s13, 1024 }
 0x174   :  { %s314_s30 = sshll.u32 %s5461_s22, 4  ;;  %p5342_p4 = scmp.ne.s32.totalorder %s5632_s13, %s5341_s24  ;;  %s315_s30 = int_to_ptr.vmem [resolvable:$true] %s314_s30 }
 0x175   :  { %p5345_p5 = scmp.lt.u32.totalorder %s5341_s24, %s5632_s13 }
 0x177   :  { %p5347_p6 = pnand %p5345_p5, %p5342_p4 }
 0x179   :  { %5350 = shalt.err (!%p5347_p6)
}
 0x17a   :  { %s5351_s29 = scalar_lea.vmem %s315_s30, 1024  ;;  %p5356_p8 = scmp.lt.s32.totalorder %s315_s30, %s315_s30 }
 0x17b   :  { %p5352_p7 = scmp.ne.s32.totalorder %s315_s30, %s5351_s29  ;;  %p5357_p9 = scmp.lt.s32.totalorder %s5351_s29, %s5351_s29 }
 0x17d   :  { %p5358_p10 = por %p5357_p9, %p5356_p8 }
 0x17f   :  { %p5359_p11 = pnand %p5358_p10, %p5352_p7 }
 0x181   :  { %5362 = shalt.err (!%p5359_p11)
}
 0x182   :  { %320 = dma.hbm_to_vmem [thread:$0]  %s5632_s13, 1024, %s315_s30, [#allocation30], %s5440_s7, %s5440_s7, %s5441_s10  }
 0x183   :  { %5385 = dma.done.wait [#allocation3], 256  }
 0x184   :  { %5386 = vsyncadd [#allocation3], 4294967040 }
 0x185   :  { %5387 = dma.done.wait [#allocation6], 2048  }
 0x186   :  { %5388 = vsyncadd [#allocation6], 4294965248 }
 0x187   :  { %5389 = dma.done.wait [#allocation9], 1040  }
 0x188   :  { %5390 = vsyncadd [#allocation9], 4294966256 }
 0x189   :  { %5391 = dma.done.wait [#allocation12], 1040  }
 0x18a   :  { %5392 = vsyncadd [#allocation12], 4294966256 }
 0x18b   :  { %5393 = dma.done.wait [#allocation15], 1040  }
 0x18c   :  { %5394 = vsyncadd [#allocation15], 4294966256 }
 0x18d   :  { %5395 = dma.done.wait [#allocation18], 1040  }
 0x18e   :  { %5396 = vsyncadd [#allocation18], 4294966256 }
 0x18f   :  { %5397 = dma.done.wait [#allocation21], 2064  }
 0x190   :  { %5398 = vsyncadd [#allocation21], 4294965232 }
 0x191   :  { %5399 = dma.done.wait [#allocation24], 1040  }
 0x192   :  { %5400 = vsyncadd [#allocation24], 4294966256 }
 0x193   :  { %5401 = dma.done.wait [#allocation27], 2048  }
 0x194   :  { %5402 = vsyncadd [#allocation27], 4294965248 }
 0x195   :  { %5403 = dma.done.wait [#allocation30], 2048  }
 0x196   :  { %5404 = vsyncadd [#allocation30], 4294965248  ;;  %v6644_v0 = vmov 0   ;;  %v5463_v1 = vmov 1   ;;  %v416_v2 = vld [vmem:[#allocation2] sm:$0xff]  ;;  %v5789_v3 = vld [vmem:[#allocation2 + $0x8] sm:$0xff]  ;;  %v6646_v63 = vlaneseq }
 0x197   :  { %4769 = vset.pattern.permute.xlu0 %v6644_v0  ;;  %4770 = vset.pattern.permute.xlu1 %v5463_v1  ;;  %v440_v4 = vadd.s32 119, %v416_v2  ;;  %v441_v5 = vadd.s32 119, %v5789_v3  ;;  %v464_v6 = vadd.s32 123, %v416_v2  ;;  %v465_v7 = vadd.s32 123, %v5789_v3  ;;  %s6694_s13 = sld [smem:[#allocation50_spill]]  ;;  %s6695_s7 = sld [smem:[#allocation44_spill]] }
 0x198   :  { %419 = vperm.xlu0 %4769, %v416_v2   ;;  %v489_v8 = vadd.s32 135, %v5789_v3  ;;  %v488_v9 = vadd.s32 135, %v416_v2  ;;  %v512_v10 = vadd.s32 147, %v416_v2  ;;  %v536_v11 = vadd.s32 157, %v416_v2  ;;  %v4813_v52 = vld [vmem:[#allocation5] sm:$0xff]   ;;  %v4815_v54 = vld [vmem:[#allocation5 + $0x8] sm:$0xff]  }
 0x199   :  { %443 = vperm.xlu1 %4770, %v440_v4   ;;  %v513_v12 = vadd.s32 147, %v5789_v3  ;;  %v561_v13 = vadd.s32 163, %v5789_v3  ;;  %v5464_v14 = vmov 2   ;;  %v5465_v15 = vmov 3   ;;  %4160 = vmatprep.subr.bf16.mxu1 %v4813_v52  ;;  %v4817_v58 = vld [vmem:[#allocation5 + $0x10] sm:$0xff]   ;;  %s6696_s10 = sld [smem:[#allocation45_spill]] }
 0x19a   :  { %v5466_v16 = vmov 5   ;;  %v5467_v17 = vmov 4   ;;  %v5468_v19 = vmov 6   ;;  %v608_v20 = vadd.s32 171, %v416_v2  ;;  %4161 = vmatpush3.bf16.msra.mxu1 %v4813_v52  ;;  %s6697_s6 = sld [smem:[#allocation46_spill]]  ;;  %s6698_s18 = sld [smem:[#allocation49_spill]] }
 0x19b   :  { %v537_v22 = vadd.s32 157, %v5789_v3  ;;  %v5469_v25 = vmov 8   ;;  %v560_v27 = vadd.s32 163, %v416_v2  ;;  %v584_v30 = vadd.s32 169, %v416_v2  ;;  %4162 = vmatprep.subr.bf16.mxu1 %v4815_v54  ;;  %s6699_s3 = sld [smem:[#allocation54_spill]]  ;;  %s6707_s23 = sld [smem:[#allocation55_spill]] }
 0x19c   :  { %422 = vperm.xlu0 %4769, %v5789_v3   ;;  %v5470_v33 = vmov 7   ;;  %v585_v35 = vadd.s32 169, %v5789_v3  ;;  %v609_v38 = vadd.s32 171, %v5789_v3  ;;  %v6651_v43 = vmov 0.0   ;;  %s6711_s12 = sld [smem:[#allocation47_spill]]  ;;  %s6718_s26 = sld [smem:[#allocation56_spill]] }
 0x19d   :  { %446 = vperm.xlu1 %4770, %v441_v5   ;;  %v4793_v18 = vld [vmem:[%s6694_s13 + $0x40] sm:$0xff]   ;;  %v4795_v23 = vld [vmem:[%s6694_s13 + $0x48] sm:$0xff]   ;;  %v4797_v26 = vld [vmem:[%s6694_s13 + $0x50] sm:$0xff]   ;;  %v5834_v3 = vand.u32 127, %v6646_v63  ;;  %s6719_s28 = sld [smem:[#allocation58_spill]]  ;;  %s6741_s20 = sld [smem:[#allocation48_spill]] }
 0x19e   :  { %v4794_v21 = vld [vmem:[%s6694_s13] sm:$0xff]   ;;  %3899 = vmatprep.subr.bf16.mxu0 %v4793_v18  ;;  %v4796_v24 = vld [vmem:[%s6694_s13 + $0x8] sm:$0xff]   ;;  %v4798_v28 = vld [vmem:[%s6694_s13 + $0x10] sm:$0xff]   ;;  %4163 = vmatpush3.bf16.msra.mxu1 %v4815_v54  ;;  %s5473_s1 = smov [#allocation32]  }
 0x19f   :  { %3900 = vmatpush3.bf16.msra.mxu0 %v4794_v21  ;;  %v4799_v29 = vld [vmem:[%s6694_s13 + $0x58] sm:$0xff]   ;;  %v4801_v32 = vld [vmem:[%s6694_s13 + $0x60] sm:$0xff]   ;;  %v4803_v36 = vld [vmem:[%s6694_s13 + $0x68] sm:$0xff]   ;;  %4164 = vmatprep.subr.bf16.mxu1 %v4817_v58  ;;  %v5837_v5 = vadd.s32 128, %v5834_v3  ;;  %s3633_s19 = sshll.u32 %s5473_s1, 4  ;;  %s3634_s19 = int_to_ptr.vmem [resolvable:$true] %s3633_s19 }
 0x1a0   :  { %4771 = vset.pattern.permute.xlu0 %v5464_v14  ;;  %3901 = vmatprep.subr.bf16.mxu0 %v4795_v23  ;;  %v4800_v31 = vld [vmem:[%s6694_s13 + $0x18] sm:$0xff]   ;;  %v4802_v34 = vld [vmem:[%s6694_s13 + $0x20] sm:$0xff]   ;;  %v4804_v37 = vld [vmem:[%s6694_s13 + $0x28] sm:$0xff]   ;;  %s5363_s2 = scalar_lea.vmem %s3634_s19, 128  ;;  %p5368_p13 = scmp.lt.s32.totalorder %s3634_s19, %s3634_s19 }
 0x1a1   :  { %467 = vperm.xlu0 %4771, %v464_v6   ;;  %4772 = vset.pattern.permute.xlu1 %v5464_v14  ;;  %v4805_v39 = vld [vmem:[%s6694_s13 + $0x70] sm:$0xff]   ;;  %v4807_v41 = vld [vmem:[%s6694_s13 + $0x78] sm:$0xff]   ;;  %v787_v44 = vld [vmem:[%s6695_s7] sm:$0xff]  ;;  %p5364_p12 = scmp.ne.s32.totalorder %s3634_s19, %s5363_s2  ;;  %p5369_p0 = scmp.lt.s32.totalorder %s5363_s2, %s5363_s2 }
 0x1a2   :  { %470 = vperm.xlu1 %4772, %v465_v7   ;;  %v4806_v40 = vld [vmem:[%s6694_s13 + $0x30] sm:$0xff]   ;;  %v4808_v42 = vld [vmem:[%s6694_s13 + $0x38] sm:$0xff]   ;;  %v788_v45 = vld [vmem:[%s6695_s7 + $0x8] sm:$0xff]  ;;  %v819_v46 = vadd.s32 5, %v787_v44  ;;  %v851_v55 = vadd.s32 11, %v787_v44  ;;  %4165 = vmatpush3.bf16.msra.mxu1 %v4817_v58 }
 0x1a3   :  { %3902 = vmatpush3.bf16.msra.mxu0 %v4796_v24  ;;  %v789_v47 = vld [vmem:[%s6695_s7 + $0x10] sm:$0xff]  ;;  %v820_v48 = vadd.s32 5, %v788_v45  ;;  %v790_v50 = vld [vmem:[%s6695_s7 + $0x18] sm:$0xff]  ;;  %v852_v51 = vadd.s32 11, %v788_v45  ;;  %p5370_p1 = por %p5369_p0, %p5368_p13 }
 0x1a4   :  { %3903 = vmatprep.subr.bf16.mxu0 %v4797_v26  ;;  %v821_v49 = vadd.s32 5, %v789_v47  ;;  %v822_v53 = vadd.s32 5, %v790_v50  ;;  %v853_v56 = vadd.s32 11, %v789_v47  ;;  %v854_v57 = vadd.s32 11, %v790_v50 }
 0x1a5   :  { %4774 = vset.pattern.permute.xlu0 %v5465_v15  ;;  %p5371_p2 = pnand %p5370_p1, %p5364_p12 }
 0x1a6   :  { %494 = vperm.xlu0 %4774, %v489_v8   ;;  %4773 = vset.pattern.permute.xlu1 %v5465_v15 }
 0x1a7   :  { %491 = vperm.xlu1 %4773, %v488_v9   ;;  %3904 = vmatpush3.bf16.msra.mxu0 %v4798_v28 }
 0x1a8   :  { %3905 = vmatprep.subr.bf16.mxu0 %v4799_v29 }
 0x1aa   :  { %4776 = vset.pattern.permute.xlu0 %v5466_v16 }
 0x1ab   :  { %539 = vperm.xlu0 %4776, %v536_v11   ;;  %4775 = vset.pattern.permute.xlu1 %v5467_v17 }
 0x1ac   :  { %515 = vperm.xlu1 %4775, %v512_v10   ;;  %3906 = vmatpush3.bf16.msra.mxu0 %v4800_v31 }
 0x1ad   :  { %3907 = vmatprep.subr.bf16.mxu0 %v4801_v32 }
 0x1af   :  { %4779 = vset.pattern.permute.xlu0 %v5468_v19 }
 0x1b0   :  { %566 = vperm.xlu0 %4779, %v561_v13   ;;  %518 = vperm.xlu1 %4775, %v513_v12  }
 0x1b1   :  { %3908 = vmatpush3.bf16.msra.mxu0 %v4802_v34 }
 0x1b2   :  { %3909 = vmatprep.subr.bf16.mxu0 %v4803_v36 }
 0x1b4   :  { %4781 = vset.pattern.permute.xlu0 %v5469_v25  ;;  %4777 = vset.pattern.permute.xlu1 %v5466_v16 }
 0x1b5   :  { %611 = vperm.xlu0 %4781, %v608_v20   ;;  %542 = vperm.xlu1 %4777, %v537_v22  }
 0x1b6   :  { %3910 = vmatpush3.bf16.msra.mxu0 %v4804_v37 }
 0x1b7   :  { %3911 = vmatprep.subr.bf16.mxu0 %v4805_v39 }
 0x1b9   :  { %4784 = vset.pattern.permute.xlu0 %v6644_v0  ;;  %4778 = vset.pattern.permute.xlu1 %v5468_v19 }
 0x1ba   :  { %563 = vperm.xlu1 %4778, %v560_v27   ;;  %3912 = vmatpush3.bf16.msra.mxu0 %v4806_v40 }
 0x1bb   :  { %3913 = vmatprep.subr.bf16.mxu0 %v4807_v41  ;;  %795 = vperm.xlu0 %4784, %v788_v45  }
 0x1be   :  { %4780 = vset.pattern.permute.xlu1 %v5470_v33  ;;  %3914 = vmatpush3.bf16.msra.mxu0 %v4808_v42 }
 0x1bf   :  { %587 = vperm.xlu1 %4780, %v584_v30   ;;  %4180 = vmatprep.subr.bf16.mxu0 %v6651_v43 }
 0x1c0   :  { %798 = vperm.xlu0 %4784, %v789_v47  }
 0x1c3   :  { %590 = vperm.xlu1 %4780, %v585_v35  }
 0x1c4   :  { %4787 = vset.pattern.permute.xlu0 %v5463_v1 }
 0x1c5   :  { %830 = vperm.xlu0 %4787, %v821_v49  }
 0x1c7   :  { %4782 = vset.pattern.permute.xlu1 %v5469_v25 }
 0x1c8   :  { %614 = vperm.xlu1 %4782, %v609_v38  }
 0x1c9   :  { %4790 = vset.pattern.permute.xlu0 %v5464_v14 }
 0x1ca   :  { %859 = vperm.xlu0 %4790, %v852_v51  }
 0x1cc   :  { %4783 = vset.pattern.permute.xlu1 %v6644_v0 }
 0x1cd   :  { %792 = vperm.xlu1 %4783, %v787_v44  }
 0x1ce   :  { %4791 = vset.pattern.permute.xlu0 %v6644_v0 }
 0x1d1   :  { %4785 = vset.pattern.permute.xlu1 %v5463_v1 }
 0x1d2   :  { %824 = vperm.xlu1 %4785, %v819_v46  }
 0x1d6   :  { %827 = vperm.xlu1 %4785, %v820_v48  }
 0x1da   :  { %4786 = vset.pattern.permute.xlu1 %v6644_v0 }
 0x1db   :  { %801 = vperm.xlu1 %4786, %v790_v50  }
 0x1df   :  { %4788 = vset.pattern.permute.xlu1 %v5463_v1 }
 0x1e0   :  { %833 = vperm.xlu1 %4788, %v822_v53  }
 0x1e4   :  { %4789 = vset.pattern.permute.xlu1 %v5464_v14 }
 0x1e5   :  { %856 = vperm.xlu1 %4789, %v851_v55  }
 0x1e9   :  { %862 = vperm.xlu1 %4789, %v853_v56  }
 0x1ed   :  { %865 = vperm.xlu1 %4789, %v854_v57  }
 0x1f1   :  { %4792 = vset.pattern.permute.xlu1 %v6644_v0 }
 0x217   :  { %v420_v61 = vpop.permute.xlu0 %419 }
 0x218   :  { %v444_v59 = vpop.permute.xlu1 %443  ;;  %vm424_vm4 = vcmp.eq.s32.totalorder %v5834_v3, %v420_v61  ;;  %vm425_vm5 = vcmp.eq.s32.totalorder %v5837_v5, %v420_v61 }
 0x219   :  { %vm448_vm6 = vcmp.eq.s32.totalorder %v5834_v3, %v444_v59  ;;  %vm449_vm7 = vcmp.eq.s32.totalorder %v5837_v5, %v444_v59  ;;  %v3683_v12 = vsel %vm424_vm4, 1.0, %v6651_v43  ;;  %v3684_v13 = vsel %vm425_vm5, 1.0, %v6651_v43 }
 0x21a   :  { %v3687_v15 = vsel %vm448_vm6, 1.0, %v6651_v43  ;;  %v3688_v16 = vsel %vm449_vm7, 1.0, %v6651_v43 }
 0x21b   :  { %v423_v2 = vpop.permute.xlu0 %422  ;;  %v460_v24 = vadd.f32 %v3687_v15, %v3683_v12  ;;  %v461_v25 = vadd.f32 %v3688_v16, %v3684_v13 }
 0x21c   :  { %v447_v60 = vpop.permute.xlu1 %446  ;;  %vm426_vm0 = vcmp.eq.s32.totalorder %v5834_v3, %v423_v2  ;;  %vm427_vm1 = vcmp.eq.s32.totalorder %v5837_v5, %v423_v2 }
 0x21d   :  { %vm450_vm2 = vcmp.eq.s32.totalorder %v5834_v3, %v447_v60  ;;  %vm451_vm3 = vcmp.eq.s32.totalorder %v5837_v5, %v447_v60  ;;  %v3685_v8 = vsel %vm426_vm0, 1.0, %v6651_v43  ;;  %v3686_v9 = vsel %vm427_vm1, 1.0, %v6651_v43 }
 0x21e   :  { %v3689_v10 = vsel %vm450_vm2, 1.0, %v6651_v43  ;;  %v3690_v11 = vsel %vm451_vm3, 1.0, %v6651_v43 }
 0x21f   :  { %v462_v17 = vadd.f32 %v3689_v10, %v3685_v8  ;;  %v463_v18 = vadd.f32 %v3690_v11, %v3686_v9 }
 0x220   :  { %v468_v6 = vpop.permute.xlu0 %467 }
 0x221   :  { %v471_v62 = vpop.permute.xlu1 %470  ;;  %vm472_vm10 = vcmp.eq.s32.totalorder %v5834_v3, %v468_v6  ;;  %vm473_vm11 = vcmp.eq.s32.totalorder %v5837_v5, %v468_v6 }
 0x222   :  { %vm474_vm8 = vcmp.eq.s32.totalorder %v5834_v3, %v471_v62  ;;  %vm475_vm9 = vcmp.eq.s32.totalorder %v5837_v5, %v471_v62  ;;  %v3691_v22 = vsel %vm472_vm10, 1.0, %v6651_v43  ;;  %v3692_v23 = vsel %vm473_vm11, 1.0, %v6651_v43 }
 0x223   :  { %v3693_v20 = vsel %vm474_vm8, 1.0, %v6651_v43  ;;  %v3694_v21 = vsel %vm475_vm9, 1.0, %v6651_v43  ;;  %v484_v31 = vadd.f32 %v3691_v22, %v460_v24  ;;  %v485_v32 = vadd.f32 %v3692_v23, %v461_v25 }
 0x224   :  { %v486_v26 = vadd.f32 %v3693_v20, %v462_v17  ;;  %v487_v27 = vadd.f32 %v3694_v21, %v463_v18 }
 0x225   :  { %v495_v14 = vpop.permute.xlu0 %494 }
 0x226   :  { %v492_v1 = vpop.permute.xlu1 %491  ;;  %vm498_vm14 = vcmp.eq.s32.totalorder %v5834_v3, %v495_v14  ;;  %vm499_vm15 = vcmp.eq.s32.totalorder %v5837_v5, %v495_v14 }
 0x227   :  { %vm496_vm12 = vcmp.eq.s32.totalorder %v5834_v3, %v492_v1  ;;  %vm497_vm13 = vcmp.eq.s32.totalorder %v5837_v5, %v492_v1  ;;  %v3697_v33 = vsel %vm498_vm14, 1.0, %v6651_v43  ;;  %v3698_v34 = vsel %vm499_vm15, 1.0, %v6651_v43 }
 0x228   :  { %v3695_v28 = vsel %vm496_vm12, 1.0, %v6651_v43  ;;  %v3696_v29 = vsel %vm497_vm13, 1.0, %v6651_v43  ;;  %v510_v40 = vadd.f32 %v3697_v33, %v486_v26  ;;  %v511_v41 = vadd.f32 %v3698_v34, %v487_v27 }
 0x229   :  { %v508_v38 = vadd.f32 %v3695_v28, %v484_v31  ;;  %v509_v39 = vadd.f32 %v3696_v29, %v485_v32  ;;  %v4809_v28 = vld [vmem:[#allocation7] sm:$0xff]   ;;  %v4810_v29 = vld [vmem:[#allocation7 + $0x8] sm:$0xff]  }
 0x22a   :  { %v540_v30 = vpop.permute.xlu0 %539  ;;  %v4814_v31 = vld [vmem:[#allocation7 + $0x20] sm:$0xff]   ;;  %v4816_v32 = vld [vmem:[#allocation7 + $0x28] sm:$0xff]  }
 0x22b   :  { %v516_v4 = vpop.permute.xlu1 %515  ;;  %vm544_vm4 = vcmp.eq.s32.totalorder %v5834_v3, %v540_v30  ;;  %vm545_vm5 = vcmp.eq.s32.totalorder %v5837_v5, %v540_v30  ;;  %v4811_v30 = vld [vmem:[#allocation7 + $0x10] sm:$0xff]  }
 0x22c   :  { %vm520_vm0 = vcmp.eq.s32.totalorder %v5834_v3, %v516_v4  ;;  %vm521_vm1 = vcmp.eq.s32.totalorder %v5837_v5, %v516_v4  ;;  %v3703_v48 = vsel %vm544_vm4, 1.0, %v6651_v43  ;;  %v3704_v49 = vsel %vm545_vm5, 1.0, %v6651_v43 }
 0x22d   :  { %v3699_v36 = vsel %vm520_vm0, 1.0, %v6651_v43  ;;  %v3700_v37 = vsel %vm521_vm1, 1.0, %v6651_v43 }
 0x22e   :  { %v532_v44 = vadd.f32 %v3699_v36, %v508_v38  ;;  %v533_v45 = vadd.f32 %v3700_v37, %v509_v39  ;;  %v4818_v38 = vld [vmem:[#allocation7 + $0x30] sm:$0xff]   ;;  %v4819_v39 = vld [vmem:[#allocation5 + $0x18] sm:$0xff]  }
 0x22f   :  { %v519_v7 = vpop.permute.xlu1 %518  ;;  %v567_v42 = vpop.permute.xlu0 %566  ;;  %4166 = vmatprep.subr.bf16.mxu1 %v4819_v39 }
 0x230   :  { %vm522_vm2 = vcmp.eq.s32.totalorder %v5834_v3, %v519_v7  ;;  %vm523_vm3 = vcmp.eq.s32.totalorder %v5837_v5, %v519_v7  ;;  %vm570_vm10 = vcmp.eq.s32.totalorder %v5834_v3, %v567_v42  ;;  %vm571_vm11 = vcmp.eq.s32.totalorder %v5837_v5, %v567_v42  ;;  %4167 = vmatpush3.bf16.msra.mxu1 %v4819_v39 }
 0x231   :  { %v3701_v46 = vsel %vm522_vm2, 1.0, %v6651_v43  ;;  %v3702_v47 = vsel %vm523_vm3, 1.0, %v6651_v43  ;;  %v556_v55 = vadd.f32 %v3703_v48, %v532_v44  ;;  %v557_v56 = vadd.f32 %v3704_v49, %v533_v45  ;;  %v4821_v44 = vld [vmem:[#allocation5 + $0x20] sm:$0xff]  }
 0x232   :  { %v534_v53 = vadd.f32 %v3701_v46, %v510_v40  ;;  %v535_v54 = vadd.f32 %v3702_v47, %v511_v41  ;;  %v3709_v62 = vsel %vm570_vm10, 1.0, %v6651_v43  ;;  %v3710_v1 = vsel %vm571_vm11, 1.0, %v6651_v43  ;;  %v4820_v41 = vld [vmem:[#allocation7 + $0x38] sm:$0xff]   ;;  %4168 = vmatprep.subr.bf16.mxu1 %v4821_v44 }
 0x234   :  { %v543_v19 = vpop.permute.xlu1 %542  ;;  %v612_v59 = vpop.permute.xlu0 %611  ;;  %4169 = vmatpush3.bf16.msra.mxu1 %v4821_v44 }
 0x235   :  { %vm546_vm6 = vcmp.eq.s32.totalorder %v5834_v3, %v543_v19  ;;  %vm547_vm7 = vcmp.eq.s32.totalorder %v5837_v5, %v543_v19  ;;  %vm616_vm0 = vcmp.eq.s32.totalorder %v5834_v3, %v612_v59  ;;  %vm617_vm1 = vcmp.eq.s32.totalorder %v5837_v5, %v612_v59 }
 0x236   :  { %v3705_v51 = vsel %vm546_vm6, 1.0, %v6651_v43  ;;  %v3706_v52 = vsel %vm547_vm7, 1.0, %v6651_v43  ;;  %v3715_v15 = vsel %vm616_vm0, 1.0, %v6651_v43  ;;  %v3716_v16 = vsel %vm617_vm1, 1.0, %v6651_v43 }
 0x237   :  { %v558_v60 = vadd.f32 %v3705_v51, %v534_v53  ;;  %v559_v61 = vadd.f32 %v3706_v52, %v535_v54  ;;  %v4822_v52 = vld [vmem:[#allocation5 + $0x28] sm:$0xff]   ;;  %v4823_v53 = vld [vmem:[#allocation5 + $0x30] sm:$0xff]  }
 0x238   :  { %4170 = vmatprep.subr.bf16.mxu1 %v4822_v52 }
 0x239   :  { %v564_v35 = vpop.permute.xlu1 %563  ;;  %v582_v11 = vadd.f32 %v3709_v62, %v558_v60  ;;  %v583_v12 = vadd.f32 %v3710_v1, %v559_v61  ;;  %v4828_v60 = vld [vmem:[#allocation13] sm:$0xff]   ;;  %4171 = vmatpush3.bf16.msra.mxu1 %v4822_v52 }
 0x23a   :  { %vm568_vm8 = vcmp.eq.s32.totalorder %v5834_v3, %v564_v35  ;;  %vm569_vm9 = vcmp.eq.s32.totalorder %v5837_v5, %v564_v35  ;;  %v796_v37 = vpop.permute.xlu0 %795  ;;  %4172 = vmatprep.subr.bf16.mxu1 %v4823_v53  ;;  %v5975_v52 = vld [vmem:[#allocation22 + $0x30] ss:$8 sps:$4 sm:$0xff]  }
 0x23b   :  { %v3707_v57 = vsel %vm568_vm8, 1.0, %v6651_v43  ;;  %v3708_v58 = vsel %vm569_vm9, 1.0, %v6651_v43  ;;  %vm804_vm7 = vcmp.eq.s32.totalorder %v5834_v3, %v796_v37  ;;  %v4853_v37 = vld [vmem:[#allocation16] sm:$0xff]  }
 0x23c   :  { %v580_v7 = vadd.f32 %v3707_v57, %v556_v55  ;;  %v581_v8 = vadd.f32 %v3708_v58, %v557_v56  ;;  %v3736_v49 = vsel %vm804_vm7, 1.0, %v6651_v43 }
 0x23d   :  { %4173 = vmatpush3.bf16.msra.mxu1 %v4823_v53  ;;  %v5978_v53 = vld [vmem:[#allocation22 + $0x44] ss:$8 sps:$4 sm:$0xff]  }
 0x23e   :  { %v588_v50 = vpop.permute.xlu1 %587 }
 0x23f   :  { %vm592_vm12 = vcmp.eq.s32.totalorder %v5834_v3, %v588_v50  ;;  %vm593_vm13 = vcmp.eq.s32.totalorder %v5837_v5, %v588_v50  ;;  %v799_v42 = vpop.permute.xlu0 %798 }
 0x240   :  { %v3711_v4 = vsel %vm592_vm12, 1.0, %v6651_v43  ;;  %v3712_v6 = vsel %vm593_vm13, 1.0, %v6651_v43  ;;  %vm805_vm8 = vcmp.eq.s32.totalorder %v5834_v3, %v799_v42  ;;  %vm5472_vm12 = vmmov 0  }
 0x241   :  { %v604_v13 = vadd.f32 %v3711_v4, %v580_v7  ;;  %v605_v14 = vadd.f32 %v3712_v6, %v581_v8  ;;  %v3737_v50 = vsel %vm805_vm8, 1.0, %v6651_v43  ;;  %v4824_v4 = vld [vmem:[#allocation5 + $0x38] sm:$0xff]  }
 0x242   :  { %v591_v2 = vpop.permute.xlu1 %590  ;;  %4174 = vmatprep.subr.bf16.mxu1 %v4824_v4 }
 0x243   :  { %vm594_vm14 = vcmp.eq.s32.totalorder %v5834_v3, %v591_v2  ;;  %vm595_vm15 = vcmp.eq.s32.totalorder %v5837_v5, %v591_v2  ;;  %v628_v22 = vadd.f32 %v3715_v15, %v604_v13  ;;  %v629_v24 = vadd.f32 %v3716_v16, %v605_v14  ;;  %4175 = vmatpush3.bf16.msra.mxu1 %v4824_v4  ;;  %v4825_v16 = vld [vmem:[#allocation10] sm:$0xff]  }
 0x244   :  { %v3713_v9 = vsel %vm594_vm14, 1.0, %v6651_v43  ;;  %v3714_v10 = vsel %vm595_vm15, 1.0, %v6651_v43  ;;  %v831_v51 = vpop.permute.xlu0 %830  ;;  %4200 = vmatprep.subr.bf16.mxu1 %v6651_v43 }
 0x245   :  { %v606_v18 = vadd.f32 %v3713_v9, %v582_v11  ;;  %v607_v19 = vadd.f32 %v3714_v10, %v583_v12  ;;  %vm837_vm13 = vcmp.eq.s32.totalorder %v5834_v3, %v831_v51  ;;  %v5972_v51 = vld [vmem:[#allocation22 + $0x34] ss:$8 sps:$4 sm:$0xff]  }
 0x246   :  { %v3741_v58 = vsel %vm837_vm13, 1.0, %v6651_v43  ;;  %vm2217_vm13 = vcmask 261120  }
 0x247   :  { %v615_v17 = vpop.permute.xlu1 %614  ;;  %v849_v62 = vadd.f32 %v3741_v58, %v3737_v50  ;;  %v5969_v50 = vld [vmem:[#allocation22 + $0x20] ss:$8 sps:$4 sm:$0xff]  }
 0x248   :  { %vm618_vm2 = vcmp.eq.s32.totalorder %v5834_v3, %v615_v17  ;;  %vm619_vm3 = vcmp.eq.s32.totalorder %v5837_v5, %v615_v17  ;;  %v4812_v5 = vld [vmem:[#allocation7 + $0x18] sm:$0xff]   ;;  %v4826_v17 = vld [vmem:[#allocation10 + $0x8] sm:$0xff]  }
 0x249   :  { %v3717_v20 = vsel %vm618_vm2, 1.0, %v6651_v43  ;;  %v3718_v21 = vsel %vm619_vm3, 1.0, %v6651_v43  ;;  %v860_v2 = vpop.permute.xlu0 %859  ;;  %v5993_v58 = vld [vmem:[#allocation22 + $0x60] ss:$8 sps:$4 sm:$0xff]   ;;  %vm1770_vm3 = vcmask 130048  }
 0x24a   :  { %v630_v23 = vadd.f32 %v3717_v20, %v606_v18  ;;  %v631_v25 = vadd.f32 %v3718_v21, %v607_v19  ;;  %vm868_vm15 = vcmp.eq.s32.totalorder %v5834_v3, %v860_v2  ;;  %v4827_v18 = vld [vmem:[#allocation10 + $0x10] sm:$0xff]   ;;  %v4829_v19 = vld [vmem:[#allocation10 + $0x18] sm:$0xff]   ;;  %v4831_v20 = vld [vmem:[#allocation10 + $0x20] sm:$0xff]  }
 0x24b   :  { %v3744_v8 = vsel %vm868_vm15, 1.0, %v6651_v43  ;;  %v4833_v21 = vld [vmem:[#allocation10 + $0x28] sm:$0xff]  }
 0x24c   :  { %v633_v26 = vpack.c.bf16 %v631_v25, %v629_v24  ;;  %v632_v27 = vpack.c.bf16 %v630_v23, %v628_v22  ;;  %v793_v33 = vpop.permute.xlu1 %792 }
 0x24d   :  { %vm803_vm4 = vcmp.eq.s32.totalorder %v5834_v3, %v793_v33  ;;  %v4837_v33 = vld [vmem:[#allocation10 + $0x38] sm:$0xff]  }
 0x24e   :  { %762 = vmatprep.mubr.bf16.mxu0 %v633_v26  ;;  %v3735_v45 = vsel %vm803_vm4, 1.0, %v6651_v43 }
 0x24f   :  { %763 = vmatmul.mubr.bf16.vlgmr.msra.gmra.mrb[0].mxu0 %v632_v27 }
 0x250   :  { %4181 = vmatpush3.bf16.msra.mxu0 %v4809_v28  ;;  %4196 = vmatprep.mubr.msk.bf16.mxu0 %vm5472_vm12, %v6651_v43 }
 0x251   :  { %4182 = vmatprep.subr.bf16.mxu0 %v6651_v43  ;;  %v825_v34 = vpop.permute.xlu1 %824 }
 0x252   :  { %vm835_vm5 = vcmp.eq.s32.totalorder %v5834_v3, %v825_v34  ;;  %v4838_v34 = vld [vmem:[#allocation13 + $0x28] sm:$0xff]  }
 0x253   :  { %v3739_v46 = vsel %vm835_vm5, 1.0, %v6651_v43 }
 0x254   :  { %4183 = vmatpush3.bf16.msra.mxu0 %v4810_v29  ;;  %v847_v54 = vadd.f32 %v3739_v46, %v3735_v45  ;;  %v4830_v29 = vld [vmem:[#allocation13 + $0x8] sm:$0xff]  }
 0x255   :  { %4184 = vmatprep.subr.bf16.mxu0 %v6651_v43  ;;  %v828_v35 = vpop.permute.xlu1 %827  ;;  %v5956_v46 = vld [vmem:[#allocation22] ss:$8 sps:$4 sm:$0xff]  }
 0x256   :  { %vm836_vm6 = vcmp.eq.s32.totalorder %v5834_v3, %v828_v35  ;;  %v4839_v35 = vld [vmem:[#allocation13 + $0x30] sm:$0xff]  }
 0x257   :  { %v3740_v48 = vsel %vm836_vm6, 1.0, %v6651_v43 }
 0x258   :  { %4185 = vmatpush3.bf16.msra.mxu0 %v4811_v30  ;;  %v848_v61 = vadd.f32 %v3740_v48, %v3736_v49  ;;  %v4832_v30 = vld [vmem:[#allocation13 + $0x10] sm:$0xff]  }
 0x259   :  { %4186 = vmatprep.subr.bf16.mxu0 %v6651_v43  ;;  %v5962_v48 = vld [vmem:[#allocation22 + $0x10] ss:$8 sps:$4 sm:$0xff]   ;;  %v5966_v49 = vld [vmem:[#allocation22 + $0x24] ss:$8 sps:$4 sm:$0xff]  }
 0x25a   :  { %v802_v36 = vpop.permute.xlu1 %801  ;;  %v880_v11 = vadd.f32 %v3744_v8, %v848_v61 }
 0x25b   :  { %vm806_vm9 = vcmp.eq.s32.totalorder %v5834_v3, %v802_v36  ;;  %v4840_v36 = vld [vmem:[#allocation13 + $0x38] sm:$0xff]  }
 0x25c   :  { %4187 = vmatpush3.bf16.msra.mxu0 %v4812_v5  ;;  %v3738_v55 = vsel %vm806_vm9, 1.0, %v6651_v43  ;;  %v4834_v5 = vld [vmem:[#allocation13 + $0x18] sm:$0xff]  }
 0x25d   :  { %4188 = vmatprep.subr.bf16.mxu0 %v6651_v43 }
 0x25f   :  { %v834_v40 = vpop.permute.xlu1 %833 }
 0x260   :  { %4189 = vmatpush3.bf16.msra.mxu0 %v4814_v31  ;;  %vm838_vm10 = vcmp.eq.s32.totalorder %v5834_v3, %v834_v40  ;;  %v4835_v31 = vld [vmem:[#allocation10 + $0x30] sm:$0xff]  }
 0x261   :  { %4190 = vmatprep.subr.bf16.mxu0 %v6651_v43  ;;  %v3742_v56 = vsel %vm838_vm10, 1.0, %v6651_v43  ;;  %v5954_v40 = vld [vmem:[#allocation22 + $0x4] ss:$8 sps:$4 sm:$0xff]  }
 0x262   :  { %v850_v6 = vadd.f32 %v3742_v56, %v3738_v55  ;;  %v5984_v55 = vld [vmem:[#allocation22 + $0x54] ss:$8 sps:$4 sm:$0xff]   ;;  %v5987_v56 = vld [vmem:[#allocation22 + $0x50] ss:$8 sps:$4 sm:$0xff]  }
 0x264   :  { %4191 = vmatpush3.bf16.msra.mxu0 %v4816_v32  ;;  %v857_v47 = vpop.permute.xlu1 %856  ;;  %v4836_v32 = vld [vmem:[#allocation13 + $0x20] sm:$0xff]  }
 0x265   :  { %4192 = vmatprep.subr.bf16.mxu0 %v6651_v43  ;;  %vm867_vm11 = vcmp.eq.s32.totalorder %v5834_v3, %v857_v47  ;;  %v5959_v47 = vld [vmem:[#allocation22 + $0x14] ss:$8 sps:$4 sm:$0xff]  }
 0x266   :  { %v3743_v57 = vsel %vm867_vm11, 1.0, %v6651_v43 }
 0x267   :  { %v879_v7 = vadd.f32 %v3743_v57, %v847_v54  ;;  %v5981_v54 = vld [vmem:[#allocation22 + $0x40] ss:$8 sps:$4 sm:$0xff]   ;;  %v5990_v57 = vld [vmem:[#allocation22 + $0x64] ss:$8 sps:$4 sm:$0xff]  }
 0x268   :  { %4193 = vmatpush3.bf16.msra.mxu0 %v4818_v38  ;;  %v863_v59 = vpop.permute.xlu1 %862 }
 0x269   :  { %4194 = vmatprep.subr.bf16.mxu0 %v6651_v43  ;;  %vm869_vm14 = vcmp.eq.s32.totalorder %v5834_v3, %v863_v59  ;;  %v883_v14 = vpack.c.bf16 %v880_v11, %v879_v7  ;;  %v3755_v59 = vld [vmem:[#allocation8] ss:$0 sm:$0xff] }
 0x26a   :  { %v3745_v1 = vsel %vm869_vm14, 1.0, %v6651_v43  ;;  %v4865_v11 = vld [vmem:[#allocation16 + $0x18] sm:$0xff]  }
 0x26b   :  { %v881_v10 = vadd.f32 %v3745_v1, %v849_v62  ;;  %4176 = vmatprep.mubr.bf16.mxu1 %v883_v14  ;;  %v4869_v14 = vld [vmem:[#allocation16 + $0x20] sm:$0xff]  }
 0x26c   :  { %4195 = vmatpush3.bf16.msra.mxu0 %v4820_v41  ;;  %v866_v9 = vpop.permute.xlu1 %865 }
 0x26d   :  { %4220 = vmatprep.subr.bf16.mxu0 %v4828_v60  ;;  %vm870_vm0 = vcmp.eq.s32.totalorder %v5834_v3, %v866_v9  ;;  %v4857_v9 = vld [vmem:[#allocation16 + $0x8] sm:$0xff]  }
 0x26e   :  { %v3746_v12 = vsel %vm870_vm0, 1.0, %v6651_v43 }
 0x26f   :  { %v882_v13 = vadd.f32 %v3746_v12, %v850_v6  ;;  %v5997_v12 = vld [vmem:[#allocation22 + $0x74] ss:$8 sps:$4 sm:$0xff]  }
 0x271   :  { %v884_v15 = vpack.c.bf16 %v882_v13, %v881_v10  ;;  %v4861_v10 = vld [vmem:[#allocation16 + $0x10] sm:$0xff]  }
 0x272   :  { %v5999_v13 = vld [vmem:[#allocation22 + $0x70] ss:$8 sps:$4 sm:$0xff]  }
 0x273   :  { %4177 = vmatmul.mubr.bf16.vlgmr.msra.gmra.mrb[0].mxu1 %v884_v15  ;;  %v4870_v15 = vld [vmem:[#allocation16 + $0x28] sm:$0xff]  }
 0x274   :  { %4201 = vmatpush3.bf16.msra.mxu1 %v4825_v16  ;;  %4216 = vmatprep.mubr.msk.bf16.mxu1 %vm5472_vm12, %v6651_v43  ;;  %v1459_v16 = vld [vmem:[%s6696_s10 + $0x8] sm:$0xff] }
 0x275   :  { %4202 = vmatprep.subr.bf16.mxu1 %v6651_v43  ;;  %1466 = vperm.xlu1 %4792, %v1459_v16   ;;  %v6032_v16 = vld [vmem:[#allocation23 + $0x8] sm:$0xff]  }
 0x278   :  { %4203 = vmatpush3.bf16.msra.mxu1 %v4826_v17  ;;  %v1458_v17 = vld [vmem:[%s6696_s10] sm:$0xff] }
 0x279   :  { %4204 = vmatprep.subr.bf16.mxu1 %v6651_v43  ;;  %1463 = vperm.xlu0 %4791, %v1458_v17   ;;  %v6037_v17 = vld [vmem:[#allocation23 + $0x10] sm:$0xff]  }
 0x27c   :  { %4205 = vmatpush3.bf16.msra.mxu1 %v4827_v18  ;;  %v4871_v18 = vld [vmem:[#allocation16 + $0x30] sm:$0xff]  }
 0x27d   :  { %4206 = vmatprep.subr.bf16.mxu1 %v6651_v43 }
 0x280   :  { %4207 = vmatpush3.bf16.msra.mxu1 %v4829_v19  ;;  %v3773_v19 = vld [vmem:[#allocation14] ss:$0 sm:$0xff] }
 0x281   :  { %4208 = vmatprep.subr.bf16.mxu1 %v6651_v43 }
 0x284   :  { %4209 = vmatpush3.bf16.msra.mxu1 %v4831_v20  ;;  %v1460_v20 = vld [vmem:[%s6696_s10 + $0x10] sm:$0xff] }
 0x285   :  { %4210 = vmatprep.subr.bf16.mxu1 %v6651_v43  ;;  %1469 = vperm.xlu1 %4792, %v1460_v20   ;;  %v6049_v20 = vld [vmem:[#allocation23 + $0x28] sm:$0xff]  }
 0x288   :  { %4211 = vmatpush3.bf16.msra.mxu1 %v4833_v21  ;;  %v1461_v21 = vld [vmem:[%s6696_s10 + $0x18] sm:$0xff] }
 0x289   :  { %4212 = vmatprep.subr.bf16.mxu1 %v6651_v43  ;;  %1472 = vperm.xlu0 %4791, %v1461_v21  }
 0x28c   :  { %4213 = vmatpush3.bf16.msra.mxu1 %v4835_v31  ;;  %v1489_v31 = vld [vmem:[%s6697_s6 + $0x8] sm:$0xff] }
 0x28d   :  { %4214 = vmatprep.subr.bf16.mxu1 %v6651_v43  ;;  %1496 = vperm.xlu0 %4791, %v1489_v31  }
 0x290   :  { %4215 = vmatpush3.bf16.msra.mxu1 %v4837_v33 }
 0x291   :  { %4240 = vmatprep.subr.bf16.mxu1 %v4853_v37 }
 0x322   :  { %v3915_v22 = vpop.f32.mrb[0].mxu0 }
 0x323   :  { %v3916_v23 = vpop.f32.mrb[1].mxu0 }
 0x324   :  { %v3917_v24 = vadd.f32 %v3916_v23, %v3915_v22  ;;  %v3918_v25 = vpop.f32.mrb[2].mxu0 }
 0x325   :  { %v3919_v26 = vpop.f32.mrb[3].mxu0 }
 0x326   :  { %v3920_v27 = vadd.f32 %v3919_v26, %v3918_v25  ;;  %v4872_v25 = vld [vmem:[#allocation16 + $0x38] sm:$0xff]  }
 0x328   :  { %v1016_v28 = vpack.c.bf16 %v3920_v27, %v3917_v24 }
 0x32a   :  { %4197 = vmatmul.mubr.bf16.vlgmr.msra.gmra.mrb[4].mxu0 %v1016_v28  ;;  %v1488_v28 = vld [vmem:[%s6697_s6] sm:$0xff] }
 0x32b   :  { %4221 = vmatpush3.bf16.msra.mxu0 %v4828_v60  ;;  %1493 = vperm.xlu1 %4792, %v1488_v28  }
 0x32c   :  { %4222 = vmatprep.subr.bf16.mxu0 %v4830_v29 }
 0x32f   :  { %4223 = vmatpush3.bf16.msra.mxu0 %v4830_v29 }
 0x330   :  { %4224 = vmatprep.subr.bf16.mxu0 %v4832_v30 }
 0x333   :  { %4225 = vmatpush3.bf16.msra.mxu0 %v4832_v30 }
 0x334   :  { %4226 = vmatprep.subr.bf16.mxu0 %v4834_v5 }
 0x337   :  { %4227 = vmatpush3.bf16.msra.mxu0 %v4834_v5 }
 0x338   :  { %4228 = vmatprep.subr.bf16.mxu0 %v4836_v32 }
 0x33b   :  { %4229 = vmatpush3.bf16.msra.mxu0 %v4836_v32 }
 0x33c   :  { %4230 = vmatprep.subr.bf16.mxu0 %v4838_v34 }
 0x33f   :  { %4231 = vmatpush3.bf16.msra.mxu0 %v4838_v34 }
 0x340   :  { %4232 = vmatprep.subr.bf16.mxu0 %v4839_v35 }
 0x343   :  { %4233 = vmatpush3.bf16.msra.mxu0 %v4839_v35 }
 0x344   :  { %4234 = vmatprep.subr.bf16.mxu0 %v4840_v36 }
 0x346   :  { %v4178_v38 = vpop.f32.mrb[0].mxu1 }
 0x347   :  { %v967_v39 = vpop.f32.mrb[1].mxu1  ;;  %4235 = vmatpush3.bf16.msra.mxu0 %v4840_v36  ;;  %v1490_v36 = vld [vmem:[%s6697_s6 + $0x10] sm:$0xff] }
 0x348   :  { %v4179_v41 = vpop.f32.mrb[2].mxu1  ;;  %1726 = vmatprep.subr.bf16.mxu0 %v5954_v40  ;;  %1499 = vperm.xlu1 %4792, %v1490_v36  }
 0x349   :  { %v1245_v42 = vpack.c.bf16 %v4179_v41, %v4178_v38  ;;  %v970_v44 = vpop.f32.mrb[3].mxu1  ;;  %v1491_v38 = vld [vmem:[%s6697_s6 + $0x18] sm:$0xff]  ;;  %v3394_v41 = vld [vmem:[%s6698_s18] sm:$0xff] }
 0x34a   :  { %v1244_v45 = vpack.c.bf16 %v970_v44, %v967_v39  ;;  %1502 = vperm.xlu0 %4791, %v1491_v38   ;;  %v3782_v38 = vld [vmem:[#allocation17] ss:$0 sm:$0xff] }
 0x34c   :  { %4236 = vmatprep.mubr.bf16.mxu0 %v1244_v45  ;;  %3397 = vperm.xlu1 %4792, %v3394_v41  }
 0x34d   :  { %4237 = vmatmul.mubr.bf16.vlgmr.msra.gmra.mrb[8].mxu0 %v1245_v42  ;;  %v3764_v42 = vld [vmem:[#allocation11] ss:$0 sm:$0xff] }
 0x34e   :  { %1727 = vmatpush1.bf16.msra.mxu0 %v5956_v46  ;;  %1758 = vmatprep.mubr.bf16.mxu0 %v6644_v0 }
 0x34f   :  { %1728 = vmatprep.subr.bf16.mxu0 %v5959_v47 }
 0x352   :  { %1729 = vmatpush1.bf16.msra.mxu0 %v5962_v48 }
 0x353   :  { %1730 = vmatprep.subr.bf16.mxu0 %v5966_v49 }
 0x356   :  { %1731 = vmatpush1.bf16.msra.mxu0 %v5969_v50 }
 0x357   :  { %1732 = vmatprep.subr.bf16.mxu0 %v5972_v51 }
 0x35a   :  { %1733 = vmatpush1.bf16.msra.mxu0 %v5975_v52 }
 0x35b   :  { %1734 = vmatprep.subr.bf16.mxu0 %v5978_v53 }
 0x35e   :  { %1735 = vmatpush1.bf16.msra.mxu0 %v5981_v54 }
 0x35f   :  { %1736 = vmatprep.subr.bf16.mxu0 %v5984_v55 }
 0x362   :  { %1737 = vmatpush1.bf16.msra.mxu0 %v5987_v56 }
 0x363   :  { %1738 = vmatprep.subr.bf16.mxu0 %v5990_v57 }
 0x366   :  { %1739 = vmatpush1.bf16.msra.mxu0 %v5993_v58 }
 0x367   :  { %1740 = vmatprep.subr.bf16.mxu0 %v5997_v12 }
 0x36a   :  { %1741 = vmatpush1.bf16.msra.mxu0 %v5999_v13 }
 0x3fd   :  { %v1105_v60 = vpop.f32.mrb[4].mxu0 }
 0x3fe   :  { %v1106_v61 = vadd.f32 %v3755_v59, %v1105_v60  ;;  %v4198_v62 = vpop.f32.mrb[5].mxu0 }
 0x3ff   :  { %v1108_v1 = vpop.f32.mrb[6].mxu0 }
 0x400   :  { %v1109_v2 = vadd.f32 %v3755_v59, %v1108_v1  ;;  %v4199_v4 = vpop.f32.mrb[7].mxu0  ;;  %v1112_v6 = vmax.f32 %v1106_v61, 0.0 }
 0x401   :  { %v1464_v4 = vpop.permute.xlu0 %1463 }
 0x402   :  { %v1113_v7 = vmax.f32 %v1109_v2, 0.0  ;;  %v1467_v2 = vpop.permute.xlu1 %1466  ;;  %vm1474_vm2 = vcmp.eq.s32.totalorder %v5834_v3, %v1464_v4  ;;  %v6099_v4 = vld [vmem:[#allocation19 + $0x20] sm:$0xff]  }
 0x403   :  { %vm1475_vm1 = vcmp.eq.s32.totalorder %v5834_v3, %v1467_v2  ;;  %v6095_v2 = vld [vmem:[#allocation19 + $0x18] sm:$0xff]  }
 0x404   :  { %v1114_v8 = vpack.c.bf16 %v1113_v7, %v1112_v6  ;;  %v3792_v6 = vsel %vm1475_vm1, 1.0, %v6651_v43  ;;  %v3791_v7 = vsel %vm1474_vm2, 1.0, %v6651_v43 }
 0x406   :  { %4217 = vmatmul.mubr.bf16.vlgmr.msra.gmra.mrb[4].mxu1 %v1114_v8  ;;  %v6022_v8 = vpack.c.bf16 %v3792_v6, %v3791_v7  ;;  %v1470_v21 = vpop.permute.xlu1 %1469  ;;  %v6103_v6 = vld [vmem:[#allocation19 + $0x28] sm:$0xff]   ;;  %v6107_v7 = vld [vmem:[#allocation19 + $0x30] sm:$0xff]  }
 0x407   :  { %4241 = vmatpush3.bf16.msra.mxu1 %v4853_v37  ;;  %vm1476_vm4 = vcmp.eq.s32.totalorder %v5834_v3, %v1470_v21 }
 0x408   :  { %4242 = vmatprep.subr.bf16.mxu1 %v4857_v9 }
 0x40b   :  { %4243 = vmatpush3.bf16.msra.mxu1 %v4857_v9 }
 0x40c   :  { %4244 = vmatprep.subr.bf16.mxu1 %v4861_v10 }
 0x40f   :  { %4245 = vmatpush3.bf16.msra.mxu1 %v4861_v10 }
 0x410   :  { %4246 = vmatprep.subr.bf16.mxu1 %v4865_v11 }
 0x413   :  { %4247 = vmatpush3.bf16.msra.mxu1 %v4865_v11 }
 0x414   :  { %4248 = vmatprep.subr.bf16.mxu1 %v4869_v14 }
 0x417   :  { %4249 = vmatpush3.bf16.msra.mxu1 %v4869_v14 }
 0x418   :  { %4250 = vmatprep.subr.bf16.mxu1 %v4870_v15 }
 0x41b   :  { %4251 = vmatpush3.bf16.msra.mxu1 %v4870_v15  ;;  %v6030_v15 = vld [vmem:[#allocation23] sm:$0xff]  }
 0x41c   :  { %4252 = vmatprep.subr.bf16.mxu1 %v4871_v18  ;;  %4292 = vmatprep.subr.bf16.mxu0 %v6030_v15 }
 0x41f   :  { %4253 = vmatpush3.bf16.msra.mxu1 %v4871_v18  ;;  %v6041_v18 = vld [vmem:[#allocation23 + $0x18] sm:$0xff]  }
 0x420   :  { %v4238_v22 = vpop.f32.mrb[8].mxu0  ;;  %4254 = vmatprep.subr.bf16.mxu1 %v4872_v25 }
 0x421   :  { %v1343_v23 = vadd.f32 %v4238_v22, %v3773_v19  ;;  %v1334_v24 = vpop.f32.mrb[9].mxu0  ;;  %v1473_v22 = vpop.permute.xlu0 %1472 }
 0x422   :  { %v1335_v26 = vadd.f32 %v3773_v19, %v1334_v24  ;;  %v4239_v27 = vpop.f32.mrb[10].mxu0  ;;  %vm1477_vm5 = vcmp.eq.s32.totalorder %v5834_v3, %v1473_v22 }
 0x423   :  { %v1351_v29 = vmax.f32 %v1343_v23, 0.0  ;;  %v1346_v30 = vadd.f32 %v4239_v27, %v3773_v19  ;;  %v1337_v5 = vpop.f32.mrb[11].mxu0  ;;  %4255 = vmatpush3.bf16.msra.mxu1 %v4872_v25  ;;  %v1494_v23 = vpop.permute.xlu1 %1493 }
 0x424   :  { %v1349_v32 = vmax.f32 %v1335_v26, 0.0  ;;  %v1338_v33 = vadd.f32 %v3773_v19, %v1337_v5  ;;  %v6045_v19 = vld [vmem:[#allocation23 + $0x20] sm:$0xff]   ;;  %vm1504_vm6 = vcmp.eq.s32.totalorder %v5834_v3, %v1494_v23  ;;  %v3794_v5 = vsel %vm1477_vm5, 1.0, %v6651_v43  ;;  %v6124_v23 = vld [vmem:[#allocation23 + $0x30] sm:$0xff]  }
 0x425   :  { %v1352_v34 = vmax.f32 %v1346_v30, 0.0  ;;  %v1497_v25 = vpop.permute.xlu0 %1496  ;;  %v3793_v30 = vsel %vm1476_vm4, 1.0, %v6651_v43 }
 0x426   :  { %v1350_v35 = vmax.f32 %v1338_v33, 0.0  ;;  %vm1505_vm7 = vcmp.eq.s32.totalorder %v5834_v3, %v1497_v25  ;;  %v6143_v25 = vld [vmem:[%s6699_s3 + $0x10] sm:$0xff]  }
 0x427   :  { %v1354_v37 = vpack.c.bf16 %v1352_v34, %v1351_v29  ;;  %v3796_v33 = vsel %vm1505_vm7, 1.0, %v6651_v43  ;;  %v6062_v34 = vpack.c.bf16 %v3794_v5, %v3793_v30 }
 0x428   :  { %v1353_v39 = vpack.c.bf16 %v1350_v35, %v1349_v32  ;;  %v3795_v32 = vsel %vm1504_vm6, 1.0, %v6651_v43  ;;  %v6064_v35 = vld [vmem:[#allocation19] sm:$0xff]  }
 0x429   :  { %v6066_v36 = vpack.c.bf16 %v3796_v33, %v3795_v32 }
 0x42a   :  { %4256 = vmatprep.mubr.bf16.mxu1 %v1353_v39  ;;  %v1500_v39 = vpop.permute.xlu1 %1499 }
 0x42b   :  { %4257 = vmatmul.mubr.bf16.vlgmr.msra.gmra.mrb[8].mxu1 %v1354_v37  ;;  %v1503_v37 = vpop.permute.xlu0 %1502  ;;  %vm1506_vm8 = vcmp.eq.s32.totalorder %v5834_v3, %v1500_v39 }
 0x42c   :  { %4262 = vmatprep.mubr.msk.bf16.mxu1 %vm1770_vm3, %v6022_v8  ;;  %vm1507_vm9 = vcmp.eq.s32.totalorder %v5834_v3, %v1503_v37  ;;  %v6091_v3 = vld [vmem:[#allocation19 + $0x10] sm:$0xff]  }
 0x4d9   :  { %v1203_v44 = vpop.f32.mrb[4].mxu1 }
 0x4da   :  { %v4218_v45 = vpop.f32.mrb[5].mxu1  ;;  %v6012_v60 = vadd.f32 %v3764_v42, %v1203_v44  ;;  %v3797_v44 = vsel %vm1506_vm8, 1.0, %v6651_v43 }
 0x4db   :  { %v1206_v59 = vpop.f32.mrb[6].mxu1  ;;  %v3798_v45 = vsel %vm1507_vm9, 1.0, %v6651_v43 }
 0x4dc   :  { %v6014_v61 = vadd.f32 %v3764_v42, %v1206_v59  ;;  %v4219_v62 = vpop.f32.mrb[7].mxu1 }
 0x4dd   :  { %v6083_v62 = vpack.c.bf16 %v3798_v45, %v3797_v44 }
 0x4de   :  { %v1643_v1 = vpack.c.bf16 %v6014_v61, %v6012_v60 }
 0x4e0   :  { %1759 = vmatmul.mubr.bf16.vlgmr.msra.gmra.mrb[12].mxu0 %v1643_v1  ;;  %v6085_v1 = vld [vmem:[#allocation19 + $0x8] sm:$0xff]  }
 0x4e1   :  { %4293 = vmatpush3.bf16.msra.mxu0 %v6030_v15 }
 0x4e2   :  { %4294 = vmatprep.subr.bf16.mxu0 %v6032_v16 }
 0x4e5   :  { %4295 = vmatpush3.bf16.msra.mxu0 %v6032_v16 }
 0x4e6   :  { %4296 = vmatprep.subr.bf16.mxu0 %v6037_v17 }
 0x4e9   :  { %4297 = vmatpush3.bf16.msra.mxu0 %v6037_v17 }
 0x4ea   :  { %4298 = vmatprep.subr.bf16.mxu0 %v6041_v18 }
 0x4ed   :  { %4299 = vmatpush3.bf16.msra.mxu0 %v6041_v18 }
 0x4ee   :  { %4300 = vmatprep.subr.bf16.mxu0 %v6045_v19 }
 0x4f1   :  { %4301 = vmatpush3.bf16.msra.mxu0 %v6045_v19 }
 0x4f2   :  { %4302 = vmatprep.subr.bf16.mxu0 %v6049_v20 }
 0x4f5   :  { %4303 = vmatpush3.bf16.msra.mxu0 %v6049_v20 }
 0x4f6   :  { %4304 = vmatprep.subr.bf16.mxu0 %v6124_v23 }
 0x4f9   :  { %4305 = vmatpush3.bf16.msra.mxu0 %v6124_v23 }
 0x4fe   :  { %v6026_v9 = vpop.f32.mrb[8].mxu1 }
 0x4ff   :  { %v1443_v10 = vpop.f32.mrb[9].mxu1 }
 0x500   :  { %v6028_v11 = vpop.f32.mrb[10].mxu1  ;;  %v6075_v41 = vadd.f32 %v3782_v38, %v1443_v10  ;;  %v6111_v10 = vld [vmem:[#allocation19 + $0x38] sm:$0xff]  }
 0x501   :  { %v1446_v14 = vpop.f32.mrb[11].mxu1  ;;  %v6118_v21 = vadd.f32 %v6028_v11, %v3782_v38  ;;  %v6134_v11 = vld [vmem:[%s6699_s3] sm:$0xff]  }
 0x502   :  { %v6077_v42 = vadd.f32 %v3782_v38, %v1446_v14  ;;  %v6115_v14 = vadd.f32 %v6026_v9, %v3782_v38  ;;  %v6128_v9 = vld [vmem:[#allocation23 + $0x38] sm:$0xff]  }
 0x503   :  { %4306 = vmatprep.subr.bf16.mxu0 %v6128_v9 }
 0x504   :  { %v1644_v59 = vpack.c.bf16 %v6077_v42, %v6075_v41  ;;  %v1645_v22 = vpack.c.bf16 %v6118_v21, %v6115_v14  ;;  %4307 = vmatpush3.bf16.msra.mxu0 %v6128_v9 }
 0x505   :  { %4340 = vmatprep.subr.bf16.mxu0 %v6651_v43 }
 0x5b3   :  { %v1760_v24 = vpop.f32.mrb[12].mxu0 }
 0x5b4   :  { %v1762_v26 = vpop.f32.mrb[13].mxu0 }
 0x5b5   :  { %v1764_v27 = vpop.f32.mrb[14].mxu0 }
 0x5b6   :  { %v1769_v28 = vpack.c.bf16 %v1764_v27, %v1760_v24  ;;  %v1766_v29 = vpop.f32.mrb[15].mxu0  ;;  %v6137_v24 = vld [vmem:[%s6699_s3 + $0x8] sm:$0xff]   ;;  %v6153_v27 = vld [vmem:[%s6699_s3 + $0x20] sm:$0xff]  }
 0x5b7   :  { %v1826_v31 = vpack.c.bf16 %v1766_v29, %v1762_v26  ;;  %v6148_v26 = vld [vmem:[%s6699_s3 + $0x18] sm:$0xff]  }
 0x5b8   :  { %4260 = vmatprep.subr.bf16.mxu1 %v1769_v28  ;;  %v6163_v29 = vld [vmem:[#allocation20] ss:$0 sm:$0xff] }
 0x5b9   :  { %4261 = vmatpush3.bf16.msra.mxu1 %v1769_v28  ;;  %v6158_v28 = vld [vmem:[%s6699_s3 + $0x28] sm:$0xff]   ;;  %6700 = vst [vmem:[#allocation59_spill] sm:$0xff] %v6163_v29 }
 0x5ba   :  { %4266 = vmatprep.subr.bf16.mxu1 %v1826_v31 }
 0x5bc   :  { %4263 = vmatmul.mubr.msk.bf16.vlgmr.msra.gmra.mrb[12].mxu1 %vm1770_vm3, %v6062_v34 }
 0x5bd   :  { %4267 = vmatpush3.bf16.msra.mxu1 %v1826_v31  ;;  %4268 = vmatprep.mubr.msk.bf16.mxu1 %vm1770_vm3, %v6066_v36 }
 0x5be   :  { %4272 = vmatprep.subr.bf16.mxu1 %v6064_v35 }
 0x5c8   :  { %4269 = vmatmul.mubr.msk.bf16.vlgmr.msra.gmra.mrb[12].mxu1 %vm1770_vm3, %v6083_v62 }
 0x5c9   :  { %4273 = vmatpush3.bf16.msra.mxu1 %v6064_v35  ;;  %4288 = vmatprep.mubr.bf16.mxu1 %v1644_v59 }
 0x5ca   :  { %4274 = vmatprep.subr.bf16.mxu1 %v6085_v1 }
 0x5cd   :  { %4275 = vmatpush3.bf16.msra.mxu1 %v6085_v1 }
 0x5ce   :  { %4276 = vmatprep.subr.bf16.mxu1 %v6091_v3 }
 0x5d1   :  { %4277 = vmatpush3.bf16.msra.mxu1 %v6091_v3 }
 0x5d2   :  { %4278 = vmatprep.subr.bf16.mxu1 %v6095_v2 }
 0x5d5   :  { %4279 = vmatpush3.bf16.msra.mxu1 %v6095_v2 }
 0x5d6   :  { %4280 = vmatprep.subr.bf16.mxu1 %v6099_v4 }
 0x5d9   :  { %4281 = vmatpush3.bf16.msra.mxu1 %v6099_v4 }
 0x5da   :  { %4282 = vmatprep.subr.bf16.mxu1 %v6103_v6 }
 0x5dd   :  { %4283 = vmatpush3.bf16.msra.mxu1 %v6103_v6 }
 0x5de   :  { %4284 = vmatprep.subr.bf16.mxu1 %v6107_v7 }
 0x5e1   :  { %4285 = vmatpush3.bf16.msra.mxu1 %v6107_v7 }
 0x5e2   :  { %4286 = vmatprep.subr.bf16.mxu1 %v6111_v10 }
 0x5e5   :  { %4287 = vmatpush3.bf16.msra.mxu1 %v6111_v10 }
 0x5e6   :  { %4312 = vmatprep.subr.bf16.mxu1 %v6134_v11 }
 0x5e8   :  { %4289 = vmatmul.mubr.bf16.vlgmr.msra.gmra.mrb[12].mxu1 %v1645_v22 }
 0x5e9   :  { %4313 = vmatpush3.bf16.msra.mxu1 %v6134_v11 }
 0x5ea   :  { %4314 = vmatprep.subr.bf16.mxu1 %v6137_v24 }
 0x5ed   :  { %4315 = vmatpush3.bf16.msra.mxu1 %v6137_v24 }
 0x5ee   :  { %4316 = vmatprep.subr.bf16.mxu1 %v6143_v25 }
 0x5f1   :  { %4317 = vmatpush3.bf16.msra.mxu1 %v6143_v25 }
 0x5f2   :  { %4318 = vmatprep.subr.bf16.mxu1 %v6148_v26 }
 0x5f5   :  { %4319 = vmatpush3.bf16.msra.mxu1 %v6148_v26 }
 0x5f6   :  { %4320 = vmatprep.subr.bf16.mxu1 %v6153_v27 }
 0x5f9   :  { %4321 = vmatpush3.bf16.msra.mxu1 %v6153_v27 }
 0x5fa   :  { %4322 = vmatprep.subr.bf16.mxu1 %v6158_v28 }
 0x5fd   :  { %4323 = vmatpush3.bf16.msra.mxu1 %v6158_v28 }
 0x6bb   :  { %v4290_v30 = vpop.f32.mrb[12].mxu1 }
 0x6bc   :  { %v1979_v5 = vadd.f32 %v4290_v30, %v6163_v29  ;;  %v1970_v31 = vpop.f32.mrb[13].mxu1  ;;  %v6172_v30 = vld [vmem:[%s6699_s3 + $0x30] sm:$0xff]  }
 0x6bd   :  { %v1971_v32 = vadd.f32 %v6163_v29, %v1970_v31  ;;  %v4291_v33 = vpop.f32.mrb[14].mxu1  ;;  %6701 = vst [vmem:[#allocation60_spill] sm:$0xff] %v6172_v30  ;;  %4324 = vmatprep.subr.bf16.mxu1 %v6172_v30  ;;  %v6177_v31 = vld [vmem:[%s6699_s3 + $0x38] sm:$0xff]  }
 0x6be   :  { %v1982_v37 = vadd.f32 %v4291_v33, %v6163_v29  ;;  %v1973_v38 = vpop.f32.mrb[15].mxu1  ;;  %v1995_v44 = vmax.f32 %v1979_v5, 0.0  ;;  %4325 = vmatpush3.bf16.msra.mxu1 %v6172_v30  ;;  %6702 = vst [vmem:[#allocation61_spill] sm:$0xff] %v6177_v31  ;;  %v6182_v5 = vld [vmem:[#allocation25] ss:$0 sm:$0xff]  ;;  %v6703_v30 = vmov 0.0  }
 0x6bf   :  { %v1974_v39 = vadd.f32 %v6163_v29, %v1973_v38  ;;  %v1993_v59 = vmax.f32 %v1971_v32, 0.0  ;;  %4326 = vmatprep.subr.bf16.mxu1 %v6177_v31 }
 0x6c0   :  { %v1996_v45 = vmax.f32 %v1982_v37, 0.0 }
 0x6c1   :  { %v1994_v22 = vmax.f32 %v1974_v39, 0.0 }
 0x6c2   :  { %v1998_v0 = vpack.c.bf16 %v1996_v45, %v1995_v44  ;;  %4327 = vmatpush3.bf16.msra.mxu1 %v6177_v31 }
 0x6c3   :  { %v1997_v63 = vpack.c.bf16 %v1994_v22, %v1993_v59  ;;  %4332 = vmatprep.subr.bf16.mxu1 %v6651_v43 }
 0x6c5   :  { %4308 = vmatprep.mubr.bf16.mxu0 %v1997_v63 }
 0x6c6   :  { %4309 = vmatmul.mubr.bf16.vlgmr.msra.gmra.mrb[16].mxu0 %v1998_v0 }
 0x6c7   :  { %4356 = vmatprep.mubr.msk.bf16.mxu0 %vm5472_vm12, %v6651_v43 }
 0x799   :  { %v4310_v0 = vpop.f32.mrb[16].mxu0 }
 0x79a   :  { %v2096_v63 = vadd.f32 %v4310_v0, %v6182_v5  ;;  %v2087_v32 = vpop.f32.mrb[17].mxu0  ;;  %v6190_v0 = vld [vmem:[#allocation26] sm:$0xff]  }
 0x79b   :  { %v2088_v33 = vadd.f32 %v6182_v5, %v2087_v32  ;;  %v4311_v37 = vpop.f32.mrb[18].mxu0  ;;  %6704 = vst [vmem:[#allocation62_spill] sm:$0xff] %v6190_v0  ;;  %4341 = vmatpush3.bf16.msra.mxu0 %v6190_v0  ;;  %v6193_v32 = vld [vmem:[#allocation26 + $0x8] sm:$0xff]  }
 0x79c   :  { %v2099_v38 = vadd.f32 %v4311_v37, %v6182_v5  ;;  %v2090_v39 = vpop.f32.mrb[19].mxu0  ;;  %v2104_v45 = vmax.f32 %v2096_v63, 0.0  ;;  %6705 = vst [vmem:[#allocation63_spill] sm:$0xff] %v6193_v32  ;;  %4342 = vmatprep.subr.bf16.mxu0 %v6703_v30  ;;  %v6197_v63 = vld [vmem:[#allocation26 + $0x10] sm:$0xff]   ;;  %v6219_v37 = vld [vmem:[%s6707_s23] ss:$0 sm:$0xff] }
 0x79d   :  { %v2091_v44 = vadd.f32 %v6182_v5, %v2090_v39  ;;  %v2102_v22 = vmax.f32 %v2088_v33, 0.0  ;;  %6706 = vst [vmem:[#allocation64_spill] sm:$0xff] %v6197_v63  ;;  %v6213_v33 = vld [vmem:[#allocation26 + $0x30] sm:$0xff]  }
 0x79e   :  { %v2105_v59 = vmax.f32 %v2099_v38, 0.0  ;;  %6712 = vst [vmem:[#allocation68_spill] sm:$0xff] %v6213_v33  ;;  %v6713_v38 = vlaneseq }
 0x79f   :  { %v2103_v29 = vmax.f32 %v2091_v44, 0.0  ;;  %4343 = vmatpush3.bf16.msra.mxu0 %v6193_v32 }
 0x7a0   :  { %v2107_v31 = vpack.c.bf16 %v2105_v59, %v2104_v45  ;;  %4344 = vmatprep.subr.bf16.mxu0 %v6703_v30  ;;  %v6222_v39 = vshrl.u32 %v6713_v38, 7 }
 0x7a1   :  { %v2106_v43 = vpack.c.bf16 %v2103_v29, %v2102_v22  ;;  %v6205_v29 = vld [vmem:[#allocation26 + $0x20] sm:$0xff]  }
 0x7a2   :  { %6709 = vst [vmem:[#allocation66_spill] sm:$0xff] %v6205_v29  ;;  %6714 = vst [vmem:[#allocation69_spill] sm:$0xff] %v6222_v39 }
 0x7a3   :  { %4328 = vmatprep.mubr.bf16.mxu1 %v2106_v43  ;;  %4345 = vmatpush3.bf16.msra.mxu0 %v6197_v63  ;;  %v6201_v43 = vld [vmem:[#allocation26 + $0x18] sm:$0xff]  }
 0x7a4   :  { %4329 = vmatmul.mubr.bf16.vlgmr.msra.gmra.mrb[16].mxu1 %v2107_v31  ;;  %6708 = vst [vmem:[#allocation65_spill] sm:$0xff] %v6201_v43  ;;  %4346 = vmatprep.subr.bf16.mxu0 %v6703_v30  ;;  %v6209_v31 = vld [vmem:[#allocation26 + $0x28] sm:$0xff]  }
 0x7a5   :  { %4336 = vmatprep.mubr.msk.bf16.mxu1 %vm5472_vm12, %v6703_v30  ;;  %6710 = vst [vmem:[#allocation67_spill] sm:$0xff] %v6209_v31 }
 0x7a7   :  { %4347 = vmatpush3.bf16.msra.mxu0 %v6201_v43 }
 0x7a8   :  { %4348 = vmatprep.subr.bf16.mxu0 %v6703_v30 }
 0x7ab   :  { %4349 = vmatpush3.bf16.msra.mxu0 %v6205_v29 }
 0x7ac   :  { %4350 = vmatprep.subr.bf16.mxu0 %v6703_v30 }
 0x7af   :  { %4351 = vmatpush3.bf16.msra.mxu0 %v6209_v31  ;;  %v1520_v31 = vadd.s32 8, %v6222_v39 }
 0x7b0   :  { %4352 = vmatprep.subr.bf16.mxu0 %v6703_v30 }
 0x7b3   :  { %4353 = vmatpush3.bf16.msra.mxu0 %v6213_v33  ;;  %v3799_v33 = vld [vmem:[%s6711_s12] ss:$0 sm:$0xff] }
 0x7b4   :  { %4354 = vmatprep.subr.bf16.mxu0 %v6703_v30  ;;  %vm1526_vm10 = vcmp.eq.s32.totalorder %v6222_v39, %v3799_v33  ;;  %vm1527_vm11 = vcmp.eq.s32.totalorder %v1520_v31, %v3799_v33  ;;  %v6274_v31 = vld [vmem:[#allocation28 + $0x10] sm:$0xff]   ;;  %v6278_v33 = vld [vmem:[#allocation28 + $0x18] sm:$0xff]  }
 0x877   :  { %v4330_v44 = vpop.f32.mrb[16].mxu1 }
 0x878   :  { %v2196_v45 = vpop.f32.mrb[17].mxu1  ;;  %v2205_v32 = vadd.f32 %v4330_v44, %v6219_v37  ;;  %v6286_v44 = vld [vmem:[#allocation28 + $0x28] sm:$0xff]  }
 0x879   :  { %v2197_v59 = vadd.f32 %v6219_v37, %v2196_v45  ;;  %v4331_v22 = vpop.f32.mrb[18].mxu1 }
 0x87a   :  { %v2199_v29 = vpop.f32.mrb[19].mxu1  ;;  %v2208_v43 = vadd.f32 %v4331_v22, %v6219_v37 }
 0x87b   :  { %v2200_v63 = vadd.f32 %v6219_v37, %v2199_v29  ;;  %v6231_v0 = vadd.f32 %v2197_v59, %v6075_v41  ;;  %v6245_v29 = vadd.f32 %v2205_v32, %v6115_v14  ;;  %v3800_v41 = vsel %vm1526_vm10, 1.0, %v6703_v30  ;;  %v6263_v14 = vld [vmem:[#allocation26 + $0x38] sm:$0xff]   ;;  %v6267_v32 = vld [vmem:[#allocation28] sm:$0xff]  }
 0x87c   :  { %v6238_v45 = vadd.f32 %v2208_v43, %v6118_v21  ;;  %6716 = vst [vmem:[#allocation71_spill] sm:$0xff] %v6263_v14  ;;  %4355 = vmatpush3.bf16.msra.mxu0 %v6263_v14  ;;  %v6270_v43 = vld [vmem:[#allocation28 + $0x8] sm:$0xff]  }
 0x87d   :  { %v6234_v38 = vadd.f32 %v2200_v63, %v6077_v42  ;;  %v3801_v42 = vsel %vm1527_vm11, 1.0, %v6703_v30  ;;  %2459 = vmatprep.subr.bf16.mxu0 %v5954_v40  ;;  %v6282_v40 = vld [vmem:[#allocation28 + $0x20] sm:$0xff]  }
 0x87e   :  { %v6253_v63 = vpack.c.bf16 %v6238_v45, %v6245_v29  ;;  %v6255_v21 = vpack.c.bf16 %v3801_v42, %v3800_v41 }
 0x87f   :  { %v6242_v22 = vpack.c.bf16 %v6234_v38, %v6231_v0 }
 0x880   :  { %6715 = vst [vmem:[#allocation70_spill] sm:$0xff] %v6255_v21 }
 0x881   :  { %4333 = vmatpush3.bf16.msra.mxu1 %v6242_v22 }
 0x882   :  { %4334 = vmatprep.subr.bf16.mxu1 %v6703_v30 }
 0x885   :  { %4335 = vmatpush3.bf16.msra.mxu1 %v6253_v63 }
 0x886   :  { %4360 = vmatprep.subr.bf16.mxu1 %v6703_v30 }
 0x888   :  { %4337 = vmatmul.mubr.msk.bf16.vlgmr.msra.gmra.mrb[20].mxu1 %vm2217_vm13, %v6255_v21  ;;  %v6717_v21 = vmov 0  }
 0x889   :  { %4376 = vmatprep.mubr.msk.bf16.mxu1 %vm5472_vm12, %v6703_v30  ;;  %4361 = vmatpush3.bf16.msra.mxu1 %v6267_v32 }
 0x88a   :  { %4362 = vmatprep.subr.bf16.mxu1 %v6703_v30 }
 0x88d   :  { %4363 = vmatpush3.bf16.msra.mxu1 %v6270_v43 }
 0x88e   :  { %4364 = vmatprep.subr.bf16.mxu1 %v6703_v30 }
 0x891   :  { %4365 = vmatpush3.bf16.msra.mxu1 %v6274_v31 }
 0x892   :  { %4366 = vmatprep.subr.bf16.mxu1 %v6703_v30 }
 0x895   :  { %4367 = vmatpush3.bf16.msra.mxu1 %v6278_v33 }
 0x896   :  { %4368 = vmatprep.subr.bf16.mxu1 %v6703_v30 }
 0x899   :  { %4369 = vmatpush3.bf16.msra.mxu1 %v6282_v40 }
 0x89a   :  { %4370 = vmatprep.subr.bf16.mxu1 %v6703_v30 }
 0x89d   :  { %4371 = vmatpush3.bf16.msra.mxu1 %v6286_v44 }
 0x89e   :  { %4372 = vmatprep.subr.bf16.mxu1 %v6703_v30 }
 0x95b   :  { %v2255_v59 = vpop.f32.mrb[20].mxu1 }
 0x95c   :  { %v4338_v41 = vpop.f32.mrb[21].mxu1 }
 0x95d   :  { %v2258_v42 = vpop.f32.mrb[22].mxu1 }
 0x95e   :  { %v2262_v39 = vpack.c.bf16 %v2258_v42, %v2255_v59  ;;  %v4339_v14 = vpop.f32.mrb[23].mxu1 }
 0x960   :  { %4357 = vmatmul.mubr.bf16.vlgmr.msra.gmra.mrb[20].mxu0 %v2262_v39 }
 0x961   :  { %2460 = vmatpush1.bf16.msra.mxu0 %v5956_v46  ;;  %2491 = vmatprep.mubr.bf16.mxu0 %v6717_v21  ;;  %v6308_v46 = vld [vmem:[#allocation28 + $0x30] sm:$0xff]  }
 0x962   :  { %2461 = vmatprep.subr.bf16.mxu0 %v5959_v47  ;;  %4373 = vmatpush3.bf16.msra.mxu1 %v6308_v46  ;;  %v6312_v47 = vld [vmem:[#allocation28 + $0x38] sm:$0xff]  }
 0x963   :  { %4374 = vmatprep.subr.bf16.mxu1 %v6703_v30 }
 0x965   :  { %2462 = vmatpush1.bf16.msra.mxu0 %v5962_v48  ;;  %v6316_v48 = vld [vmem:[%s6718_s26] ss:$0 sm:$0xff] }
 0x966   :  { %2463 = vmatprep.subr.bf16.mxu0 %v5966_v49  ;;  %4375 = vmatpush3.bf16.msra.mxu1 %v6312_v47 }
 0x969   :  { %2464 = vmatpush1.bf16.msra.mxu0 %v5969_v50 }
 0x96a   :  { %2465 = vmatprep.subr.bf16.mxu0 %v5972_v51 }
 0x96d   :  { %2466 = vmatpush1.bf16.msra.mxu0 %v5975_v52 }
 0x96e   :  { %2467 = vmatprep.subr.bf16.mxu0 %v5978_v53 }
 0x971   :  { %2468 = vmatpush1.bf16.msra.mxu0 %v5981_v54 }
 0x972   :  { %2469 = vmatprep.subr.bf16.mxu0 %v5984_v55 }
 0x975   :  { %2470 = vmatpush1.bf16.msra.mxu0 %v5987_v56 }
 0x976   :  { %2471 = vmatprep.subr.bf16.mxu0 %v5990_v57 }
 0x979   :  { %2472 = vmatpush1.bf16.msra.mxu0 %v5993_v58  ;;  %v6323_v58 = vld [vmem:[%s6719_s28] ss:$0 sm:$0xff] }
 0x97a   :  { %2473 = vmatprep.subr.bf16.mxu0 %v5997_v12 }
 0x97d   :  { %2474 = vmatpush1.bf16.msra.mxu0 %v5999_v13 }
 0x97e   :  { %4412 = vmatprep.subr.bf16.mxu0 %v6030_v15 }
 0xa33   :  { %v2351_v49 = vpop.f32.mrb[20].mxu0 }
 0xa34   :  { %v2352_v50 = vadd.f32 %v6316_v48, %v2351_v49  ;;  %v4358_v51 = vpop.f32.mrb[21].mxu0 }
 0xa35   :  { %v2354_v52 = vpop.f32.mrb[22].mxu0 }
 0xa36   :  { %v2355_v53 = vadd.f32 %v6316_v48, %v2354_v52  ;;  %v4359_v54 = vpop.f32.mrb[23].mxu0  ;;  %v2358_v55 = vmax.f32 %v2352_v50, 0.0 }
 0xa38   :  { %v2359_v56 = vmax.f32 %v2355_v53, 0.0 }
 0xa3a   :  { %v2360_v57 = vpack.c.bf16 %v2359_v56, %v2358_v55  ;;  %v6722_v56 = vld [vmem:[#allocation59_spill] sm:$0xff] }
 0xa3c   :  { %4377 = vmatmul.mubr.bf16.vlgmr.msra.gmra.mrb[24].mxu1 %v2360_v57 }
 0xa3d   :  { %4382 = vmatprep.mubr.msk.bf16.mxu1 %vm1770_vm3, %v6022_v8 }
 0xb0f   :  { %v2449_v12 = vpop.f32.mrb[24].mxu1 }
 0xb10   :  { %v2450_v13 = vadd.f32 %v6323_v58, %v2449_v12  ;;  %v4378_v39 = vpop.f32.mrb[25].mxu1 }
 0xb11   :  { %v2452_v14 = vpop.f32.mrb[26].mxu1 }
 0xb12   :  { %v2453_v59 = vadd.f32 %v6323_v58, %v2452_v14  ;;  %v4379_v41 = vpop.f32.mrb[27].mxu1  ;;  %v6328_v42 = vadd.f32 %v2450_v13, %v6012_v60 }
 0xb14   :  { %v6331_v49 = vadd.f32 %v2453_v59, %v6014_v61 }
 0xb16   :  { %v2458_v50 = vpack.c.bf16 %v6331_v49, %v6328_v42 }
 0xb18   :  { %2492 = vmatmul.mubr.bf16.vlgmr.msra.gmra.mrb[24].mxu0 %v2458_v50 }
 0xb19   :  { %4413 = vmatpush3.bf16.msra.mxu0 %v6030_v15 }
 0xb1a   :  { %4414 = vmatprep.subr.bf16.mxu0 %v6032_v16 }
 0xb1d   :  { %4415 = vmatpush3.bf16.msra.mxu0 %v6032_v16 }
 0xb1e   :  { %4416 = vmatprep.subr.bf16.mxu0 %v6037_v17 }
 0xb21   :  { %4417 = vmatpush3.bf16.msra.mxu0 %v6037_v17 }
 0xb22   :  { %4418 = vmatprep.subr.bf16.mxu0 %v6041_v18 }
 0xb25   :  { %4419 = vmatpush3.bf16.msra.mxu0 %v6041_v18 }
 0xb26   :  { %4420 = vmatprep.subr.bf16.mxu0 %v6045_v19 }
 0xb29   :  { %4421 = vmatpush3.bf16.msra.mxu0 %v6045_v19 }
 0xb2a   :  { %4422 = vmatprep.subr.bf16.mxu0 %v6049_v20 }
 0xb2d   :  { %4423 = vmatpush3.bf16.msra.mxu0 %v6049_v20 }
 0xb2e   :  { %4424 = vmatprep.subr.bf16.mxu0 %v6124_v23 }
 0xb31   :  { %4425 = vmatpush3.bf16.msra.mxu0 %v6124_v23 }
 0xb32   :  { %4426 = vmatprep.subr.bf16.mxu0 %v6128_v9 }
 0xb35   :  { %4427 = vmatpush3.bf16.msra.mxu0 %v6128_v9 }
 0xb36   :  { %4452 = vmatprep.subr.bf16.mxu0 %v6703_v30 }
 0xbeb   :  { %v2493_v60 = vpop.f32.mrb[24].mxu0 }
 0xbec   :  { %v2495_v61 = vpop.f32.mrb[25].mxu0 }
 0xbed   :  { %v2497_v51 = vpop.f32.mrb[26].mxu0 }
 0xbee   :  { %v2502_v52 = vpack.c.bf16 %v2497_v51, %v2493_v60  ;;  %v2499_v53 = vpop.f32.mrb[27].mxu0 }
 0xbef   :  { %v2552_v54 = vpack.c.bf16 %v2499_v53, %v2495_v61 }
 0xbf0   :  { %4380 = vmatprep.subr.bf16.mxu1 %v2502_v52 }
 0xbf1   :  { %4381 = vmatpush3.bf16.msra.mxu1 %v2502_v52 }
 0xbf2   :  { %4386 = vmatprep.subr.bf16.mxu1 %v2552_v54 }
 0xbf4   :  { %4383 = vmatmul.mubr.msk.bf16.vlgmr.msra.gmra.mrb[28].mxu1 %vm1770_vm3, %v6062_v34 }
 0xbf5   :  { %4387 = vmatpush3.bf16.msra.mxu1 %v2552_v54  ;;  %4388 = vmatprep.mubr.msk.bf16.mxu1 %vm1770_vm3, %v6066_v36 }
 0xbf6   :  { %4392 = vmatprep.subr.bf16.mxu1 %v6064_v35 }
 0xc00   :  { %4389 = vmatmul.mubr.msk.bf16.vlgmr.msra.gmra.mrb[28].mxu1 %vm1770_vm3, %v6083_v62 }
 0xc01   :  { %4393 = vmatpush3.bf16.msra.mxu1 %v6064_v35  ;;  %4408 = vmatprep.mubr.bf16.mxu1 %v6242_v22  ;;  %v6720_v22 = vld [vmem:[#allocation60_spill] sm:$0xff] }
 0xc02   :  { %4394 = vmatprep.subr.bf16.mxu1 %v6085_v1 }
 0xc05   :  { %4395 = vmatpush3.bf16.msra.mxu1 %v6085_v1 }
 0xc06   :  { %4396 = vmatprep.subr.bf16.mxu1 %v6091_v3 }
 0xc09   :  { %4397 = vmatpush3.bf16.msra.mxu1 %v6091_v3 }
 0xc0a   :  { %4398 = vmatprep.subr.bf16.mxu1 %v6095_v2 }
 0xc0d   :  { %4399 = vmatpush3.bf16.msra.mxu1 %v6095_v2 }
 0xc0e   :  { %4400 = vmatprep.subr.bf16.mxu1 %v6099_v4 }
 0xc11   :  { %4401 = vmatpush3.bf16.msra.mxu1 %v6099_v4 }
 0xc12   :  { %4402 = vmatprep.subr.bf16.mxu1 %v6103_v6 }
 0xc15   :  { %4403 = vmatpush3.bf16.msra.mxu1 %v6103_v6 }
 0xc16   :  { %4404 = vmatprep.subr.bf16.mxu1 %v6107_v7 }
 0xc19   :  { %4405 = vmatpush3.bf16.msra.mxu1 %v6107_v7 }
 0xc1a   :  { %4406 = vmatprep.subr.bf16.mxu1 %v6111_v10 }
 0xc1d   :  { %4407 = vmatpush3.bf16.msra.mxu1 %v6111_v10 }
 0xc1e   :  { %4432 = vmatprep.subr.bf16.mxu1 %v6134_v11 }
 0xc20   :  { %4409 = vmatmul.mubr.bf16.vlgmr.msra.gmra.mrb[28].mxu1 %v6253_v63  ;;  %v6721_v63 = vld [vmem:[#allocation61_spill] sm:$0xff] }
 0xc21   :  { %4433 = vmatpush3.bf16.msra.mxu1 %v6134_v11 }
 0xc22   :  { %4434 = vmatprep.subr.bf16.mxu1 %v6137_v24 }
 0xc25   :  { %4435 = vmatpush3.bf16.msra.mxu1 %v6137_v24 }
 0xc26   :  { %4436 = vmatprep.subr.bf16.mxu1 %v6143_v25 }
 0xc29   :  { %4437 = vmatpush3.bf16.msra.mxu1 %v6143_v25 }
 0xc2a   :  { %4438 = vmatprep.subr.bf16.mxu1 %v6148_v26 }
 0xc2d   :  { %4439 = vmatpush3.bf16.msra.mxu1 %v6148_v26 }
 0xc2e   :  { %4440 = vmatprep.subr.bf16.mxu1 %v6153_v27 }
 0xc31   :  { %4441 = vmatpush3.bf16.msra.mxu1 %v6153_v27 }
 0xc32   :  { %4442 = vmatprep.subr.bf16.mxu1 %v6158_v28 }
 0xc35   :  { %4443 = vmatpush3.bf16.msra.mxu1 %v6158_v28 }
 0xc36   :  { %4444 = vmatprep.subr.bf16.mxu1 %v6720_v22 }
 0xc39   :  { %4445 = vmatpush3.bf16.msra.mxu1 %v6720_v22 }
 0xc3a   :  { %4446 = vmatprep.subr.bf16.mxu1 %v6721_v63 }
 0xc3d   :  { %4447 = vmatpush3.bf16.msra.mxu1 %v6721_v63 }
 0xc3e   :  { %4480 = vmatprep.subr.bf16.mxu1 %v6703_v30 }
 0xcf3   :  { %v4410_v55 = vpop.f32.mrb[28].mxu1 }
 0xcf4   :  { %v2645_v57 = vadd.f32 %v4410_v55, %v6722_v56  ;;  %v2636_v12 = vpop.f32.mrb[29].mxu1 }
 0xcf5   :  { %v2637_v13 = vadd.f32 %v6722_v56, %v2636_v12  ;;  %v4411_v39 = vpop.f32.mrb[30].mxu1 }
 0xcf6   :  { %v2648_v14 = vadd.f32 %v4411_v39, %v6722_v56  ;;  %v2639_v59 = vpop.f32.mrb[31].mxu1  ;;  %v2661_v50 = vmax.f32 %v2645_v57, 0.0 }
 0xcf7   :  { %v2640_v41 = vadd.f32 %v6722_v56, %v2639_v59  ;;  %v2659_v61 = vmax.f32 %v2637_v13, 0.0 }
 0xcf8   :  { %v2662_v60 = vmax.f32 %v2648_v14, 0.0 }
 0xcf9   :  { %v2660_v51 = vmax.f32 %v2640_v41, 0.0 }
 0xcfa   :  { %v2664_v52 = vpack.c.bf16 %v2662_v60, %v2661_v50 }
 0xcfb   :  { %v2663_v53 = vpack.c.bf16 %v2660_v51, %v2659_v61 }
 0xcfd   :  { %4428 = vmatprep.mubr.bf16.mxu0 %v2663_v53 }
 0xcfe   :  { %4429 = vmatmul.mubr.bf16.vlgmr.msra.gmra.mrb[28].mxu0 %v2664_v52 }
 0xcff   :  { %4456 = vmatprep.mubr.msk.bf16.mxu0 %vm5472_vm12, %v6703_v30 }
 0xdd1   :  { %v4430_v54 = vpop.f32.mrb[28].mxu0 }
 0xdd2   :  { %v2708_v55 = vadd.f32 %v4430_v54, %v6182_v5  ;;  %v2699_v12 = vpop.f32.mrb[29].mxu0 }
 0xdd3   :  { %v2700_v39 = vadd.f32 %v6182_v5, %v2699_v12  ;;  %v4431_v63 = vpop.f32.mrb[30].mxu0 }
 0xdd4   :  { %v2711_v59 = vadd.f32 %v4431_v63, %v6182_v5  ;;  %v2702_v57 = vpop.f32.mrb[31].mxu0  ;;  %v2716_v14 = vmax.f32 %v2708_v55, 0.0 }
 0xdd5   :  { %v2703_v13 = vadd.f32 %v6182_v5, %v2702_v57  ;;  %v2714_v50 = vmax.f32 %v2700_v39, 0.0 }
 0xdd6   :  { %v2717_v41 = vmax.f32 %v2711_v59, 0.0 }
 0xdd7   :  { %v2715_v60 = vmax.f32 %v2703_v13, 0.0 }
 0xdd8   :  { %v2719_v61 = vpack.c.bf16 %v2717_v41, %v2716_v14 }
 0xdd9   :  { %v2718_v51 = vpack.c.bf16 %v2715_v60, %v2714_v50  ;;  %v6726_v60 = vld [vmem:[#allocation64_spill] sm:$0xff] }
 0xddb   :  { %4448 = vmatprep.mubr.bf16.mxu1 %v2718_v51  ;;  %v6728_v51 = vld [vmem:[#allocation66_spill] sm:$0xff] }
 0xddc   :  { %4449 = vmatmul.mubr.bf16.vlgmr.msra.gmra.mrb[32].mxu1 %v2719_v61  ;;  %v6727_v61 = vld [vmem:[#allocation65_spill] sm:$0xff] }
 0xddd   :  { %4481 = vmatpush3.bf16.msra.mxu1 %v6267_v32  ;;  %4496 = vmatprep.mubr.msk.bf16.mxu1 %vm5472_vm12, %v6703_v30 }
 0xdde   :  { %4482 = vmatprep.subr.bf16.mxu1 %v6703_v30 }
 0xde1   :  { %4483 = vmatpush3.bf16.msra.mxu1 %v6270_v43 }
 0xde2   :  { %4484 = vmatprep.subr.bf16.mxu1 %v6703_v30 }
 0xde5   :  { %4485 = vmatpush3.bf16.msra.mxu1 %v6274_v31 }
 0xde6   :  { %4486 = vmatprep.subr.bf16.mxu1 %v6703_v30 }
 0xde9   :  { %4487 = vmatpush3.bf16.msra.mxu1 %v6278_v33 }
 0xdea   :  { %4488 = vmatprep.subr.bf16.mxu1 %v6703_v30 }
 0xded   :  { %4489 = vmatpush3.bf16.msra.mxu1 %v6282_v40 }
 0xdee   :  { %4490 = vmatprep.subr.bf16.mxu1 %v6703_v30 }
 0xdf1   :  { %4491 = vmatpush3.bf16.msra.mxu1 %v6286_v44 }
 0xdf2   :  { %4492 = vmatprep.subr.bf16.mxu1 %v6703_v30 }
 0xdf5   :  { %4493 = vmatpush3.bf16.msra.mxu1 %v6308_v46 }
 0xdf6   :  { %4494 = vmatprep.subr.bf16.mxu1 %v6703_v30 }
 0xdf9   :  { %4495 = vmatpush3.bf16.msra.mxu1 %v6312_v47 }
 0xeaf   :  { %v4450_v63 = vpop.f32.mrb[32].mxu1 }
 0xeb0   :  { %v2754_v52 = vpop.f32.mrb[33].mxu1  ;;  %v2763_v59 = vadd.f32 %v4450_v63, %v6219_v37  ;;  %v6729_v63 = vld [vmem:[#allocation67_spill] sm:$0xff] }
 0xeb1   :  { %v2755_v53 = vadd.f32 %v6219_v37, %v2754_v52  ;;  %v4451_v54 = vpop.f32.mrb[34].mxu1  ;;  %v6730_v52 = vld [vmem:[#allocation68_spill] sm:$0xff] }
 0xeb2   :  { %v2757_v55 = vpop.f32.mrb[35].mxu1  ;;  %v2766_v12 = vadd.f32 %v4451_v54, %v6219_v37  ;;  %v6437_v50 = vadd.f32 %v2763_v59, %v6245_v29  ;;  %v6725_v29 = vld [vmem:[#allocation63_spill] sm:$0xff] }
 0xeb3   :  { %v2758_v39 = vadd.f32 %v6219_v37, %v2757_v55  ;;  %v6424_v57 = vadd.f32 %v2755_v53, %v6231_v0  ;;  %v6731_v53 = vld [vmem:[#allocation71_spill] sm:$0xff] }
 0xeb4   :  { %v6430_v14 = vadd.f32 %v2766_v12, %v6238_v45  ;;  %v6724_v45 = vld [vmem:[#allocation62_spill] sm:$0xff] }
 0xeb5   :  { %v6427_v13 = vadd.f32 %v2758_v39, %v6234_v38  ;;  %v6723_v38 = vld [vmem:[#allocation70_spill] sm:$0xff] }
 0xeb6   :  { %v6443_v0 = vpack.c.bf16 %v6430_v14, %v6437_v50  ;;  %v4929_v54 = vld [vmem:[#allocation22 + $0x4] ss:$8 sps:$4 sm:$0xff]  }
 0xeb7   :  { %v6434_v41 = vpack.c.bf16 %v6427_v13, %v6424_v57 }
 0xeb9   :  { %4453 = vmatpush3.bf16.msra.mxu0 %v6434_v41 }
 0xeba   :  { %4454 = vmatprep.subr.bf16.mxu0 %v6703_v30 }
 0xebd   :  { %4455 = vmatpush3.bf16.msra.mxu0 %v6443_v0 }
 0xebe   :  { %4460 = vmatprep.subr.bf16.mxu0 %v6703_v30 }
 0xec0   :  { %4457 = vmatmul.mubr.msk.bf16.vlgmr.msra.gmra.mrb[32].mxu0 %vm2217_vm13, %v6723_v38 }
 0xec1   :  { %4461 = vmatpush3.bf16.msra.mxu0 %v6724_v45  ;;  %4476 = vmatprep.mubr.msk.bf16.mxu0 %vm5472_vm12, %v6703_v30 }
 0xec2   :  { %4462 = vmatprep.subr.bf16.mxu0 %v6703_v30 }
 0xec5   :  { %4463 = vmatpush3.bf16.msra.mxu0 %v6725_v29  ;;  %v4934_v29 = vld [vmem:[#allocation22 + $0x20] ss:$8 sps:$4 sm:$0xff]  }
 0xec6   :  { %4464 = vmatprep.subr.bf16.mxu0 %v6703_v30 }
 0xec9   :  { %4465 = vmatpush3.bf16.msra.mxu0 %v6726_v60  ;;  %v4932_v60 = vld [vmem:[#allocation22 + $0x10] ss:$8 sps:$4 sm:$0xff]  }
 0xeca   :  { %4466 = vmatprep.subr.bf16.mxu0 %v6703_v30 }
 0xecd   :  { %4467 = vmatpush3.bf16.msra.mxu0 %v6727_v61 }
 0xece   :  { %4468 = vmatprep.subr.bf16.mxu0 %v6703_v30 }
 0xed1   :  { %4469 = vmatpush3.bf16.msra.mxu0 %v6728_v51  ;;  %v4930_v51 = vld [vmem:[#allocation22] ss:$8 sps:$4 sm:$0xff]  }
 0xed2   :  { %4470 = vmatprep.subr.bf16.mxu0 %v6703_v30 }
 0xed5   :  { %4471 = vmatpush3.bf16.msra.mxu0 %v6729_v63  ;;  %v4931_v63 = vld [vmem:[#allocation22 + $0x14] ss:$8 sps:$4 sm:$0xff]  }
 0xed6   :  { %4472 = vmatprep.subr.bf16.mxu0 %v6703_v30 }
 0xed9   :  { %4473 = vmatpush3.bf16.msra.mxu0 %v6730_v52  ;;  %v4933_v52 = vld [vmem:[#allocation22 + $0x24] ss:$8 sps:$4 sm:$0xff]  }
 0xeda   :  { %4474 = vmatprep.subr.bf16.mxu0 %v6703_v30 }
 0xedd   :  { %4475 = vmatpush3.bf16.msra.mxu0 %v6731_v53  ;;  %v4935_v53 = vld [vmem:[#allocation22 + $0x34] ss:$8 sps:$4 sm:$0xff]  }
 0xede   :  { %2905 = vmatprep.subr.bf16.mxu0 %v4929_v54  ;;  %v4936_v54 = vld [vmem:[#allocation22 + $0x30] ss:$8 sps:$4 sm:$0xff]  }
 0xf93   :  { %v2809_v55 = vpop.f32.mrb[32].mxu0 }
 0xf94   :  { %v4458_v12 = vpop.f32.mrb[33].mxu0 }
 0xf95   :  { %v2812_v39 = vpop.f32.mrb[34].mxu0  ;;  %v4937_v12 = vld [vmem:[#allocation22 + $0x44] ss:$8 sps:$4 sm:$0xff]  }
 0xf96   :  { %v2816_v59 = vpack.c.bf16 %v2812_v39, %v2809_v55  ;;  %v4459_v61 = vpop.f32.mrb[35].mxu0  ;;  %v4939_v55 = vld [vmem:[#allocation22 + $0x54] ss:$8 sps:$4 sm:$0xff]  }
 0xf97   :  { %v4938_v61 = vld [vmem:[#allocation22 + $0x40] ss:$8 sps:$4 sm:$0xff]  }
 0xf98   :  { %4477 = vmatmul.mubr.bf16.vlgmr.msra.gmra.mrb[36].mxu0 %v2816_v59 }
 0xf99   :  { %2906 = vmatpush1.bf16.msra.mxu0 %v4930_v51  ;;  %2937 = vmatprep.mubr.bf16.mxu0 %v6717_v21  ;;  %v4940_v51 = vld [vmem:[#allocation22 + $0x50] ss:$8 sps:$4 sm:$0xff]   ;;  %v4941_v21 = vld [vmem:[#allocation22 + $0x64] ss:$8 sps:$4 sm:$0xff]  }
 0xf9a   :  { %2907 = vmatprep.subr.bf16.mxu0 %v4931_v63  ;;  %v4942_v63 = vld [vmem:[#allocation22 + $0x60] ss:$8 sps:$4 sm:$0xff]  }
 0xf9d   :  { %2908 = vmatpush1.bf16.msra.mxu0 %v4932_v60  ;;  %v4943_v60 = vld [vmem:[#allocation22 + $0x74] ss:$8 sps:$4 sm:$0xff]  }
 0xf9e   :  { %2909 = vmatprep.subr.bf16.mxu0 %v4933_v52  ;;  %v4944_v52 = vld [vmem:[#allocation22 + $0x70] ss:$8 sps:$4 sm:$0xff]  }
 0xfa1   :  { %2910 = vmatpush1.bf16.msra.mxu0 %v4934_v29 }
 0xfa2   :  { %2911 = vmatprep.subr.bf16.mxu0 %v4935_v53 }
 0xfa5   :  { %2912 = vmatpush1.bf16.msra.mxu0 %v4936_v54 }
 0xfa6   :  { %2913 = vmatprep.subr.bf16.mxu0 %v4937_v12 }
 0xfa9   :  { %2914 = vmatpush1.bf16.msra.mxu0 %v4938_v61 }
 0xfaa   :  { %2915 = vmatprep.subr.bf16.mxu0 %v4939_v55 }
 0xfad   :  { %2916 = vmatpush1.bf16.msra.mxu0 %v4940_v51 }
 0xfae   :  { %2917 = vmatprep.subr.bf16.mxu0 %v4941_v21 }
 0xfb1   :  { %2918 = vmatpush1.bf16.msra.mxu0 %v4942_v63 }
 0xfb2   :  { %2919 = vmatprep.subr.bf16.mxu0 %v4943_v60 }
 0xfb5   :  { %2920 = vmatpush1.bf16.msra.mxu0 %v4944_v52 }
 0xfb6   :  { %4532 = vmatprep.subr.bf16.mxu0 %v6030_v15 }
0x106b   :  { %v2851_v29 = vpop.f32.mrb[36].mxu0 }
0x106c   :  { %v2852_v53 = vadd.f32 %v6316_v48, %v2851_v29  ;;  %v4478_v39 = vpop.f32.mrb[37].mxu0 }
0x106d   :  { %v2854_v59 = vpop.f32.mrb[38].mxu0 }
0x106e   :  { %v2855_v54 = vadd.f32 %v6316_v48, %v2854_v59  ;;  %v4479_v12 = vpop.f32.mrb[39].mxu0  ;;  %v2858_v61 = vmax.f32 %v2852_v53, 0.0 }
0x1070   :  { %v2859_v55 = vmax.f32 %v2855_v54, 0.0 }
0x1072   :  { %v2860_v51 = vpack.c.bf16 %v2859_v55, %v2858_v61 }
0x1074   :  { %4497 = vmatmul.mubr.bf16.vlgmr.msra.gmra.mrb[36].mxu1 %v2860_v51 }
0x1075   :  { %4502 = vmatprep.mubr.msk.bf16.mxu1 %vm1770_vm3, %v6022_v8 }
0x1147   :  { %v2895_v21 = vpop.f32.mrb[36].mxu1 }
0x1148   :  { %v2896_v63 = vadd.f32 %v6323_v58, %v2895_v21  ;;  %v4498_v60 = vpop.f32.mrb[37].mxu1 }
0x1149   :  { %v2898_v52 = vpop.f32.mrb[38].mxu1  ;;  %v6739_v60 = vld [vmem:[#allocation68_spill] sm:$0xff] }
0x114a   :  { %v2899_v45 = vadd.f32 %v6323_v58, %v2898_v52  ;;  %v4499_v29 = vpop.f32.mrb[39].mxu1  ;;  %v6475_v39 = vadd.f32 %v2896_v63, %v6328_v42  ;;  %v6740_v52 = vld [vmem:[#allocation71_spill] sm:$0xff] }
0x114c   :  { %v6478_v59 = vadd.f32 %v2899_v45, %v6331_v49 }
0x114e   :  { %v2904_v53 = vpack.c.bf16 %v6478_v59, %v6475_v39 }
0x1150   :  { %2938 = vmatmul.mubr.bf16.vlgmr.msra.gmra.mrb[40].mxu0 %v2904_v53 }
0x1151   :  { %4533 = vmatpush3.bf16.msra.mxu0 %v6030_v15 }
0x1152   :  { %4534 = vmatprep.subr.bf16.mxu0 %v6032_v16 }
0x1155   :  { %4535 = vmatpush3.bf16.msra.mxu0 %v6032_v16 }
0x1156   :  { %4536 = vmatprep.subr.bf16.mxu0 %v6037_v17 }
0x1159   :  { %4537 = vmatpush3.bf16.msra.mxu0 %v6037_v17 }
0x115a   :  { %4538 = vmatprep.subr.bf16.mxu0 %v6041_v18 }
0x115d   :  { %4539 = vmatpush3.bf16.msra.mxu0 %v6041_v18 }
0x115e   :  { %4540 = vmatprep.subr.bf16.mxu0 %v6045_v19 }
0x1161   :  { %4541 = vmatpush3.bf16.msra.mxu0 %v6045_v19 }
0x1162   :  { %4542 = vmatprep.subr.bf16.mxu0 %v6049_v20 }
0x1165   :  { %4543 = vmatpush3.bf16.msra.mxu0 %v6049_v20 }
0x1166   :  { %4544 = vmatprep.subr.bf16.mxu0 %v6124_v23 }
0x1169   :  { %4545 = vmatpush3.bf16.msra.mxu0 %v6124_v23 }
0x116a   :  { %4546 = vmatprep.subr.bf16.mxu0 %v6128_v9 }
0x116d   :  { %4547 = vmatpush3.bf16.msra.mxu0 %v6128_v9 }
0x116e   :  { %4552 = vmatprep.subr.bf16.mxu0 %v6134_v11 }
0x1223   :  { %v2939_v8 = vpop.f32.mrb[40].mxu0 }
0x1224   :  { %v2941_v15 = vpop.f32.mrb[41].mxu0 }
0x1225   :  { %v2943_v16 = vpop.f32.mrb[42].mxu0 }
0x1226   :  { %v2948_v17 = vpack.c.bf16 %v2943_v16, %v2939_v8  ;;  %v2945_v18 = vpop.f32.mrb[43].mxu0 }
0x1227   :  { %v2998_v19 = vpack.c.bf16 %v2945_v18, %v2941_v15 }
0x1228   :  { %4500 = vmatprep.subr.bf16.mxu1 %v2948_v17 }
0x1229   :  { %4501 = vmatpush3.bf16.msra.mxu1 %v2948_v17 }
0x122a   :  { %4506 = vmatprep.subr.bf16.mxu1 %v2998_v19 }
0x122c   :  { %4503 = vmatmul.mubr.msk.bf16.vlgmr.msra.gmra.mrb[40].mxu1 %vm1770_vm3, %v6062_v34 }
0x122d   :  { %4507 = vmatpush3.bf16.msra.mxu1 %v2998_v19  ;;  %4508 = vmatprep.mubr.msk.bf16.mxu1 %vm1770_vm3, %v6066_v36 }
0x122e   :  { %4512 = vmatprep.subr.bf16.mxu1 %v6064_v35 }
0x1238   :  { %4509 = vmatmul.mubr.msk.bf16.vlgmr.msra.gmra.mrb[40].mxu1 %vm1770_vm3, %v6083_v62 }
0x1239   :  { %4513 = vmatpush3.bf16.msra.mxu1 %v6064_v35  ;;  %4528 = vmatprep.mubr.bf16.mxu1 %v6434_v41 }
0x123a   :  { %4514 = vmatprep.subr.bf16.mxu1 %v6085_v1 }
0x123d   :  { %4515 = vmatpush3.bf16.msra.mxu1 %v6085_v1 }
0x123e   :  { %4516 = vmatprep.subr.bf16.mxu1 %v6091_v3 }
0x1241   :  { %4517 = vmatpush3.bf16.msra.mxu1 %v6091_v3 }
0x1242   :  { %4518 = vmatprep.subr.bf16.mxu1 %v6095_v2 }
0x1245   :  { %4519 = vmatpush3.bf16.msra.mxu1 %v6095_v2 }
0x1246   :  { %4520 = vmatprep.subr.bf16.mxu1 %v6099_v4 }
0x1249   :  { %4521 = vmatpush3.bf16.msra.mxu1 %v6099_v4 }
0x124a   :  { %4522 = vmatprep.subr.bf16.mxu1 %v6103_v6 }
0x124d   :  { %4523 = vmatpush3.bf16.msra.mxu1 %v6103_v6 }
0x124e   :  { %4524 = vmatprep.subr.bf16.mxu1 %v6107_v7 }
0x1251   :  { %4525 = vmatpush3.bf16.msra.mxu1 %v6107_v7 }
0x1252   :  { %4526 = vmatprep.subr.bf16.mxu1 %v6111_v10 }
0x1255   :  { %4527 = vmatpush3.bf16.msra.mxu1 %v6111_v10 }
0x1256   :  { %4572 = vmatprep.subr.bf16.mxu1 %v6703_v30 }
0x1258   :  { %4529 = vmatmul.mubr.bf16.vlgmr.msra.gmra.mrb[40].mxu1 %v6443_v0 }
0x1259   :  { %4576 = vmatprep.mubr.msk.bf16.mxu1 %vm5472_vm12, %v6703_v30 }
0x132b   :  { %v4530_v20 = vpop.f32.mrb[40].mxu1 }
0x132c   :  { %v3091_v34 = vadd.f32 %v4530_v20, %v6722_v56  ;;  %v3082_v35 = vpop.f32.mrb[41].mxu1 }
0x132d   :  { %v3083_v36 = vadd.f32 %v6722_v56, %v3082_v35  ;;  %v4531_v62 = vpop.f32.mrb[42].mxu1 }
0x132e   :  { %v3094_v1 = vadd.f32 %v4531_v62, %v6722_v56  ;;  %v3085_v3 = vpop.f32.mrb[43].mxu1  ;;  %v3107_v4 = vmax.f32 %v3091_v34, 0.0 }
0x132f   :  { %v3086_v2 = vadd.f32 %v6722_v56, %v3085_v3  ;;  %v3105_v7 = vmax.f32 %v3083_v36, 0.0  ;;  %v3802_v3 = vld [vmem:[%s6741_s20] ss:$0 sm:$0xff] }
0x1330   :  { %v3108_v6 = vmax.f32 %v3094_v1, 0.0 }
0x1331   :  { %v3106_v10 = vmax.f32 %v3086_v2, 0.0 }
0x1332   :  { %v3110_v23 = vpack.c.bf16 %v3108_v6, %v3107_v4 }
0x1333   :  { %v3109_v9 = vpack.c.bf16 %v3106_v10, %v3105_v7  ;;  %v6742_v10 = vld [vmem:[#allocation69_spill] sm:$0xff] }
0x1334   :  { %vm1538_vm14 = vcmp.eq.s32.totalorder %v6742_v10, %v3802_v3 }
0x1335   :  { %4548 = vmatprep.mubr.bf16.mxu0 %v3109_v9 }
0x1336   :  { %4549 = vmatmul.mubr.bf16.vlgmr.msra.gmra.mrb[44].mxu0 %v3110_v23 }
0x1337   :  { %4553 = vmatpush3.bf16.msra.mxu0 %v6134_v11  ;;  %v6732_v11 = vld [vmem:[#allocation61_spill] sm:$0xff] }
0x1338   :  { %4554 = vmatprep.subr.bf16.mxu0 %v6137_v24 }
0x133b   :  { %4555 = vmatpush3.bf16.msra.mxu0 %v6137_v24 }
0x133c   :  { %4556 = vmatprep.subr.bf16.mxu0 %v6143_v25 }
0x133f   :  { %4557 = vmatpush3.bf16.msra.mxu0 %v6143_v25 }
0x1340   :  { %4558 = vmatprep.subr.bf16.mxu0 %v6148_v26 }
0x1343   :  { %4559 = vmatpush3.bf16.msra.mxu0 %v6148_v26 }
0x1344   :  { %4560 = vmatprep.subr.bf16.mxu0 %v6153_v27 }
0x1347   :  { %4561 = vmatpush3.bf16.msra.mxu0 %v6153_v27 }
0x1348   :  { %4562 = vmatprep.subr.bf16.mxu0 %v6158_v28 }
0x134b   :  { %4563 = vmatpush3.bf16.msra.mxu0 %v6158_v28 }
0x134c   :  { %4564 = vmatprep.subr.bf16.mxu0 %v6720_v22 }
0x134f   :  { %4565 = vmatpush3.bf16.msra.mxu0 %v6720_v22 }
0x1350   :  { %4566 = vmatprep.subr.bf16.mxu0 %v6732_v11 }
0x1353   :  { %4567 = vmatpush3.bf16.msra.mxu0 %v6732_v11 }
0x1354   :  { %4600 = vmatprep.subr.bf16.mxu0 %v6703_v30 }
0x1409   :  { %v4550_v24 = vpop.f32.mrb[44].mxu0 }
0x140a   :  { %v3154_v25 = vadd.f32 %v4550_v24, %v6182_v5  ;;  %v3145_v26 = vpop.f32.mrb[45].mxu0  ;;  %v3803_v24 = vsel %vm1538_vm14, 1.0, %v6703_v30 }
0x140b   :  { %v3146_v27 = vadd.f32 %v6182_v5, %v3145_v26  ;;  %v4551_v42 = vpop.f32.mrb[46].mxu0  ;;  %v1541_v26 = vpack.c.bf16 %v3803_v24, %v3803_v24 }
0x140c   :  { %v3157_v49 = vadd.f32 %v4551_v42, %v6182_v5  ;;  %v3148_v28 = vpop.f32.mrb[47].mxu0  ;;  %v3162_v41 = vmax.f32 %v3154_v25, 0.0  ;;  %v4914_v42 = vld [vmem:[#allocation29 + $0x8] sm:$0xff]  }
0x140d   :  { %v3149_v56 = vadd.f32 %v6182_v5, %v3148_v28  ;;  %v3160_v0 = vmax.f32 %v3146_v27, 0.0  ;;  %v4913_v27 = vld [vmem:[#allocation29] sm:$0xff]   ;;  %v4919_v28 = vld [vmem:[#allocation29 + $0x30] sm:$0xff]  }
0x140e   :  { %v3163_v22 = vmax.f32 %v3157_v49, 0.0  ;;  %v4918_v49 = vld [vmem:[#allocation29 + $0x28] sm:$0xff]  }
0x140f   :  { %v3161_v45 = vmax.f32 %v3149_v56, 0.0  ;;  %v4920_v56 = vld [vmem:[#allocation29 + $0x38] sm:$0xff]  }
0x1410   :  { %v3165_v54 = vpack.c.bf16 %v3163_v22, %v3162_v41  ;;  %v4921_v41 = vld [vmem:[#allocation31] sm:$0xff]   ;;  %v4922_v22 = vld [vmem:[#allocation31 + $0x8] sm:$0xff]  }
0x1411   :  { %v3164_v12 = vpack.c.bf16 %v3161_v45, %v3160_v0  ;;  %v4923_v0 = vld [vmem:[#allocation31 + $0x10] sm:$0xff]   ;;  %v4924_v45 = vld [vmem:[#allocation31 + $0x18] sm:$0xff]  }
0x1413   :  { %4568 = vmatprep.mubr.bf16.mxu0 %v3164_v12  ;;  %v4926_v12 = vld [vmem:[#allocation31 + $0x28] sm:$0xff]  }
0x1414   :  { %4569 = vmatmul.mubr.bf16.vlgmr.msra.gmra.mrb[48].mxu0 %v3165_v54  ;;  %v4925_v54 = vld [vmem:[#allocation31 + $0x20] sm:$0xff]  }
0x1415   :  { %4601 = vmatpush3.bf16.msra.mxu0 %v6267_v32  ;;  %4616 = vmatprep.mubr.msk.bf16.mxu0 %vm5472_vm12, %v6703_v30 }
0x1416   :  { %4602 = vmatprep.subr.bf16.mxu0 %v6703_v30 }
0x1419   :  { %4603 = vmatpush3.bf16.msra.mxu0 %v6270_v43 }
0x141a   :  { %4604 = vmatprep.subr.bf16.mxu0 %v6703_v30 }
0x141d   :  { %4605 = vmatpush3.bf16.msra.mxu0 %v6274_v31 }
0x141e   :  { %4606 = vmatprep.subr.bf16.mxu0 %v6703_v30 }
0x1421   :  { %4607 = vmatpush3.bf16.msra.mxu0 %v6278_v33 }
0x1422   :  { %4608 = vmatprep.subr.bf16.mxu0 %v6703_v30 }
0x1425   :  { %4609 = vmatpush3.bf16.msra.mxu0 %v6282_v40 }
0x1426   :  { %4610 = vmatprep.subr.bf16.mxu0 %v6703_v30 }
0x1429   :  { %4611 = vmatpush3.bf16.msra.mxu0 %v6286_v44 }
0x142a   :  { %4612 = vmatprep.subr.bf16.mxu0 %v6703_v30 }
0x142d   :  { %4613 = vmatpush3.bf16.msra.mxu0 %v6308_v46 }
0x142e   :  { %4614 = vmatprep.subr.bf16.mxu0 %v6703_v30 }
0x1431   :  { %4615 = vmatpush3.bf16.msra.mxu0 %v6312_v47 }
0x1432   :  { %4646 = vmatprep.subr.bf16.mxu0 %v6703_v30 }
0x14e7   :  { %v4570_v5 = vpop.f32.mrb[48].mxu0 }
0x14e8   :  { %v3209_v32 = vadd.f32 %v4570_v5, %v6219_v37  ;;  %v3200_v43 = vpop.f32.mrb[49].mxu0  ;;  %v3398_v5 = vpop.permute.xlu1 %3397 }
0x14e9   :  { %v3201_v31 = vadd.f32 %v6219_v37, %v3200_v43  ;;  %v4571_v33 = vpop.f32.mrb[50].mxu0 }
0x14ea   :  { %v3212_v40 = vadd.f32 %v4571_v33, %v6219_v37  ;;  %v3203_v44 = vpop.f32.mrb[51].mxu0  ;;  %v3217_v46 = vadd.f32 %v3209_v32, %v6437_v50  ;;  %v6737_v50 = vld [vmem:[#allocation66_spill] sm:$0xff] }
0x14eb   :  { %v3204_v61 = vadd.f32 %v6219_v37, %v3203_v44  ;;  %v3215_v47 = vadd.f32 %v3201_v31, %v6424_v57  ;;  %v6733_v37 = vld [vmem:[#allocation62_spill] sm:$0xff]  ;;  %v6734_v57 = vld [vmem:[#allocation63_spill] sm:$0xff] }
0x14ec   :  { %v3218_v55 = vadd.f32 %v3212_v40, %v6430_v14  ;;  %v6736_v14 = vld [vmem:[#allocation65_spill] sm:$0xff] }
0x14ed   :  { %v3216_v51 = vadd.f32 %v3204_v61, %v6427_v13  ;;  %v6735_v13 = vld [vmem:[#allocation64_spill] sm:$0xff] }
0x14ee   :  { %v3220_v21 = vpack.c.bf16 %v3218_v55, %v3217_v46  ;;  %v4927_v61 = vld [vmem:[#allocation31 + $0x30] sm:$0xff]   ;;  %v4928_v46 = vld [vmem:[#allocation31 + $0x38] sm:$0xff]   ;;  %v3881_v55 = vld [vmem:[%s5627_s17] ss:$0 sm:$0xff] }
0x14ef   :  { %v3219_v63 = vpack.c.bf16 %v3216_v51, %v3215_v47 }
0x14f1   :  { %4573 = vmatpush3.bf16.msra.mxu1 %v3219_v63 }
0x14f2   :  { %4574 = vmatprep.subr.bf16.mxu1 %v6703_v30 }
0x14f5   :  { %4575 = vmatpush3.bf16.msra.mxu1 %v3220_v21 }
0x14f6   :  { %4580 = vmatprep.subr.bf16.mxu1 %v6703_v30 }
0x14f8   :  { %4577 = vmatmul.mubr.msk.bf16.vlgmr.msra.gmra.mrb[44].mxu1 %vm2217_vm13, %v6723_v38  ;;  %v6738_v38 = vld [vmem:[#allocation67_spill] sm:$0xff] }
0x14f9   :  { %4581 = vmatpush3.bf16.msra.mxu1 %v6733_v37  ;;  %4596 = vmatprep.mubr.msk.bf16.mxu1 %vm5472_vm12, %v6703_v30 }
0x14fa   :  { %4582 = vmatprep.subr.bf16.mxu1 %v6703_v30 }
0x14fd   :  { %4583 = vmatpush3.bf16.msra.mxu1 %v6734_v57 }
0x14fe   :  { %4584 = vmatprep.subr.bf16.mxu1 %v6703_v30 }
0x1501   :  { %4585 = vmatpush3.bf16.msra.mxu1 %v6735_v13 }
0x1502   :  { %4586 = vmatprep.subr.bf16.mxu1 %v6703_v30 }
0x1505   :  { %4587 = vmatpush3.bf16.msra.mxu1 %v6736_v14  ;;  %v3890_v14 = vld [vmem:[%s5637_s9] ss:$0 sm:$0xff] }
0x1506   :  { %4588 = vmatprep.subr.bf16.mxu1 %v6703_v30 }
0x1509   :  { %4589 = vmatpush3.bf16.msra.mxu1 %v6737_v50 }
0x150a   :  { %4590 = vmatprep.subr.bf16.mxu1 %v6703_v30 }
0x150d   :  { %4591 = vmatpush3.bf16.msra.mxu1 %v6738_v38 }
0x150e   :  { %4592 = vmatprep.subr.bf16.mxu1 %v6703_v30 }
0x1511   :  { %4593 = vmatpush3.bf16.msra.mxu1 %v6739_v60 }
0x1512   :  { %4594 = vmatprep.subr.bf16.mxu1 %v6703_v30 }
0x1515   :  { %4595 = vmatpush3.bf16.msra.mxu1 %v6740_v52 }
0x1516   :  { %4620 = vmatprep.subr.bf16.mxu1 %v6703_v30 }
0x15cb   :  { %v3255_v29 = vpop.f32.mrb[44].mxu1 }
0x15cc   :  { %v4578_v53 = vpop.f32.mrb[45].mxu1 }
0x15cd   :  { %v3258_v8 = vpop.f32.mrb[46].mxu1 }
0x15ce   :  { %v3262_v15 = vpack.c.bf16 %v3258_v8, %v3255_v29  ;;  %v4579_v16 = vpop.f32.mrb[47].mxu1 }
0x15d0   :  { %4597 = vmatmul.mubr.bf16.vlgmr.msra.gmra.mrb[48].mxu1 %v3262_v15 }
0x15d1   :  { %4622 = vmatprep.mubr.msk.bf16.mxu1 %vm5472_vm12, %v6703_v30 }
0x16a3   :  { %v3297_v17 = vpop.f32.mrb[48].mxu1 }
0x16a4   :  { %v3298_v18 = vadd.f32 %v6316_v48, %v3297_v17  ;;  %v4598_v19 = vpop.f32.mrb[49].mxu1 }
0x16a5   :  { %v3300_v20 = vpop.f32.mrb[50].mxu1 }
0x16a6   :  { %v3301_v34 = vadd.f32 %v6316_v48, %v3300_v20  ;;  %v4599_v35 = vpop.f32.mrb[51].mxu1  ;;  %v3304_v36 = vmax.f32 %v3298_v18, 0.0 }
0x16a8   :  { %v3305_v62 = vmax.f32 %v3301_v34, 0.0 }
0x16aa   :  { %v3306_v1 = vpack.c.bf16 %v3305_v62, %v3304_v36 }
0x16ac   :  { %4617 = vmatmul.mubr.bf16.vlgmr.msra.gmra.mrb[52].mxu0 %v3306_v1 }
0x16ad   :  { %4662 = vmatprep.mubr.msk.bf16.mxu0 %vm5472_vm12, %v6703_v30  ;;  %4647 = vmatpush3.bf16.msra.mxu0 %v4921_v41 }
0x16ae   :  { %4648 = vmatprep.subr.bf16.mxu0 %v6703_v30 }
0x16b1   :  { %4649 = vmatpush3.bf16.msra.mxu0 %v4922_v22 }
0x16b2   :  { %4650 = vmatprep.subr.bf16.mxu0 %v6703_v30 }
0x16b5   :  { %4651 = vmatpush3.bf16.msra.mxu0 %v4923_v0 }
0x16b6   :  { %4652 = vmatprep.subr.bf16.mxu0 %v6703_v30 }
0x16b9   :  { %4653 = vmatpush3.bf16.msra.mxu0 %v4924_v45 }
0x16ba   :  { %4654 = vmatprep.subr.bf16.mxu0 %v6703_v30 }
0x16bd   :  { %4655 = vmatpush3.bf16.msra.mxu0 %v4925_v54 }
0x16be   :  { %4656 = vmatprep.subr.bf16.mxu0 %v6703_v30 }
0x16c1   :  { %4657 = vmatpush3.bf16.msra.mxu0 %v4926_v12 }
0x16c2   :  { %4658 = vmatprep.subr.bf16.mxu0 %v6703_v30 }
0x16c5   :  { %4659 = vmatpush3.bf16.msra.mxu0 %v4927_v61 }
0x16c6   :  { %4660 = vmatprep.subr.bf16.mxu0 %v6703_v30 }
0x16c9   :  { %4661 = vmatpush3.bf16.msra.mxu0 %v4928_v46 }
0x177f   :  { %v3341_v2 = vpop.f32.mrb[52].mxu0 }
0x1780   :  { %v3342_v4 = vadd.f32 %v6323_v58, %v3341_v2  ;;  %v4618_v6 = vpop.f32.mrb[53].mxu0 }
0x1781   :  { %v3344_v7 = vpop.f32.mrb[54].mxu0 }
0x1782   :  { %v3345_v23 = vadd.f32 %v6323_v58, %v3344_v7  ;;  %v4619_v9 = vpop.f32.mrb[55].mxu0  ;;  %v3348_v48 = vadd.f32 %v3342_v4, %v6475_v39  ;;  %v4915_v58 = vld [vmem:[#allocation29 + $0x10] sm:$0xff]   ;;  %v4916_v39 = vld [vmem:[#allocation29 + $0x18] sm:$0xff]  }
0x1784   :  { %v3349_v11 = vadd.f32 %v3345_v23, %v6478_v59  ;;  %v4917_v59 = vld [vmem:[#allocation29 + $0x20] sm:$0xff]  }
0x1786   :  { %v3350_v25 = vpack.c.bf16 %v3349_v11, %v3348_v48 }
0x1788   :  { %4621 = vmatpush3.bf16.msra.mxu1 %v3350_v25 }
0x1789   :  { %4626 = vmatprep.subr.bf16.mxu1 %v6703_v30 }
0x178b   :  { %4623 = vmatmul.mubr.msk.bf16.vlgmr.msra.gmra.mrb[52].mxu1 %vm1770_vm3, %v1541_v26 }
0x178c   :  { %4627 = vmatpush3.bf16.msra.mxu1 %v4913_v27  ;;  %4642 = vmatprep.mubr.msk.bf16.mxu1 %vm5472_vm12, %v6703_v30 }
0x178d   :  { %4628 = vmatprep.subr.bf16.mxu1 %v6703_v30 }
0x1790   :  { %4629 = vmatpush3.bf16.msra.mxu1 %v4914_v42 }
0x1791   :  { %4630 = vmatprep.subr.bf16.mxu1 %v6703_v30 }
0x1794   :  { %4631 = vmatpush3.bf16.msra.mxu1 %v4915_v58 }
0x1795   :  { %4632 = vmatprep.subr.bf16.mxu1 %v6703_v30 }
0x1798   :  { %4633 = vmatpush3.bf16.msra.mxu1 %v4916_v39 }
0x1799   :  { %4634 = vmatprep.subr.bf16.mxu1 %v6703_v30 }
0x179c   :  { %4635 = vmatpush3.bf16.msra.mxu1 %v4917_v59 }
0x179d   :  { %4636 = vmatprep.subr.bf16.mxu1 %v6703_v30 }
0x17a0   :  { %4637 = vmatpush3.bf16.msra.mxu1 %v4918_v49 }
0x17a1   :  { %4638 = vmatprep.subr.bf16.mxu1 %v6703_v30 }
0x17a4   :  { %4639 = vmatpush3.bf16.msra.mxu1 %v4919_v28 }
0x17a5   :  { %4640 = vmatprep.subr.bf16.mxu1 %v6703_v30 }
0x17a8   :  { %4641 = vmatpush3.bf16.msra.mxu1 %v4920_v56 }
0x185e   :  { %v3388_v32 = vpop.f32.mrb[52].mxu1 }
0x185f   :  { %v3400_v43 = vmul.f32 %v3398_v5, %v3388_v32  ;;  %v4624_v31 = vpop.f32.mrb[53].mxu1 }
0x1860   :  { %v3391_v33 = vpop.f32.mrb[54].mxu1 }
0x1861   :  { %v3418_v40 = vpack.c.bf16 %v3400_v43, %v3400_v43  ;;  %v4625_v44 = vpop.f32.mrb[55].mxu1 }
0x1863   :  { %4643 = vmatmul.mubr.bf16.vlgmr.msra.gmra.mrb[56].mxu1 %v3418_v40 }
0x1936   :  { %v3507_v47 = vpop.f32.mrb[56].mxu1 }
0x1937   :  { %v3508_v51 = vadd.f32 %v3881_v55, %v3507_v47  ;;  %v4644_v21 = vpop.f32.mrb[57].mxu1 }
0x1938   :  { %v3510_v63 = vpop.f32.mrb[58].mxu1 }
0x1939   :  { %v3513_v37 = vmax.f32 %v3508_v51, 0.0  ;;  %v4645_v57 = vpop.f32.mrb[59].mxu1 }
0x193b   :  { %v3531_v13 = vpack.c.bf16 %v3513_v37, %v3513_v37 }
0x193d   :  { %4663 = vmatmul.mubr.bf16.vlgmr.msra.gmra.mrb[56].mxu0 %v3531_v13 }
0x1a10   :  { %v3620_v50 = vpop.f32.mrb[56].mxu0 }
0x1a11   :  { %v3621_v38 = vadd.f32 %v3890_v14, %v3620_v50  ;;  %v4664_v60 = vpop.f32.mrb[57].mxu0 }
0x1a12   :  { %v3623_v52 = vpop.f32.mrb[58].mxu0 }
0x1a13   :  { %3626 = vst [vmem:[#allocation32] sm:$0xff] %v3621_v38  ;;  %v4665_v30 = vpop.f32.mrb[59].mxu0 }
0x1a14   :  { %5374 = shalt.err (!%p5371_p2)
}
0x1a15   :  { %s5375_s9 = scalar_lea.hbm %s5642_s4, 128 }
0x1a16   :  { %p5376_p3 = scmp.ne.s32.totalorder %s5642_s4, %s5375_s9  ;;  %p5379_p4 = scmp.lt.u32.totalorder %s5375_s9, %s5642_s4 }
0x1a18   :  { %p5381_p5 = pnand %p5379_p4, %p5376_p3 }
0x1a1a   :  { %5384 = shalt.err (!%p5381_p5)
}
0x1a1b   :  { %3636 = dma.vmem_to_hbm [thread:$0]  %s3634_s19, 128, %s5642_s4, [#allocation4]  }
0x1a1c   :  { %5405 = dma.done.wait [#allocation4], 128  }
0x1a1d   :  { %5406 = vsyncadd [#allocation4], 4294967168 }
0x1a1e   :  { %3640 = vsyncpa [#allocation3], 1 }
0x1a1f   :  { %3641 = vsyncpa [#allocation6], 1 }
0x1a20   :  { %3642 = vsyncpa [#allocation9], 1 }
0x1a21   :  { %3643 = vsyncpa [#allocation12], 1 }
0x1a22   :  { %3644 = vsyncpa [#allocation15], 1 }
0x1a23   :  { %3645 = vsyncpa [#allocation18], 1 }
0x1a24   :  { %3646 = vsyncpa [#allocation21], 1 }
0x1a25   :  { %3647 = vsyncpa [#allocation24], 1 }
0x1a26   :  { %3648 = vsyncpa [#allocation27], 1 }
0x1a27   :  { %3649 = vsyncpa [#allocation30], 1 }
0x1a28   :  { %3650 = vsyncpa [#allocation4], 1 }

</bundles_post_ra>
